<compile_context>
chip_gen: v7x
topology: tpu7x:2x2x1
jax: 0.10.0
libtpu: 0.0.40
codegen_flags: <defaults>
</compile_context>

<pallas_src>
import functools

import jax
import jax.numpy as jnp
from jax import lax
from jax.experimental import pallas as pl
from jax.experimental.pallas import tpu as pltpu

NEG_INF = -1e9
BANK_DTYPE = jnp.bfloat16     # MXU operand dtype (f32 accumulation everywhere)
NUM_DEC = 3                   # rnn1 / rnn2 / rnn3


# -----------------------------------------------------------------------------
# Fused decoder kernel: grid=(num_chunks,), state resident in VMEM scratch.
# -----------------------------------------------------------------------------
def hier_decoder_kernel(
    # ---- inputs --------------------------------------------------------------
    emb_ref,      # (TT, B, E)      f32   time-chunked embeddings
    wb_ref,       # (B, S*W, D)     bf16  word memory bank (sentence-contiguous)
    sb_ref,       # (B, S, D)       bf16  sentence memory bank
    smask_ref,    # (B, 1, S)       f32   additive sentence mask (0 / -1e9)
    wmask_ref,    # (B, 1, S*W)     f32   additive word mask     (0 / -1e9)
    static_ref,   # (B, 1, S)       f32   static sentence attention
    w_emb_ref,    # (E, K*4H)       bf16  layer-0 W_ih, embedding part, all K decoders
    w_ih_ref,     # (K, L, H, 4H)   bf16  W_ih (input-feed part for l=0, full for l>0)
    w_hh_ref,     # (K, L, H, 4H)   bf16
    b_ref,        # (K, L, 1, 4H)   f32
    wsw_ref,      # (D, 2D)         bf16  [W_sent | W_word] query projections
    woc_ref,      # (D, D)          bf16  linear_out, context half
    woq_ref,      # (D, D)          bf16  linear_out, query half
    h0_ref,       # (K, L, B, H)    f32
    c0_ref,       # (K, L, B, H)    f32
    if0_ref,      # (K, B, H)       f32
    # ---- outputs -------------------------------------------------------------
    dec_out_ref,  # (TT, K, B, H)   f32
    attn_out_ref, # (TT, B, K, S*W) f32
    hfin_ref,     # (K, L, B, H)    f32
    cfin_ref,     # (K, L, B, H)    f32
    # ---- VMEM scratch (persistent across the grid) ---------------------------
    h_st, c_st, if_st,
    *, K, L, B, E, H, S, W, TT, T):
  G = 4 * H
  chunk = pl.program_id(0)

  @pl.when(chunk == 0)
  def _init():
    h_st[...] = h0_ref[...]
    c_st[...] = c0_ref[...]
    if_st[...] = if0_ref[...]

  # Timestep-invariant operands (hoisted out of the recurrence; masks were built
  # once in the wrapper -- no per-step iota / compare / segment work).
  smask = smask_ref[...]
  wmask = wmask_ref[...]
  static3 = static_ref[...]
  w_emb = w_emb_ref[...]
  wsw = wsw_ref[...]
  woc = woc_ref[...]
  woq = woq_ref[...]

  def step(tt, carry):
    t_glob = chunk * TT + tt
    valid = t_glob < T                       # padded tail steps keep state frozen

    emb_bf = emb_ref[tt].astype(BANK_DTYPE)                          # (B, E)
    # Shared embedding contribution to the layer-0 gates of all K decoders:
    # one (B,E)@(E,K*4H) matmul per step (no lane concat, no K-times redundancy).
    emb_gates = jnp.dot(emb_bf, w_emb, preferred_element_type=jnp.float32)

    # ---------------- phase 1: the K stacked LSTMs ----------------
    q_list = []
    for k in range(K):
      x = if_st[k]                                                   # (B, H) input feed
      for l in range(L):
        h_old = h_st[k, l]
        c_old = c_st[k, l]
        gates = (jnp.dot(x.astype(BANK_DTYPE), w_ih_ref[k, l],
                         preferred_element_type=jnp.float32)
                 + jnp.dot(h_old.astype(BANK_DTYPE), w_hh_ref[k, l],
                           preferred_element_type=jnp.float32)
                 + b_ref[k, l])                                      # (B, 4H) f32
        if l == 0:
          gates = gates + emb_gates[:, k * G:(k + 1) * G]
        # TODO(synk): at H=32 the gate slices are sub-128-lane extracts; use an H
        # that is a multiple of 128 in production so they become free views.
        i_g = jax.nn.sigmoid(gates[:, 0 * H:1 * H])
        f_g = jax.nn.sigmoid(gates[:, 1 * H:2 * H])
        g_g = jnp.tanh(gates[:, 2 * H:3 * H])
        o_g = jax.nn.sigmoid(gates[:, 3 * H:4 * H])
        c_new = f_g * c_old + i_g * g_g
        h_new = o_g * jnp.tanh(c_new)
        h_st[k, l] = jnp.where(valid, h_new, h_old)
        c_st[k, l] = jnp.where(valid, c_new, c_old)
        x = h_new                     # inter-layer dropout p=0 -> identity
      q_list.append(x)                                               # (B, H) query

    # ---------------- phase 2: hierarchical attention, K folded ----------------
    # TODO(synk): HierarchicalAttention source is not part of the provided module;
    # standard hierarchical (sentence x word) 'general' attention with static_attn
    # mixing is implemented, using the k-th rnn output as the k-th decoder's query.
    proj_list = []
    for k in range(K):
      proj = jnp.dot(q_list[k].astype(BANK_DTYPE), wsw,
                     preferred_element_type=jnp.float32)             # (B, 2H)
      proj_list.append(proj[:, None, :])
    proj_stack = jnp.concatenate(proj_list, axis=1)                  # (B, K, 2H)
    q_s = proj_stack[:, :, :H].astype(BANK_DTYPE)                    # (B, K, H)
    q_w = proj_stack[:, :, H:2 * H].astype(BANK_DTYPE)               # (B, K, H)

    # sentence-level 'general' scores + static_attn mixing  (M = K per batch elem)
    s_sc = jnp.einsum('bkd,bsd->bks', q_s, sb_ref[...],
                      preferred_element_type=jnp.float32) + smask    # (B, K, S)
    s_exp = jnp.exp(s_sc - jnp.max(s_sc, axis=-1, keepdims=True))
    s_align = s_exp * pl.reciprocal(jnp.sum(s_exp, axis=-1, keepdims=True),
                                    approx=True)
    comb = s_align * static3
    comb = comb * pl.reciprocal(jnp.sum(comb, axis=-1, keepdims=True) + 1e-9,
                                approx=True)                         # (B, K, S)

    # word-level masked softmax, renormalized per sentence.  The additive -1e9 mask
    # underflows to exactly 0 after exp, so fully-masked sentences contribute 0.
    wb = wb_ref[...]                                                 # (B, N, D)
    w_sc = jnp.einsum('bkd,bnd->bkn', q_w, wb,
                      preferred_element_type=jnp.float32) + wmask    # (B, K, N)
    w_exp = jnp.exp(w_sc - jnp.max(w_sc, axis=-1, keepdims=True))
    # Per-sentence denominators via lane-contiguous slices (words of sentence si
    # occupy columns [si*W, (si+1)*W)) -- no one-hot segment matmuls / broadcasts.
    parts = []
    for si in range(S):
      blk = w_exp[:, :, si * W:(si + 1) * W]                         # (B, K, W)
      den = jnp.sum(blk, axis=-1, keepdims=True)                     # (B, K, 1)
      ratio = comb[:, :, si:si + 1] * pl.reciprocal(den + 1e-9, approx=True)
      parts.append(ratio * blk)
    total = jnp.concatenate(parts, axis=-1)                          # (B, K, N)

    ctx = jnp.einsum('bkn,bnd->bkd', total.astype(BANK_DTYPE), wb,
                     preferred_element_type=jnp.float32)             # (B, K, D)

    # attn_h = tanh([ctx, q] @ W_out) as split matmuls (no lane concat)
    out_list = []
    for k in range(K):
      attn_h = jnp.tanh(
          jnp.dot(ctx[:, k, :].astype(BANK_DTYPE), woc,
                  preferred_element_type=jnp.float32)
          + jnp.dot(q_list[k].astype(BANK_DTYPE), woq,
                    preferred_element_type=jnp.float32))             # (B, H)
      out_list.append(attn_h[None])
    attn_all = jnp.concatenate(out_list, axis=0)                     # (K, B, H)

    # output dropout p=0 -> identity; attn_h becomes the next input feed
    dec_out_ref[tt] = attn_all
    attn_out_ref[tt] = total
    if_st[...] = jnp.where(valid, attn_all, if_st[...])
    return carry

  lax.fori_loop(0, TT, step, 0)

  # final-state writeback only on the last grid step (saves redundant store bursts)
  @pl.when(chunk == pl.num_programs(0) - 1)
  def _fin():
    hfin_ref[...] = h_st[...]
    cfin_ref[...] = c_st[...]


# -----------------------------------------------------------------------------
# HierDecoder forward: one pallas_call for the whole T-step recurrence.
# -----------------------------------------------------------------------------
def init_decoder_state(hidden_size, h0, c0):
  """RNNDecoderState analog: hidden + zeroed input_feed."""
  B = h0.shape[1]
  return {'hidden': (h0, c0),
          'input_feed': jnp.zeros((1, B, hidden_size), jnp.float32)}


def hier_decoder_forward(params, tgt, word_memory_bank, sent_memory_bank,
                         state1, state2, state3,
                         word_memory_lengths, sent_memory_lengths, static_attn,
                         chunk_steps=8):
  T, B = tgt.shape
  Wd, _, S, D = word_memory_bank.shape
  H = D
  E = params['embedding'].shape[1]
  L = len(params['rnn'][0])
  K = NUM_DEC
  N = S * Wd

  TT = max(1, min(chunk_steps, T))
  n_chunks = (T + TT - 1) // TT
  Tpad = n_chunks * TT

  # embedding lookup (gather) stays in XLA
  emb = jnp.take(params['embedding'], tgt, axis=0).astype(jnp.float32)    # (T,B,E)
  if Tpad > T:
    emb = jnp.pad(emb, ((0, Tpad - T), (0, 0), (0, 0)))

  # batch-major, sentence-contiguous word bank; bf16 MXU operands
  wb = jnp.transpose(word_memory_bank, (1, 2, 0, 3)).reshape(B, N, D).astype(BANK_DTYPE)
  sb = jnp.transpose(sent_memory_bank, (1, 0, 2)).astype(BANK_DTYPE)

  # timestep-invariant additive masks, built once here (hoisted out of the kernel)
  slen = sent_memory_lengths.astype(jnp.int32)
  svalid = jnp.arange(S, dtype=jnp.int32)[None, :] < slen[:, None]        # (B,S)
  smask = jnp.where(svalid, 0.0, NEG_INF).astype(jnp.float32)[:, None, :]

  n_idx = jnp.arange(N, dtype=jnp.int32)
  wlen = word_memory_lengths.astype(jnp.int32)                            # (B,S)
  wlen_n = wlen[:, n_idx // Wd]                                           # (B,N)
  wvalid = (n_idx % Wd)[None, :] < wlen_n
  wmask = jnp.where(wvalid, 0.0, NEG_INF).astype(jnp.float32)[:, None, :]

  static3 = static_attn.astype(jnp.float32)[:, None, :]                   # (B,1,S)

  # LSTM weights: bf16 MXU operands; embedding part of layer 0 stacked over K so the
  # shared emb contribution is a single matmul per timestep.
  rnn = params['rnn']
  w_emb_all = jnp.concatenate([rnn[k][0]['w_ih'][:E] for k in range(K)],
                              axis=1).astype(BANK_DTYPE)                  # (E, K*4H)
  w_ih = jnp.stack([
      jnp.stack([rnn[k][0]['w_ih'][E:]] +
                [rnn[k][l]['w_ih'] for l in range(1, L)], axis=0)
      for k in range(K)], axis=0).astype(BANK_DTYPE)                      # (K,L,H,4H)
  w_hh = jnp.stack([
      jnp.stack([rnn[k][l]['w_hh'] for l in range(L)], axis=0)
      for k in range(K)], axis=0).astype(BANK_DTYPE)                      # (K,L,H,4H)
  bias = jnp.stack([
      jnp.stack([rnn[k][l]['b'] for l in range(L)], axis=0)
      for k in range(K)], axis=0).astype(jnp.float32)                     # (K,L,1,4H)

  wsw = jnp.concatenate([params['attn']['w_sent'], params['attn']['w_word']],
                        axis=1).astype(BANK_DTYPE)                        # (D, 2D)
  woc = params['attn']['w_out'][:D].astype(BANK_DTYPE)                    # (D, D)
  woq = params['attn']['w_out'][D:].astype(BANK_DTYPE)                    # (D, D)

  states = (state1, state2, state3)
  h0 = jnp.stack([s['hidden'][0] for s in states]).astype(jnp.float32)    # (K,L,B,H)
  c0 = jnp.stack([s['hidden'][1] for s in states]).astype(jnp.float32)    # (K,L,B,H)
  if0 = jnp.stack([s['input_feed'][0] for s in states]).astype(jnp.float32)  # (K,B,H)

  args = (emb, wb, sb, smask, wmask, static3, w_emb_all, w_ih, w_hh, bias,
          wsw, woc, woq, h0, c0, if0)

  def const_spec(x):
    nd = x.ndim
    return pl.BlockSpec(x.shape, lambda c, _nd=nd: (0,) * _nd)

  in_specs = [pl.BlockSpec((TT, B, E), lambda c: (c, 0, 0))]
  in_specs += [const_spec(a) for a in args[1:]]

  out_shape = (
      jax.ShapeDtypeStruct((Tpad, K, B, H), jnp.float32),   # decoder outputs
      jax.ShapeDtypeStruct((Tpad, B, K, N), jnp.float32),   # attention 'std'
      jax.ShapeDtypeStruct((K, L, B, H), jnp.float32),      # final h
      jax.ShapeDtypeStruct((K, L, B, H), jnp.float32),      # final c
  )
  out_specs = (
      pl.BlockSpec((TT, K, B, H), lambda c: (c, 0, 0, 0)),
      pl.BlockSpec((TT, B, K, N), lambda c: (c, 0, 0, 0)),
      pl.BlockSpec((K, L, B, H), lambda c: (0, 0, 0, 0)),
      pl.BlockSpec((K, L, B, H), lambda c: (0, 0, 0, 0)),
  )
  scratch_shapes = [
      pltpu.VMEM((K, L, B, H), jnp.float32),   # hidden state
      pltpu.VMEM((K, L, B, H), jnp.float32),   # cell state
      pltpu.VMEM((K, B, H), jnp.float32),      # input feed
  ]

  kernel = functools.partial(hier_decoder_kernel, K=K, L=L, B=B, E=E, H=H,
                             S=S, W=Wd, TT=TT, T=T)

  dec_out, attn_out, h_fin, c_fin = pl.pallas_call(
      kernel,
      grid=(n_chunks,),
      in_specs=in_specs,
      out_specs=out_specs,
      out_shape=out_shape,
      scratch_shapes=scratch_shapes,
      compiler_params=pltpu.CompilerParams(
          dimension_semantics=("arbitrary",),          # recurrent time-chunk axis
          vmem_limit_bytes=64 * 1024 * 1024),
  )(*args)

  dec_out = dec_out[:T]        # (T, K, B, H)
  attn_out = attn_out[:T]      # (T, B, K, N)

  results = []
  for k in range(K):
    hidden_k = (h_fin[k], c_fin[k])              # (L, B, H) each
    dec_k = dec_out[:, k]                        # (T, B, H)
    attn_k = attn_out[:, :, k]                   # (T, B, S*W)
    new_state = {'hidden': hidden_k, 'input_feed': dec_k[-1][None]}
    results += [hidden_k, dec_k, new_state, {'std': attn_k}]
  return tuple(results)


# -----------------------------------------------------------------------------
# Deterministic parameter init (shapes implied by HierDecoder.__init__,
# rnn_type='LSTM', attn_type='general', dropout=0.0). LSTM weights are stored
# pre-fused as (in_size, 4H) / (H, 4H) with gate order i, f, g, o.
# -----------------------------------------------------------------------------
def init_params(key, vocab, E, H, L):
  D = H
  ks = iter(jax.random.split(key, 64))

  def nrm(shape):
    return 0.1 * jax.random.normal(next(ks), shape, jnp.float32)

  params = {'embedding': nrm((vocab, E))}
  rnns = []
  for _ in range(NUM_DEC):                  # rnn1, rnn2, rnn3
    layers = []
    in_size = E + H                         # embedding_size + hidden_size (input feed)
    for _ in range(L):
      layers.append({'w_ih': nrm((in_size, 4 * H)),
                     'w_hh': nrm((H, 4 * H)),
                     'b': nrm((1, 4 * H))})   # b_ih + b_hh combined
      in_size = H
    rnns.append(layers)
  params['rnn'] = rnns
  # single shared HierarchicalAttention (matches self.attn in the reference)
  params['attn'] = {'w_word': nrm((D, D)),
                    'w_sent': nrm((D, D)),
                    'w_out': nrm((2 * D, D))}     # linear_out, no bias ('general')
  return params


if __name__ == "__main__":
  key = jax.random.PRNGKey(0)
  T, B, E, H, L = 3, 2, 32, 32, 2
  S, Wd, vocab = 4, 5, 16

  keys = jax.random.split(key, 10)
  params = init_params(keys[0], vocab, E, H, L)

  tgt = jax.random.randint(keys[1], (T, B), 0, vocab, dtype=jnp.int32)
  word_memory_bank = 0.1 * jax.random.normal(keys[2], (Wd, B, S, H), jnp.float32)
  sent_memory_bank = 0.1 * jax.random.normal(keys[3], (S, B, H), jnp.float32)
  word_memory_lengths = jax.random.randint(keys[4], (B, S), 1, Wd + 1, dtype=jnp.int32)
  sent_memory_lengths = jax.random.randint(keys[5], (B,), 1, S + 1, dtype=jnp.int32)
  static_attn = jax.nn.softmax(jax.random.normal(keys[6], (B, S), jnp.float32), axis=-1)

  h0 = 0.1 * jax.random.normal(keys[7], (L, B, H), jnp.float32)
  c0 = 0.1 * jax.random.normal(keys[8], (L, B, H), jnp.float32)
  state1 = init_decoder_state(H, h0, c0)
  state2 = init_decoder_state(H, h0, c0)
  state3 = init_decoder_state(H, h0, c0)

  result = hier_decoder_forward(params, tgt, word_memory_bank, sent_memory_bank,
                                state1, state2, state3,
                                word_memory_lengths, sent_memory_lengths,
                                static_attn)
  jax.block_until_ready(result)
  print("KERNEL_OK")
</pallas_src>

<mosaic_0001>
module attributes {stable_mosaic.version = 11 : i64} {
  func.func @hier_decoder_kernel(%arg0: i32, %arg1: memref<3x2x32xf32, #tpu.memory_space<vmem>>, %arg2: memref<2x20x32xbf16, #tpu.memory_space<vmem>>, %arg3: memref<2x4x32xbf16, #tpu.memory_space<vmem>>, %arg4: memref<2x1x4xf32, #tpu.memory_space<vmem>>, %arg5: memref<2x1x20xf32, #tpu.memory_space<vmem>>, %arg6: memref<2x1x4xf32, #tpu.memory_space<vmem>>, %arg7: memref<32x384xbf16, #tpu.memory_space<vmem>>, %arg8: memref<3x2x32x128xbf16, #tpu.memory_space<vmem>>, %arg9: memref<3x2x32x128xbf16, #tpu.memory_space<vmem>>, %arg10: memref<3x2x1x128xf32, #tpu.memory_space<vmem>>, %arg11: memref<32x64xbf16, #tpu.memory_space<vmem>>, %arg12: memref<32x32xbf16, #tpu.memory_space<vmem>>, %arg13: memref<32x32xbf16, #tpu.memory_space<vmem>>, %arg14: memref<3x2x2x32xf32, #tpu.memory_space<vmem>>, %arg15: memref<3x2x2x32xf32, #tpu.memory_space<vmem>>, %arg16: memref<3x2x32xf32, #tpu.memory_space<vmem>>, %arg17: memref<3x3x2x32xf32, #tpu.memory_space<vmem>>, %arg18: memref<3x2x3x20xf32, #tpu.memory_space<vmem>>, %arg19: memref<3x2x2x32xf32, #tpu.memory_space<vmem>>, %arg20: memref<3x2x2x32xf32, #tpu.memory_space<vmem>>, %arg21: memref<3x2x2x32xf32, #tpu.memory_space<vmem>>, %arg22: memref<3x2x2x32xf32, #tpu.memory_space<vmem>>, %arg23: memref<3x2x32xf32, #tpu.memory_space<vmem>>) attributes {dimension_semantics = [#tpu.dimension_semantics<arbitrary>], iteration_bounds = array<i64: 1>, scalar_prefetch = 0 : i64, scratch_operands = 3 : i64, tpu.core_type = #tpu.core_type<tc>, window_params = [{transform_indices = @transform_0, window_bounds = array<i64: 3, 2, 32>}, {pipeline_mode = #tpu.pipeline_mode<synchronous>, transform_indices = @transform_1, window_bounds = array<i64: 2, 20, 32>}, {pipeline_mode = #tpu.pipeline_mode<synchronous>, transform_indices = @transform_2, window_bounds = array<i64: 2, 4, 32>}, {pipeline_mode = #tpu.pipeline_mode<synchronous>, transform_indices = @transform_3, window_bounds = array<i64: 2, 1, 4>}, {pipeline_mode = #tpu.pipeline_mode<synchronous>, transform_indices = @transform_4, window_bounds = array<i64: 2, 1, 20>}, {pipeline_mode = #tpu.pipeline_mode<synchronous>, transform_indices = @transform_5, window_bounds = array<i64: 2, 1, 4>}, {pipeline_mode = #tpu.pipeline_mode<synchronous>, transform_indices = @transform_6, window_bounds = array<i64: 32, 384>}, {pipeline_mode = #tpu.pipeline_mode<synchronous>, transform_indices = @transform_7, window_bounds = array<i64: 3, 2, 32, 128>}, {pipeline_mode = #tpu.pipeline_mode<synchronous>, transform_indices = @transform_8, window_bounds = array<i64: 3, 2, 32, 128>}, {pipeline_mode = #tpu.pipeline_mode<synchronous>, transform_indices = @transform_9, window_bounds = array<i64: 3, 2, 1, 128>}, {pipeline_mode = #tpu.pipeline_mode<synchronous>, transform_indices = @transform_10, window_bounds = array<i64: 32, 64>}, {pipeline_mode = #tpu.pipeline_mode<synchronous>, transform_indices = @transform_11, window_bounds = array<i64: 32, 32>}, {pipeline_mode = #tpu.pipeline_mode<synchronous>, transform_indices = @transform_12, window_bounds = array<i64: 32, 32>}, {pipeline_mode = #tpu.pipeline_mode<synchronous>, transform_indices = @transform_13, window_bounds = array<i64: 3, 2, 2, 32>}, {pipeline_mode = #tpu.pipeline_mode<synchronous>, transform_indices = @transform_14, window_bounds = array<i64: 3, 2, 2, 32>}, {pipeline_mode = #tpu.pipeline_mode<synchronous>, transform_indices = @transform_15, window_bounds = array<i64: 3, 2, 32>}, {transform_indices = @transform_16, window_bounds = array<i64: 3, 3, 2, 32>}, {transform_indices = @transform_17, window_bounds = array<i64: 3, 2, 3, 20>}, {pipeline_mode = #tpu.pipeline_mode<synchronous>, transform_indices = @transform_18, window_bounds = array<i64: 3, 2, 2, 32>}, {pipeline_mode = #tpu.pipeline_mode<synchronous>, transform_indices = @transform_19, window_bounds = array<i64: 3, 2, 2, 32>}]} {
    %c0_i32 = arith.constant 0 : i32
    %0 = arith.cmpi eq, %arg0, %c0_i32 : i32
    %1 = arith.extui %0 : i1 to i32
    %c0_i32_0 = arith.constant 0 : i32
    %2 = arith.cmpi ne, %1, %c0_i32_0 : i32
    scf.if %2 {
      %c0_21 = arith.constant 0 : index
      %c0_22 = arith.constant 0 : index
      %c0_23 = arith.constant 0 : index
      %c0_24 = arith.constant 0 : index
      %14 = vector.load %arg14[%c0_21, %c0_22, %c0_23, %c0_24] : memref<3x2x2x32xf32, #tpu.memory_space<vmem>>, vector<3x2x2x32xf32>
      %c0_25 = arith.constant 0 : index
      %c0_26 = arith.constant 0 : index
      %c0_27 = arith.constant 0 : index
      %c0_28 = arith.constant 0 : index
      %15 = vector.load %arg21[%c0_25, %c0_26, %c0_27, %c0_28] : memref<3x2x2x32xf32, #tpu.memory_space<vmem>>, vector<3x2x2x32xf32>
      tpu.vector_store %arg21[%c0_25, %c0_26, %c0_27, %c0_28], %14 {strides = array<i32>} : memref<3x2x2x32xf32, #tpu.memory_space<vmem>>, vector<3x2x2x32xf32>,
      %c0_29 = arith.constant 0 : index
      %c0_30 = arith.constant 0 : index
      %c0_31 = arith.constant 0 : index
      %c0_32 = arith.constant 0 : index
      %16 = vector.load %arg15[%c0_29, %c0_30, %c0_31, %c0_32] : memref<3x2x2x32xf32, #tpu.memory_space<vmem>>, vector<3x2x2x32xf32>
      %c0_33 = arith.constant 0 : index
      %c0_34 = arith.constant 0 : index
      %c0_35 = arith.constant 0 : index
      %c0_36 = arith.constant 0 : index
      %17 = vector.load %arg22[%c0_33, %c0_34, %c0_35, %c0_36] : memref<3x2x2x32xf32, #tpu.memory_space<vmem>>, vector<3x2x2x32xf32>
      tpu.vector_store %arg22[%c0_33, %c0_34, %c0_35, %c0_36], %16 {strides = array<i32>} : memref<3x2x2x32xf32, #tpu.memory_space<vmem>>, vector<3x2x2x32xf32>,
      %c0_37 = arith.constant 0 : index
      %c0_38 = arith.constant 0 : index
      %c0_39 = arith.constant 0 : index
      %18 = vector.load %arg16[%c0_37, %c0_38, %c0_39] : memref<3x2x32xf32, #tpu.memory_space<vmem>>, vector<3x2x32xf32>
      %c0_40 = arith.constant 0 : index
      %c0_41 = arith.constant 0 : index
      %c0_42 = arith.constant 0 : index
      %19 = vector.load %arg23[%c0_40, %c0_41, %c0_42] : memref<3x2x32xf32, #tpu.memory_space<vmem>>, vector<3x2x32xf32>
      tpu.vector_store %arg23[%c0_40, %c0_41, %c0_42], %18 {strides = array<i32>} : memref<3x2x32xf32, #tpu.memory_space<vmem>>, vector<3x2x32xf32>,
    } else {
    }
    %c0 = arith.constant 0 : index
    %c0_1 = arith.constant 0 : index
    %c0_2 = arith.constant 0 : index
    %3 = vector.load %arg4[%c0, %c0_1, %c0_2] : memref<2x1x4xf32, #tpu.memory_space<vmem>>, vector<2x1x4xf32>
    %c0_3 = arith.constant 0 : index
    %c0_4 = arith.constant 0 : index
    %c0_5 = arith.constant 0 : index
    %4 = vector.load %arg5[%c0_3, %c0_4, %c0_5] : memref<2x1x20xf32, #tpu.memory_space<vmem>>, vector<2x1x20xf32>
    %c0_6 = arith.constant 0 : index
    %c0_7 = arith.constant 0 : index
    %c0_8 = arith.constant 0 : index
    %5 = vector.load %arg6[%c0_6, %c0_7, %c0_8] : memref<2x1x4xf32, #tpu.memory_space<vmem>>, vector<2x1x4xf32>
    %c0_9 = arith.constant 0 : index
    %c0_10 = arith.constant 0 : index
    %6 = vector.load %arg7[%c0_9, %c0_10] : memref<32x384xbf16, #tpu.memory_space<vmem>>, vector<32x384xbf16>
    %c0_11 = arith.constant 0 : index
    %c0_12 = arith.constant 0 : index
    %7 = vector.load %arg11[%c0_11, %c0_12] : memref<32x64xbf16, #tpu.memory_space<vmem>>, vector<32x64xbf16>
    %c0_13 = arith.constant 0 : index
    %c0_14 = arith.constant 0 : index
    %8 = vector.load %arg12[%c0_13, %c0_14] : memref<32x32xbf16, #tpu.memory_space<vmem>>, vector<32x32xbf16>
    %c0_15 = arith.constant 0 : index
    %c0_16 = arith.constant 0 : index
    %9 = vector.load %arg13[%c0_15, %c0_16] : memref<32x32xbf16, #tpu.memory_space<vmem>>, vector<32x32xbf16>
    %c0_i32_17 = arith.constant 0 : i32
    %c3_i32 = arith.constant 3 : i32
    %10 = arith.addi %c0_i32_17, %c3_i32 : i32
    %c1_i32 = arith.constant 1 : i32
    scf.for %arg24 = %c0_i32_17 to %10 step %c1_i32  : i32 {
      %c3_i32_21 = arith.constant 3 : i32
      %14 = arith.muli %arg0, %c3_i32_21 : i32
      %15 = arith.addi %14, %arg24 : i32
      %c3_i32_22 = arith.constant 3 : i32
      %16 = arith.cmpi slt, %15, %c3_i32_22 : i32
      %17 = arith.index_cast %arg24 : i32 to index
      %c0_23 = arith.constant 0 : index
      %c0_24 = arith.constant 0 : index
      %18 = vector.load %arg1[%17, %c0_23, %c0_24] : memref<3x2x32xf32, #tpu.memory_space<vmem>>, vector<1x2x32xf32>
      %19 = vector.shape_cast %18 : vector<1x2x32xf32> to vector<2x32xf32>
      %20 = arith.truncf %19 : vector<2x32xf32> to vector<2x32xbf16>
      %cst = arith.constant dense<0.000000e+00> : vector<2x384xf32>
      %21 = tpu.matmul %20, %6, %cst {dimension_numbers = #tpu.dot_dimension_numbers<[1], [0], [0], [1], [0, 0, 1, 1], [], []>} : vector<2x32xbf16>, vector<32x384xbf16>, vector<2x384xf32> -> vector<2x384xf32>
      %c0_25 = arith.constant 0 : index
      %c0_26 = arith.constant 0 : index
      %c0_27 = arith.constant 0 : index
      %22 = vector.load %arg23[%c0_25, %c0_26, %c0_27] : memref<3x2x32xf32, #tpu.memory_space<vmem>>, vector<1x2x32xf32>
      %23 = vector.shape_cast %22 : vector<1x2x32xf32> to vector<2x32xf32>
      %c0_28 = arith.constant 0 : index
      %c0_29 = arith.constant 0 : index
      %c0_30 = arith.constant 0 : index
      %c0_31 = arith.constant 0 : index
      %24 = vector.load %arg21[%c0_28, %c0_29, %c0_30, %c0_31] : memref<3x2x2x32xf32, #tpu.memory_space<vmem>>, vector<1x1x2x32xf32>
      %25 = vector.shape_cast %24 : vector<1x1x2x32xf32> to vector<2x32xf32>
      %c0_32 = arith.constant 0 : index
      %c0_33 = arith.constant 0 : index
      %c0_34 = arith.constant 0 : index
      %c0_35 = arith.constant 0 : index
      %26 = vector.load %arg22[%c0_32, %c0_33, %c0_34, %c0_35] : memref<3x2x2x32xf32, #tpu.memory_space<vmem>>, vector<1x1x2x32xf32>
      %27 = vector.shape_cast %26 : vector<1x1x2x32xf32> to vector<2x32xf32>
      %28 = arith.truncf %23 : vector<2x32xf32> to vector<2x32xbf16>
      %c0_36 = arith.constant 0 : index
      %c0_37 = arith.constant 0 : index
      %c0_38 = arith.constant 0 : index
      %c0_39 = arith.constant 0 : index
      %29 = vector.load %arg8[%c0_36, %c0_37, %c0_38, %c0_39] : memref<3x2x32x128xbf16, #tpu.memory_space<vmem>>, vector<1x1x32x128xbf16>
      %30 = vector.shape_cast %29 : vector<1x1x32x128xbf16> to vector<32x128xbf16>
      %cst_40 = arith.constant dense<0.000000e+00> : vector<2x128xf32>
      %31 = tpu.matmul %28, %30, %cst_40 {dimension_numbers = #tpu.dot_dimension_numbers<[1], [0], [0], [1], [0, 0, 1, 1], [], []>} : vector<2x32xbf16>, vector<32x128xbf16>, vector<2x128xf32> -> vector<2x128xf32>
      %32 = arith.truncf %25 : vector<2x32xf32> to vector<2x32xbf16>
      %c0_41 = arith.constant 0 : index
      %c0_42 = arith.constant 0 : index
      %c0_43 = arith.constant 0 : index
      %c0_44 = arith.constant 0 : index
      %33 = vector.load %arg9[%c0_41, %c0_42, %c0_43, %c0_44] : memref<3x2x32x128xbf16, #tpu.memory_space<vmem>>, vector<1x1x32x128xbf16>
      %34 = vector.shape_cast %33 : vector<1x1x32x128xbf16> to vector<32x128xbf16>
      %cst_45 = arith.constant dense<0.000000e+00> : vector<2x128xf32>
      %35 = tpu.matmul %32, %34, %cst_45 {dimension_numbers = #tpu.dot_dimension_numbers<[1], [0], [0], [1], [0, 0, 1, 1], [], []>} : vector<2x32xbf16>, vector<32x128xbf16>, vector<2x128xf32> -> vector<2x128xf32>
      %36 = arith.addf %31, %35 : vector<2x128xf32>
      %c0_46 = arith.constant 0 : index
      %c0_47 = arith.constant 0 : index
      %c0_48 = arith.constant 0 : index
      %c0_49 = arith.constant 0 : index
      %37 = vector.load %arg10[%c0_46, %c0_47, %c0_48, %c0_49] : memref<3x2x1x128xf32, #tpu.memory_space<vmem>>, vector<1x1x1x128xf32>
      %38 = vector.shape_cast %37 : vector<1x1x1x128xf32> to vector<1x128xf32>
      %39 = vector.broadcast %38 : vector<1x128xf32> to vector<2x128xf32>
      %40 = arith.addf %36, %39 : vector<2x128xf32>
      %41 = vector.extract_strided_slice %21 {offsets = [0, 0], sizes = [2, 128], strides = [1, 1]} : vector<2x384xf32> to vector<2x128xf32>
      %42 = arith.addf %40, %41 : vector<2x128xf32>
      %43 = vector.extract_strided_slice %42 {offsets = [0, 0], sizes = [2, 32], strides = [1, 1]} : vector<2x128xf32> to vector<2x32xf32>
      %44 = arith.negf %43 : vector<2x32xf32>
      %45 = math.exp %44 : vector<2x32xf32>
      %cst_50 = arith.constant 1.000000e+00 : f32
      %46 = vector.broadcast %cst_50 : f32 to vector<2x32xf32>
      %47 = arith.addf %46, %45 : vector<2x32xf32>
      %48 = arith.divf %46, %47 : vector<2x32xf32>
      %49 = vector.extract_strided_slice %42 {offsets = [0, 32], sizes = [2, 32], strides = [1, 1]} : vector<2x128xf32> to vector<2x32xf32>
      %50 = arith.negf %49 : vector<2x32xf32>
      %51 = math.exp %50 : vector<2x32xf32>
      %cst_51 = arith.constant 1.000000e+00 : f32
      %52 = vector.broadcast %cst_51 : f32 to vector<2x32xf32>
      %53 = arith.addf %52, %51 : vector<2x32xf32>
      %54 = arith.divf %52, %53 : vector<2x32xf32>
      %55 = vector.extract_strided_slice %42 {offsets = [0, 64], sizes = [2, 32], strides = [1, 1]} : vector<2x128xf32> to vector<2x32xf32>
      %56 = math.tanh %55 : vector<2x32xf32>
      %57 = vector.extract_strided_slice %42 {offsets = [0, 96], sizes = [2, 32], strides = [1, 1]} : vector<2x128xf32> to vector<2x32xf32>
      %58 = arith.negf %57 : vector<2x32xf32>
      %59 = math.exp %58 : vector<2x32xf32>
      %cst_52 = arith.constant 1.000000e+00 : f32
      %60 = vector.broadcast %cst_52 : f32 to vector<2x32xf32>
      %61 = arith.addf %60, %59 : vector<2x32xf32>
      %62 = arith.divf %60, %61 : vector<2x32xf32>
      %63 = arith.mulf %54, %27 : vector<2x32xf32>
      %64 = arith.mulf %48, %56 : vector<2x32xf32>
      %65 = arith.addf %63, %64 : vector<2x32xf32>
      %66 = math.tanh %65 : vector<2x32xf32>
      %67 = arith.mulf %62, %66 : vector<2x32xf32>
      %68 = arith.select %16, %67, %25 : vector<2x32xf32>
      %c0_53 = arith.constant 0 : index
      %c0_54 = arith.constant 0 : index
      %c0_55 = arith.constant 0 : index
      %c0_56 = arith.constant 0 : index
      %69 = vector.load %arg21[%c0_53, %c0_54, %c0_55, %c0_56] : memref<3x2x2x32xf32, #tpu.memory_space<vmem>>, vector<1x1x2x32xf32>
      %70 = vector.shape_cast %69 : vector<1x1x2x32xf32> to vector<2x32xf32>
      %71 = vector.shape_cast %68 : vector<2x32xf32> to vector<1x1x2x32xf32>
      tpu.vector_store %arg21[%c0_53, %c0_54, %c0_55, %c0_56], %71 {strides = array<i32>} : memref<3x2x2x32xf32, #tpu.memory_space<vmem>>, vector<1x1x2x32xf32>,
      %72 = arith.select %16, %65, %27 : vector<2x32xf32>
      %c0_57 = arith.constant 0 : index
      %c0_58 = arith.constant 0 : index
      %c0_59 = arith.constant 0 : index
      %c0_60 = arith.constant 0 : index
      %73 = vector.load %arg22[%c0_57, %c0_58, %c0_59, %c0_60] : memref<3x2x2x32xf32, #tpu.memory_space<vmem>>, vector<1x1x2x32xf32>
      %74 = vector.shape_cast %73 : vector<1x1x2x32xf32> to vector<2x32xf32>
      %75 = vector.shape_cast %72 : vector<2x32xf32> to vector<1x1x2x32xf32>
      tpu.vector_store %arg22[%c0_57, %c0_58, %c0_59, %c0_60], %75 {strides = array<i32>} : memref<3x2x2x32xf32, #tpu.memory_space<vmem>>, vector<1x1x2x32xf32>,
      %c0_61 = arith.constant 0 : index
      %c1 = arith.constant 1 : index
      %c0_62 = arith.constant 0 : index
      %c0_63 = arith.constant 0 : index
      %76 = vector.load %arg21[%c0_61, %c1, %c0_62, %c0_63] : memref<3x2x2x32xf32, #tpu.memory_space<vmem>>, vector<1x1x2x32xf32>
      %77 = vector.shape_cast %76 : vector<1x1x2x32xf32> to vector<2x32xf32>
      %c0_64 = arith.constant 0 : index
      %c1_65 = arith.constant 1 : index
      %c0_66 = arith.constant 0 : index
      %c0_67 = arith.constant 0 : index
      %78 = vector.load %arg22[%c0_64, %c1_65, %c0_66, %c0_67] : memref<3x2x2x32xf32, #tpu.memory_space<vmem>>, vector<1x1x2x32xf32>
      %79 = vector.shape_cast %78 : vector<1x1x2x32xf32> to vector<2x32xf32>
      %80 = arith.truncf %67 : vector<2x32xf32> to vector<2x32xbf16>
      %c0_68 = arith.constant 0 : index
      %c1_69 = arith.constant 1 : index
      %c0_70 = arith.constant 0 : index
      %c0_71 = arith.constant 0 : index
      %81 = vector.load %arg8[%c0_68, %c1_69, %c0_70, %c0_71] : memref<3x2x32x128xbf16, #tpu.memory_space<vmem>>, vector<1x1x32x128xbf16>
      %82 = vector.shape_cast %81 : vector<1x1x32x128xbf16> to vector<32x128xbf16>
      %cst_72 = arith.constant dense<0.000000e+00> : vector<2x128xf32>
      %83 = tpu.matmul %80, %82, %cst_72 {dimension_numbers = #tpu.dot_dimension_numbers<[1], [0], [0], [1], [0, 0, 1, 1], [], []>} : vector<2x32xbf16>, vector<32x128xbf16>, vector<2x128xf32> -> vector<2x128xf32>
      %84 = arith.truncf %77 : vector<2x32xf32> to vector<2x32xbf16>
      %c0_73 = arith.constant 0 : index
      %c1_74 = arith.constant 1 : index
      %c0_75 = arith.constant 0 : index
      %c0_76 = arith.constant 0 : index
      %85 = vector.load %arg9[%c0_73, %c1_74, %c0_75, %c0_76] : memref<3x2x32x128xbf16, #tpu.memory_space<vmem>>, vector<1x1x32x128xbf16>
      %86 = vector.shape_cast %85 : vector<1x1x32x128xbf16> to vector<32x128xbf16>
      %cst_77 = arith.constant dense<0.000000e+00> : vector<2x128xf32>
      %87 = tpu.matmul %84, %86, %cst_77 {dimension_numbers = #tpu.dot_dimension_numbers<[1], [0], [0], [1], [0, 0, 1, 1], [], []>} : vector<2x32xbf16>, vector<32x128xbf16>, vector<2x128xf32> -> vector<2x128xf32>
      %88 = arith.addf %83, %87 : vector<2x128xf32>
      %c0_78 = arith.constant 0 : index
      %c1_79 = arith.constant 1 : index
      %c0_80 = arith.constant 0 : index
      %c0_81 = arith.constant 0 : index
      %89 = vector.load %arg10[%c0_78, %c1_79, %c0_80, %c0_81] : memref<3x2x1x128xf32, #tpu.memory_space<vmem>>, vector<1x1x1x128xf32>
      %90 = vector.shape_cast %89 : vector<1x1x1x128xf32> to vector<1x128xf32>
      %91 = vector.broadcast %90 : vector<1x128xf32> to vector<2x128xf32>
      %92 = arith.addf %88, %91 : vector<2x128xf32>
      %93 = vector.extract_strided_slice %92 {offsets = [0, 0], sizes = [2, 32], strides = [1, 1]} : vector<2x128xf32> to vector<2x32xf32>
      %94 = arith.negf %93 : vector<2x32xf32>
      %95 = math.exp %94 : vector<2x32xf32>
      %cst_82 = arith.constant 1.000000e+00 : f32
      %96 = vector.broadcast %cst_82 : f32 to vector<2x32xf32>
      %97 = arith.addf %96, %95 : vector<2x32xf32>
      %98 = arith.divf %96, %97 : vector<2x32xf32>
      %99 = vector.extract_strided_slice %92 {offsets = [0, 32], sizes = [2, 32], strides = [1, 1]} : vector<2x128xf32> to vector<2x32xf32>
      %100 = arith.negf %99 : vector<2x32xf32>
      %101 = math.exp %100 : vector<2x32xf32>
      %cst_83 = arith.constant 1.000000e+00 : f32
      %102 = vector.broadcast %cst_83 : f32 to vector<2x32xf32>
      %103 = arith.addf %102, %101 : vector<2x32xf32>
      %104 = arith.divf %102, %103 : vector<2x32xf32>
      %105 = vector.extract_strided_slice %92 {offsets = [0, 64], sizes = [2, 32], strides = [1, 1]} : vector<2x128xf32> to vector<2x32xf32>
      %106 = math.tanh %105 : vector<2x32xf32>
      %107 = vector.extract_strided_slice %92 {offsets = [0, 96], sizes = [2, 32], strides = [1, 1]} : vector<2x128xf32> to vector<2x32xf32>
      %108 = arith.negf %107 : vector<2x32xf32>
      %109 = math.exp %108 : vector<2x32xf32>
      %cst_84 = arith.constant 1.000000e+00 : f32
      %110 = vector.broadcast %cst_84 : f32 to vector<2x32xf32>
      %111 = arith.addf %110, %109 : vector<2x32xf32>
      %112 = arith.divf %110, %111 : vector<2x32xf32>
      %113 = arith.mulf %104, %79 : vector<2x32xf32>
      %114 = arith.mulf %98, %106 : vector<2x32xf32>
      %115 = arith.addf %113, %114 : vector<2x32xf32>
      %116 = math.tanh %115 : vector<2x32xf32>
      %117 = arith.mulf %112, %116 : vector<2x32xf32>
      %118 = arith.select %16, %117, %77 : vector<2x32xf32>
      %c0_85 = arith.constant 0 : index
      %c1_86 = arith.constant 1 : index
      %c0_87 = arith.constant 0 : index
      %c0_88 = arith.constant 0 : index
      %119 = vector.load %arg21[%c0_85, %c1_86, %c0_87, %c0_88] : memref<3x2x2x32xf32, #tpu.memory_space<vmem>>, vector<1x1x2x32xf32>
      %120 = vector.shape_cast %119 : vector<1x1x2x32xf32> to vector<2x32xf32>
      %121 = vector.shape_cast %118 : vector<2x32xf32> to vector<1x1x2x32xf32>
      tpu.vector_store %arg21[%c0_85, %c1_86, %c0_87, %c0_88], %121 {strides = array<i32>} : memref<3x2x2x32xf32, #tpu.memory_space<vmem>>, vector<1x1x2x32xf32>,
      %122 = arith.select %16, %115, %79 : vector<2x32xf32>
      %c0_89 = arith.constant 0 : index
      %c1_90 = arith.constant 1 : index
      %c0_91 = arith.constant 0 : index
      %c0_92 = arith.constant 0 : index
      %123 = vector.load %arg22[%c0_89, %c1_90, %c0_91, %c0_92] : memref<3x2x2x32xf32, #tpu.memory_space<vmem>>, vector<1x1x2x32xf32>
      %124 = vector.shape_cast %123 : vector<1x1x2x32xf32> to vector<2x32xf32>
      %125 = vector.shape_cast %122 : vector<2x32xf32> to vector<1x1x2x32xf32>
      tpu.vector_store %arg22[%c0_89, %c1_90, %c0_91, %c0_92], %125 {strides = array<i32>} : memref<3x2x2x32xf32, #tpu.memory_space<vmem>>, vector<1x1x2x32xf32>,
      %c1_93 = arith.constant 1 : index
      %c0_94 = arith.constant 0 : index
      %c0_95 = arith.constant 0 : index
      %126 = vector.load %arg23[%c1_93, %c0_94, %c0_95] : memref<3x2x32xf32, #tpu.memory_space<vmem>>, vector<1x2x32xf32>
      %127 = vector.shape_cast %126 : vector<1x2x32xf32> to vector<2x32xf32>
      %c1_96 = arith.constant 1 : index
      %c0_97 = arith.constant 0 : index
      %c0_98 = arith.constant 0 : index
      %c0_99 = arith.constant 0 : index
      %128 = vector.load %arg21[%c1_96, %c0_97, %c0_98, %c0_99] : memref<3x2x2x32xf32, #tpu.memory_space<vmem>>, vector<1x1x2x32xf32>
      %129 = vector.shape_cast %128 : vector<1x1x2x32xf32> to vector<2x32xf32>
      %c1_100 = arith.constant 1 : index
      %c0_101 = arith.constant 0 : index
      %c0_102 = arith.constant 0 : index
      %c0_103 = arith.constant 0 : index
      %130 = vector.load %arg22[%c1_100, %c0_101, %c0_102, %c0_103] : memref<3x2x2x32xf32, #tpu.memory_space<vmem>>, vector<1x1x2x32xf32>
      %131 = vector.shape_cast %130 : vector<1x1x2x32xf32> to vector<2x32xf32>
      %132 = arith.truncf %127 : vector<2x32xf32> to vector<2x32xbf16>
      %c1_104 = arith.constant 1 : index
      %c0_105 = arith.constant 0 : index
      %c0_106 = arith.constant 0 : index
      %c0_107 = arith.constant 0 : index
      %133 = vector.load %arg8[%c1_104, %c0_105, %c0_106, %c0_107] : memref<3x2x32x128xbf16, #tpu.memory_space<vmem>>, vector<1x1x32x128xbf16>
      %134 = vector.shape_cast %133 : vector<1x1x32x128xbf16> to vector<32x128xbf16>
      %cst_108 = arith.constant dense<0.000000e+00> : vector<2x128xf32>
      %135 = tpu.matmul %132, %134, %cst_108 {dimension_numbers = #tpu.dot_dimension_numbers<[1], [0], [0], [1], [0, 0, 1, 1], [], []>} : vector<2x32xbf16>, vector<32x128xbf16>, vector<2x128xf32> -> vector<2x128xf32>
      %136 = arith.truncf %129 : vector<2x32xf32> to vector<2x32xbf16>
      %c1_109 = arith.constant 1 : index
      %c0_110 = arith.constant 0 : index
      %c0_111 = arith.constant 0 : index
      %c0_112 = arith.constant 0 : index
      %137 = vector.load %arg9[%c1_109, %c0_110, %c0_111, %c0_112] : memref<3x2x32x128xbf16, #tpu.memory_space<vmem>>, vector<1x1x32x128xbf16>
      %138 = vector.shape_cast %137 : vector<1x1x32x128xbf16> to vector<32x128xbf16>
      %cst_113 = arith.constant dense<0.000000e+00> : vector<2x128xf32>
      %139 = tpu.matmul %136, %138, %cst_113 {dimension_numbers = #tpu.dot_dimension_numbers<[1], [0], [0], [1], [0, 0, 1, 1], [], []>} : vector<2x32xbf16>, vector<32x128xbf16>, vector<2x128xf32> -> vector<2x128xf32>
      %140 = arith.addf %135, %139 : vector<2x128xf32>
      %c1_114 = arith.constant 1 : index
      %c0_115 = arith.constant 0 : index
      %c0_116 = arith.constant 0 : index
      %c0_117 = arith.constant 0 : index
      %141 = vector.load %arg10[%c1_114, %c0_115, %c0_116, %c0_117] : memref<3x2x1x128xf32, #tpu.memory_space<vmem>>, vector<1x1x1x128xf32>
      %142 = vector.shape_cast %141 : vector<1x1x1x128xf32> to vector<1x128xf32>
      %143 = vector.broadcast %142 : vector<1x128xf32> to vector<2x128xf32>
      %144 = arith.addf %140, %143 : vector<2x128xf32>
      %145 = vector.extract_strided_slice %21 {offsets = [0, 128], sizes = [2, 128], strides = [1, 1]} : vector<2x384xf32> to vector<2x128xf32>
      %146 = arith.addf %144, %145 : vector<2x128xf32>
      %147 = vector.extract_strided_slice %146 {offsets = [0, 0], sizes = [2, 32], strides = [1, 1]} : vector<2x128xf32> to vector<2x32xf32>
      %148 = arith.negf %147 : vector<2x32xf32>
      %149 = math.exp %148 : vector<2x32xf32>
      %cst_118 = arith.constant 1.000000e+00 : f32
      %150 = vector.broadcast %cst_118 : f32 to vector<2x32xf32>
      %151 = arith.addf %150, %149 : vector<2x32xf32>
      %152 = arith.divf %150, %151 : vector<2x32xf32>
      %153 = vector.extract_strided_slice %146 {offsets = [0, 32], sizes = [2, 32], strides = [1, 1]} : vector<2x128xf32> to vector<2x32xf32>
      %154 = arith.negf %153 : vector<2x32xf32>
      %155 = math.exp %154 : vector<2x32xf32>
      %cst_119 = arith.constant 1.000000e+00 : f32
      %156 = vector.broadcast %cst_119 : f32 to vector<2x32xf32>
      %157 = arith.addf %156, %155 : vector<2x32xf32>
      %158 = arith.divf %156, %157 : vector<2x32xf32>
      %159 = vector.extract_strided_slice %146 {offsets = [0, 64], sizes = [2, 32], strides = [1, 1]} : vector<2x128xf32> to vector<2x32xf32>
      %160 = math.tanh %159 : vector<2x32xf32>
      %161 = vector.extract_strided_slice %146 {offsets = [0, 96], sizes = [2, 32], strides = [1, 1]} : vector<2x128xf32> to vector<2x32xf32>
      %162 = arith.negf %161 : vector<2x32xf32>
      %163 = math.exp %162 : vector<2x32xf32>
      %cst_120 = arith.constant 1.000000e+00 : f32
      %164 = vector.broadcast %cst_120 : f32 to vector<2x32xf32>
      %165 = arith.addf %164, %163 : vector<2x32xf32>
      %166 = arith.divf %164, %165 : vector<2x32xf32>
      %167 = arith.mulf %158, %131 : vector<2x32xf32>
      %168 = arith.mulf %152, %160 : vector<2x32xf32>
      %169 = arith.addf %167, %168 : vector<2x32xf32>
      %170 = math.tanh %169 : vector<2x32xf32>
      %171 = arith.mulf %166, %170 : vector<2x32xf32>
      %172 = arith.select %16, %171, %129 : vector<2x32xf32>
      %c1_121 = arith.constant 1 : index
      %c0_122 = arith.constant 0 : index
      %c0_123 = arith.constant 0 : index
      %c0_124 = arith.constant 0 : index
      %173 = vector.load %arg21[%c1_121, %c0_122, %c0_123, %c0_124] : memref<3x2x2x32xf32, #tpu.memory_space<vmem>>, vector<1x1x2x32xf32>
      %174 = vector.shape_cast %173 : vector<1x1x2x32xf32> to vector<2x32xf32>
      %175 = vector.shape_cast %172 : vector<2x32xf32> to vector<1x1x2x32xf32>
      tpu.vector_store %arg21[%c1_121, %c0_122, %c0_123, %c0_124], %175 {strides = array<i32>} : memref<3x2x2x32xf32, #tpu.memory_space<vmem>>, vector<1x1x2x32xf32>,
      %176 = arith.select %16, %169, %131 : vector<2x32xf32>
      %c1_125 = arith.constant 1 : index
      %c0_126 = arith.constant 0 : index
      %c0_127 = arith.constant 0 : index
      %c0_128 = arith.constant 0 : index
      %177 = vector.load %arg22[%c1_125, %c0_126, %c0_127, %c0_128] : memref<3x2x2x32xf32, #tpu.memory_space<vmem>>, vector<1x1x2x32xf32>
      %178 = vector.shape_cast %177 : vector<1x1x2x32xf32> to vector<2x32xf32>
      %179 = vector.shape_cast %176 : vector<2x32xf32> to vector<1x1x2x32xf32>
      tpu.vector_store %arg22[%c1_125, %c0_126, %c0_127, %c0_128], %179 {strides = array<i32>} : memref<3x2x2x32xf32, #tpu.memory_space<vmem>>, vector<1x1x2x32xf32>,
      %c1_129 = arith.constant 1 : index
      %c1_130 = arith.constant 1 : index
      %c0_131 = arith.constant 0 : index
      %c0_132 = arith.constant 0 : index
      %180 = vector.load %arg21[%c1_129, %c1_130, %c0_131, %c0_132] : memref<3x2x2x32xf32, #tpu.memory_space<vmem>>, vector<1x1x2x32xf32>
      %181 = vector.shape_cast %180 : vector<1x1x2x32xf32> to vector<2x32xf32>
      %c1_133 = arith.constant 1 : index
      %c1_134 = arith.constant 1 : index
      %c0_135 = arith.constant 0 : index
      %c0_136 = arith.constant 0 : index
      %182 = vector.load %arg22[%c1_133, %c1_134, %c0_135, %c0_136] : memref<3x2x2x32xf32, #tpu.memory_space<vmem>>, vector<1x1x2x32xf32>
      %183 = vector.shape_cast %182 : vector<1x1x2x32xf32> to vector<2x32xf32>
      %184 = arith.truncf %171 : vector<2x32xf32> to vector<2x32xbf16>
      %c1_137 = arith.constant 1 : index
      %c1_138 = arith.constant 1 : index
      %c0_139 = arith.constant 0 : index
      %c0_140 = arith.constant 0 : index
      %185 = vector.load %arg8[%c1_137, %c1_138, %c0_139, %c0_140] : memref<3x2x32x128xbf16, #tpu.memory_space<vmem>>, vector<1x1x32x128xbf16>
      %186 = vector.shape_cast %185 : vector<1x1x32x128xbf16> to vector<32x128xbf16>
      %cst_141 = arith.constant dense<0.000000e+00> : vector<2x128xf32>
      %187 = tpu.matmul %184, %186, %cst_141 {dimension_numbers = #tpu.dot_dimension_numbers<[1], [0], [0], [1], [0, 0, 1, 1], [], []>} : vector<2x32xbf16>, vector<32x128xbf16>, vector<2x128xf32> -> vector<2x128xf32>
      %188 = arith.truncf %181 : vector<2x32xf32> to vector<2x32xbf16>
      %c1_142 = arith.constant 1 : index
      %c1_143 = arith.constant 1 : index
      %c0_144 = arith.constant 0 : index
      %c0_145 = arith.constant 0 : index
      %189 = vector.load %arg9[%c1_142, %c1_143, %c0_144, %c0_145] : memref<3x2x32x128xbf16, #tpu.memory_space<vmem>>, vector<1x1x32x128xbf16>
      %190 = vector.shape_cast %189 : vector<1x1x32x128xbf16> to vector<32x128xbf16>
      %cst_146 = arith.constant dense<0.000000e+00> : vector<2x128xf32>
      %191 = tpu.matmul %188, %190, %cst_146 {dimension_numbers = #tpu.dot_dimension_numbers<[1], [0], [0], [1], [0, 0, 1, 1], [], []>} : vector<2x32xbf16>, vector<32x128xbf16>, vector<2x128xf32> -> vector<2x128xf32>
      %192 = arith.addf %187, %191 : vector<2x128xf32>
      %c1_147 = arith.constant 1 : index
      %c1_148 = arith.constant 1 : index
      %c0_149 = arith.constant 0 : index
      %c0_150 = arith.constant 0 : index
      %193 = vector.load %arg10[%c1_147, %c1_148, %c0_149, %c0_150] : memref<3x2x1x128xf32, #tpu.memory_space<vmem>>, vector<1x1x1x128xf32>
      %194 = vector.shape_cast %193 : vector<1x1x1x128xf32> to vector<1x128xf32>
      %195 = vector.broadcast %194 : vector<1x128xf32> to vector<2x128xf32>
      %196 = arith.addf %192, %195 : vector<2x128xf32>
      %197 = vector.extract_strided_slice %196 {offsets = [0, 0], sizes = [2, 32], strides = [1, 1]} : vector<2x128xf32> to vector<2x32xf32>
      %198 = arith.negf %197 : vector<2x32xf32>
      %199 = math.exp %198 : vector<2x32xf32>
      %cst_151 = arith.constant 1.000000e+00 : f32
      %200 = vector.broadcast %cst_151 : f32 to vector<2x32xf32>
      %201 = arith.addf %200, %199 : vector<2x32xf32>
      %202 = arith.divf %200, %201 : vector<2x32xf32>
      %203 = vector.extract_strided_slice %196 {offsets = [0, 32], sizes = [2, 32], strides = [1, 1]} : vector<2x128xf32> to vector<2x32xf32>
      %204 = arith.negf %203 : vector<2x32xf32>
      %205 = math.exp %204 : vector<2x32xf32>
      %cst_152 = arith.constant 1.000000e+00 : f32
      %206 = vector.broadcast %cst_152 : f32 to vector<2x32xf32>
      %207 = arith.addf %206, %205 : vector<2x32xf32>
      %208 = arith.divf %206, %207 : vector<2x32xf32>
      %209 = vector.extract_strided_slice %196 {offsets = [0, 64], sizes = [2, 32], strides = [1, 1]} : vector<2x128xf32> to vector<2x32xf32>
      %210 = math.tanh %209 : vector<2x32xf32>
      %211 = vector.extract_strided_slice %196 {offsets = [0, 96], sizes = [2, 32], strides = [1, 1]} : vector<2x128xf32> to vector<2x32xf32>
      %212 = arith.negf %211 : vector<2x32xf32>
      %213 = math.exp %212 : vector<2x32xf32>
      %cst_153 = arith.constant 1.000000e+00 : f32
      %214 = vector.broadcast %cst_153 : f32 to vector<2x32xf32>
      %215 = arith.addf %214, %213 : vector<2x32xf32>
      %216 = arith.divf %214, %215 : vector<2x32xf32>
      %217 = arith.mulf %208, %183 : vector<2x32xf32>
      %218 = arith.mulf %202, %210 : vector<2x32xf32>
      %219 = arith.addf %217, %218 : vector<2x32xf32>
      %220 = math.tanh %219 : vector<2x32xf32>
      %221 = arith.mulf %216, %220 : vector<2x32xf32>
      %222 = arith.select %16, %221, %181 : vector<2x32xf32>
      %c1_154 = arith.constant 1 : index
      %c1_155 = arith.constant 1 : index
      %c0_156 = arith.constant 0 : index
      %c0_157 = arith.constant 0 : index
      %223 = vector.load %arg21[%c1_154, %c1_155, %c0_156, %c0_157] : memref<3x2x2x32xf32, #tpu.memory_space<vmem>>, vector<1x1x2x32xf32>
      %224 = vector.shape_cast %223 : vector<1x1x2x32xf32> to vector<2x32xf32>
      %225 = vector.shape_cast %222 : vector<2x32xf32> to vector<1x1x2x32xf32>
      tpu.vector_store %arg21[%c1_154, %c1_155, %c0_156, %c0_157], %225 {strides = array<i32>} : memref<3x2x2x32xf32, #tpu.memory_space<vmem>>, vector<1x1x2x32xf32>,
      %226 = arith.select %16, %219, %183 : vector<2x32xf32>
      %c1_158 = arith.constant 1 : index
      %c1_159 = arith.constant 1 : index
      %c0_160 = arith.constant 0 : index
      %c0_161 = arith.constant 0 : index
      %227 = vector.load %arg22[%c1_158, %c1_159, %c0_160, %c0_161] : memref<3x2x2x32xf32, #tpu.memory_space<vmem>>, vector<1x1x2x32xf32>
      %228 = vector.shape_cast %227 : vector<1x1x2x32xf32> to vector<2x32xf32>
      %229 = vector.shape_cast %226 : vector<2x32xf32> to vector<1x1x2x32xf32>
      tpu.vector_store %arg22[%c1_158, %c1_159, %c0_160, %c0_161], %229 {strides = array<i32>} : memref<3x2x2x32xf32, #tpu.memory_space<vmem>>, vector<1x1x2x32xf32>,
      %c2 = arith.constant 2 : index
      %c0_162 = arith.constant 0 : index
      %c0_163 = arith.constant 0 : index
      %230 = vector.load %arg23[%c2, %c0_162, %c0_163] : memref<3x2x32xf32, #tpu.memory_space<vmem>>, vector<1x2x32xf32>
      %231 = vector.shape_cast %230 : vector<1x2x32xf32> to vector<2x32xf32>
      %c2_164 = arith.constant 2 : index
      %c0_165 = arith.constant 0 : index
      %c0_166 = arith.constant 0 : index
      %c0_167 = arith.constant 0 : index
      %232 = vector.load %arg21[%c2_164, %c0_165, %c0_166, %c0_167] : memref<3x2x2x32xf32, #tpu.memory_space<vmem>>, vector<1x1x2x32xf32>
      %233 = vector.shape_cast %232 : vector<1x1x2x32xf32> to vector<2x32xf32>
      %c2_168 = arith.constant 2 : index
      %c0_169 = arith.constant 0 : index
      %c0_170 = arith.constant 0 : index
      %c0_171 = arith.constant 0 : index
      %234 = vector.load %arg22[%c2_168, %c0_169, %c0_170, %c0_171] : memref<3x2x2x32xf32, #tpu.memory_space<vmem>>, vector<1x1x2x32xf32>
      %235 = vector.shape_cast %234 : vector<1x1x2x32xf32> to vector<2x32xf32>
      %236 = arith.truncf %231 : vector<2x32xf32> to vector<2x32xbf16>
      %c2_172 = arith.constant 2 : index
      %c0_173 = arith.constant 0 : index
      %c0_174 = arith.constant 0 : index
      %c0_175 = arith.constant 0 : index
      %237 = vector.load %arg8[%c2_172, %c0_173, %c0_174, %c0_175] : memref<3x2x32x128xbf16, #tpu.memory_space<vmem>>, vector<1x1x32x128xbf16>
      %238 = vector.shape_cast %237 : vector<1x1x32x128xbf16> to vector<32x128xbf16>
      %cst_176 = arith.constant dense<0.000000e+00> : vector<2x128xf32>
      %239 = tpu.matmul %236, %238, %cst_176 {dimension_numbers = #tpu.dot_dimension_numbers<[1], [0], [0], [1], [0, 0, 1, 1], [], []>} : vector<2x32xbf16>, vector<32x128xbf16>, vector<2x128xf32> -> vector<2x128xf32>
      %240 = arith.truncf %233 : vector<2x32xf32> to vector<2x32xbf16>
      %c2_177 = arith.constant 2 : index
      %c0_178 = arith.constant 0 : index
      %c0_179 = arith.constant 0 : index
      %c0_180 = arith.constant 0 : index
      %241 = vector.load %arg9[%c2_177, %c0_178, %c0_179, %c0_180] : memref<3x2x32x128xbf16, #tpu.memory_space<vmem>>, vector<1x1x32x128xbf16>
      %242 = vector.shape_cast %241 : vector<1x1x32x128xbf16> to vector<32x128xbf16>
      %cst_181 = arith.constant dense<0.000000e+00> : vector<2x128xf32>
      %243 = tpu.matmul %240, %242, %cst_181 {dimension_numbers = #tpu.dot_dimension_numbers<[1], [0], [0], [1], [0, 0, 1, 1], [], []>} : vector<2x32xbf16>, vector<32x128xbf16>, vector<2x128xf32> -> vector<2x128xf32>
      %244 = arith.addf %239, %243 : vector<2x128xf32>
      %c2_182 = arith.constant 2 : index
      %c0_183 = arith.constant 0 : index
      %c0_184 = arith.constant 0 : index
      %c0_185 = arith.constant 0 : index
      %245 = vector.load %arg10[%c2_182, %c0_183, %c0_184, %c0_185] : memref<3x2x1x128xf32, #tpu.memory_space<vmem>>, vector<1x1x1x128xf32>
      %246 = vector.shape_cast %245 : vector<1x1x1x128xf32> to vector<1x128xf32>
      %247 = vector.broadcast %246 : vector<1x128xf32> to vector<2x128xf32>
      %248 = arith.addf %244, %247 : vector<2x128xf32>
      %249 = vector.extract_strided_slice %21 {offsets = [0, 256], sizes = [2, 128], strides = [1, 1]} : vector<2x384xf32> to vector<2x128xf32>
      %250 = arith.addf %248, %249 : vector<2x128xf32>
      %251 = vector.extract_strided_slice %250 {offsets = [0, 0], sizes = [2, 32], strides = [1, 1]} : vector<2x128xf32> to vector<2x32xf32>
      %252 = arith.negf %251 : vector<2x32xf32>
      %253 = math.exp %252 : vector<2x32xf32>
      %cst_186 = arith.constant 1.000000e+00 : f32
      %254 = vector.broadcast %cst_186 : f32 to vector<2x32xf32>
      %255 = arith.addf %254, %253 : vector<2x32xf32>
      %256 = arith.divf %254, %255 : vector<2x32xf32>
      %257 = vector.extract_strided_slice %250 {offsets = [0, 32], sizes = [2, 32], strides = [1, 1]} : vector<2x128xf32> to vector<2x32xf32>
      %258 = arith.negf %257 : vector<2x32xf32>
      %259 = math.exp %258 : vector<2x32xf32>
      %cst_187 = arith.constant 1.000000e+00 : f32
      %260 = vector.broadcast %cst_187 : f32 to vector<2x32xf32>
      %261 = arith.addf %260, %259 : vector<2x32xf32>
      %262 = arith.divf %260, %261 : vector<2x32xf32>
      %263 = vector.extract_strided_slice %250 {offsets = [0, 64], sizes = [2, 32], strides = [1, 1]} : vector<2x128xf32> to vector<2x32xf32>
      %264 = math.tanh %263 : vector<2x32xf32>
      %265 = vector.extract_strided_slice %250 {offsets = [0, 96], sizes = [2, 32], strides = [1, 1]} : vector<2x128xf32> to vector<2x32xf32>
      %266 = arith.negf %265 : vector<2x32xf32>
      %267 = math.exp %266 : vector<2x32xf32>
      %cst_188 = arith.constant 1.000000e+00 : f32
      %268 = vector.broadcast %cst_188 : f32 to vector<2x32xf32>
      %269 = arith.addf %268, %267 : vector<2x32xf32>
      %270 = arith.divf %268, %269 : vector<2x32xf32>
      %271 = arith.mulf %262, %235 : vector<2x32xf32>
      %272 = arith.mulf %256, %264 : vector<2x32xf32>
      %273 = arith.addf %271, %272 : vector<2x32xf32>
      %274 = math.tanh %273 : vector<2x32xf32>
      %275 = arith.mulf %270, %274 : vector<2x32xf32>
      %276 = arith.select %16, %275, %233 : vector<2x32xf32>
      %c2_189 = arith.constant 2 : index
      %c0_190 = arith.constant 0 : index
      %c0_191 = arith.constant 0 : index
      %c0_192 = arith.constant 0 : index
      %277 = vector.load %arg21[%c2_189, %c0_190, %c0_191, %c0_192] : memref<3x2x2x32xf32, #tpu.memory_space<vmem>>, vector<1x1x2x32xf32>
      %278 = vector.shape_cast %277 : vector<1x1x2x32xf32> to vector<2x32xf32>
      %279 = vector.shape_cast %276 : vector<2x32xf32> to vector<1x1x2x32xf32>
      tpu.vector_store %arg21[%c2_189, %c0_190, %c0_191, %c0_192], %279 {strides = array<i32>} : memref<3x2x2x32xf32, #tpu.memory_space<vmem>>, vector<1x1x2x32xf32>,
      %280 = arith.select %16, %273, %235 : vector<2x32xf32>
      %c2_193 = arith.constant 2 : index
      %c0_194 = arith.constant 0 : index
      %c0_195 = arith.constant 0 : index
      %c0_196 = arith.constant 0 : index
      %281 = vector.load %arg22[%c2_193, %c0_194, %c0_195, %c0_196] : memref<3x2x2x32xf32, #tpu.memory_space<vmem>>, vector<1x1x2x32xf32>
      %282 = vector.shape_cast %281 : vector<1x1x2x32xf32> to vector<2x32xf32>
      %283 = vector.shape_cast %280 : vector<2x32xf32> to vector<1x1x2x32xf32>
      tpu.vector_store %arg22[%c2_193, %c0_194, %c0_195, %c0_196], %283 {strides = array<i32>} : memref<3x2x2x32xf32, #tpu.memory_space<vmem>>, vector<1x1x2x32xf32>,
      %c2_197 = arith.constant 2 : index
      %c1_198 = arith.constant 1 : index
      %c0_199 = arith.constant 0 : index
      %c0_200 = arith.constant 0 : index
      %284 = vector.load %arg21[%c2_197, %c1_198, %c0_199, %c0_200] : memref<3x2x2x32xf32, #tpu.memory_space<vmem>>, vector<1x1x2x32xf32>
      %285 = vector.shape_cast %284 : vector<1x1x2x32xf32> to vector<2x32xf32>
      %c2_201 = arith.constant 2 : index
      %c1_202 = arith.constant 1 : index
      %c0_203 = arith.constant 0 : index
      %c0_204 = arith.constant 0 : index
      %286 = vector.load %arg22[%c2_201, %c1_202, %c0_203, %c0_204] : memref<3x2x2x32xf32, #tpu.memory_space<vmem>>, vector<1x1x2x32xf32>
      %287 = vector.shape_cast %286 : vector<1x1x2x32xf32> to vector<2x32xf32>
      %288 = arith.truncf %275 : vector<2x32xf32> to vector<2x32xbf16>
      %c2_205 = arith.constant 2 : index
      %c1_206 = arith.constant 1 : index
      %c0_207 = arith.constant 0 : index
      %c0_208 = arith.constant 0 : index
      %289 = vector.load %arg8[%c2_205, %c1_206, %c0_207, %c0_208] : memref<3x2x32x128xbf16, #tpu.memory_space<vmem>>, vector<1x1x32x128xbf16>
      %290 = vector.shape_cast %289 : vector<1x1x32x128xbf16> to vector<32x128xbf16>
      %cst_209 = arith.constant dense<0.000000e+00> : vector<2x128xf32>
      %291 = tpu.matmul %288, %290, %cst_209 {dimension_numbers = #tpu.dot_dimension_numbers<[1], [0], [0], [1], [0, 0, 1, 1], [], []>} : vector<2x32xbf16>, vector<32x128xbf16>, vector<2x128xf32> -> vector<2x128xf32>
      %292 = arith.truncf %285 : vector<2x32xf32> to vector<2x32xbf16>
      %c2_210 = arith.constant 2 : index
      %c1_211 = arith.constant 1 : index
      %c0_212 = arith.constant 0 : index
      %c0_213 = arith.constant 0 : index
      %293 = vector.load %arg9[%c2_210, %c1_211, %c0_212, %c0_213] : memref<3x2x32x128xbf16, #tpu.memory_space<vmem>>, vector<1x1x32x128xbf16>
      %294 = vector.shape_cast %293 : vector<1x1x32x128xbf16> to vector<32x128xbf16>
      %cst_214 = arith.constant dense<0.000000e+00> : vector<2x128xf32>
      %295 = tpu.matmul %292, %294, %cst_214 {dimension_numbers = #tpu.dot_dimension_numbers<[1], [0], [0], [1], [0, 0, 1, 1], [], []>} : vector<2x32xbf16>, vector<32x128xbf16>, vector<2x128xf32> -> vector<2x128xf32>
      %296 = arith.addf %291, %295 : vector<2x128xf32>
      %c2_215 = arith.constant 2 : index
      %c1_216 = arith.constant 1 : index
      %c0_217 = arith.constant 0 : index
      %c0_218 = arith.constant 0 : index
      %297 = vector.load %arg10[%c2_215, %c1_216, %c0_217, %c0_218] : memref<3x2x1x128xf32, #tpu.memory_space<vmem>>, vector<1x1x1x128xf32>
      %298 = vector.shape_cast %297 : vector<1x1x1x128xf32> to vector<1x128xf32>
      %299 = vector.broadcast %298 : vector<1x128xf32> to vector<2x128xf32>
      %300 = arith.addf %296, %299 : vector<2x128xf32>
      %301 = vector.extract_strided_slice %300 {offsets = [0, 0], sizes = [2, 32], strides = [1, 1]} : vector<2x128xf32> to vector<2x32xf32>
      %302 = arith.negf %301 : vector<2x32xf32>
      %303 = math.exp %302 : vector<2x32xf32>
      %cst_219 = arith.constant 1.000000e+00 : f32
      %304 = vector.broadcast %cst_219 : f32 to vector<2x32xf32>
      %305 = arith.addf %304, %303 : vector<2x32xf32>
      %306 = arith.divf %304, %305 : vector<2x32xf32>
      %307 = vector.extract_strided_slice %300 {offsets = [0, 32], sizes = [2, 32], strides = [1, 1]} : vector<2x128xf32> to vector<2x32xf32>
      %308 = arith.negf %307 : vector<2x32xf32>
      %309 = math.exp %308 : vector<2x32xf32>
      %cst_220 = arith.constant 1.000000e+00 : f32
      %310 = vector.broadcast %cst_220 : f32 to vector<2x32xf32>
      %311 = arith.addf %310, %309 : vector<2x32xf32>
      %312 = arith.divf %310, %311 : vector<2x32xf32>
      %313 = vector.extract_strided_slice %300 {offsets = [0, 64], sizes = [2, 32], strides = [1, 1]} : vector<2x128xf32> to vector<2x32xf32>
      %314 = math.tanh %313 : vector<2x32xf32>
      %315 = vector.extract_strided_slice %300 {offsets = [0, 96], sizes = [2, 32], strides = [1, 1]} : vector<2x128xf32> to vector<2x32xf32>
      %316 = arith.negf %315 : vector<2x32xf32>
      %317 = math.exp %316 : vector<2x32xf32>
      %cst_221 = arith.constant 1.000000e+00 : f32
      %318 = vector.broadcast %cst_221 : f32 to vector<2x32xf32>
      %319 = arith.addf %318, %317 : vector<2x32xf32>
      %320 = arith.divf %318, %319 : vector<2x32xf32>
      %321 = arith.mulf %312, %287 : vector<2x32xf32>
      %322 = arith.mulf %306, %314 : vector<2x32xf32>
      %323 = arith.addf %321, %322 : vector<2x32xf32>
      %324 = math.tanh %323 : vector<2x32xf32>
      %325 = arith.mulf %320, %324 : vector<2x32xf32>
      %326 = arith.select %16, %325, %285 : vector<2x32xf32>
      %c2_222 = arith.constant 2 : index
      %c1_223 = arith.constant 1 : index
      %c0_224 = arith.constant 0 : index
      %c0_225 = arith.constant 0 : index
      %327 = vector.load %arg21[%c2_222, %c1_223, %c0_224, %c0_225] : memref<3x2x2x32xf32, #tpu.memory_space<vmem>>, vector<1x1x2x32xf32>
      %328 = vector.shape_cast %327 : vector<1x1x2x32xf32> to vector<2x32xf32>
      %329 = vector.shape_cast %326 : vector<2x32xf32> to vector<1x1x2x32xf32>
      tpu.vector_store %arg21[%c2_222, %c1_223, %c0_224, %c0_225], %329 {strides = array<i32>} : memref<3x2x2x32xf32, #tpu.memory_space<vmem>>, vector<1x1x2x32xf32>,
      %330 = arith.select %16, %323, %287 : vector<2x32xf32>
      %c2_226 = arith.constant 2 : index
      %c1_227 = arith.constant 1 : index
      %c0_228 = arith.constant 0 : index
      %c0_229 = arith.constant 0 : index
      %331 = vector.load %arg22[%c2_226, %c1_227, %c0_228, %c0_229] : memref<3x2x2x32xf32, #tpu.memory_space<vmem>>, vector<1x1x2x32xf32>
      %332 = vector.shape_cast %331 : vector<1x1x2x32xf32> to vector<2x32xf32>
      %333 = vector.shape_cast %330 : vector<2x32xf32> to vector<1x1x2x32xf32>
      tpu.vector_store %arg22[%c2_226, %c1_227, %c0_228, %c0_229], %333 {strides = array<i32>} : memref<3x2x2x32xf32, #tpu.memory_space<vmem>>, vector<1x1x2x32xf32>,
      %334 = arith.truncf %117 : vector<2x32xf32> to vector<2x32xbf16>
      %cst_230 = arith.constant dense<0.000000e+00> : vector<2x64xf32>
      %335 = tpu.matmul %334, %7, %cst_230 {dimension_numbers = #tpu.dot_dimension_numbers<[1], [0], [0], [1], [0, 0, 1, 1], [], []>} : vector<2x32xbf16>, vector<32x64xbf16>, vector<2x64xf32> -> vector<2x64xf32>
      %336 = vector.shape_cast %335 : vector<2x64xf32> to vector<2x1x64xf32>
      %337 = arith.truncf %221 : vector<2x32xf32> to vector<2x32xbf16>
      %cst_231 = arith.constant dense<0.000000e+00> : vector<2x64xf32>
      %338 = tpu.matmul %337, %7, %cst_231 {dimension_numbers = #tpu.dot_dimension_numbers<[1], [0], [0], [1], [0, 0, 1, 1], [], []>} : vector<2x32xbf16>, vector<32x64xbf16>, vector<2x64xf32> -> vector<2x64xf32>
      %339 = vector.shape_cast %338 : vector<2x64xf32> to vector<2x1x64xf32>
      %340 = arith.truncf %325 : vector<2x32xf32> to vector<2x32xbf16>
      %cst_232 = arith.constant dense<0.000000e+00> : vector<2x64xf32>
      %341 = tpu.matmul %340, %7, %cst_232 {dimension_numbers = #tpu.dot_dimension_numbers<[1], [0], [0], [1], [0, 0, 1, 1], [], []>} : vector<2x32xbf16>, vector<32x64xbf16>, vector<2x64xf32> -> vector<2x64xf32>
      %342 = vector.shape_cast %341 : vector<2x64xf32> to vector<2x1x64xf32>
      %343 = tpu.concatenate %336, %339, %342 in 1 : vector<2x1x64xf32>, vector<2x1x64xf32>, vector<2x1x64xf32> -> vector<2x3x64xf32>
      %344 = vector.extract_strided_slice %343 {offsets = [0, 0, 0], sizes = [2, 3, 32], strides = [1, 1, 1]} : vector<2x3x64xf32> to vector<2x3x32xf32>
      %345 = arith.truncf %344 : vector<2x3x32xf32> to vector<2x3x32xbf16>
      %346 = vector.extract_strided_slice %343 {offsets = [0, 0, 32], sizes = [2, 3, 32], strides = [1, 1, 1]} : vector<2x3x64xf32> to vector<2x3x32xf32>
      %347 = arith.truncf %346 : vector<2x3x32xf32> to vector<2x3x32xbf16>
      %c0_233 = arith.constant 0 : index
      %c0_234 = arith.constant 0 : index
      %c0_235 = arith.constant 0 : index
      %348 = vector.load %arg3[%c0_233, %c0_234, %c0_235] : memref<2x4x32xbf16, #tpu.memory_space<vmem>>, vector<2x4x32xbf16>
      "tpu.trace_start"() <{level = 10 : i32, message = "bkd,bsd->bks"}> : () -> ()
      %cst_236 = arith.constant dense<0.000000e+00> : vector<2x3x4xf32>
      %349 = tpu.matmul %345, %348, %cst_236 {dimension_numbers = #tpu.dot_dimension_numbers<[2], [2], [1], [1], [0, 0, 0, 1, 1, 1], [0], [0]>} : vector<2x3x32xbf16>, vector<2x4x32xbf16>, vector<2x3x4xf32> -> vector<2x3x4xf32>
      "tpu.trace_stop"() : () -> ()
      %350 = vector.broadcast %3 : vector<2x1x4xf32> to vector<2x3x4xf32>
      %351 = arith.addf %349, %350 : vector<2x3x4xf32>
      %cst_237 = arith.constant dense<0xFF800000> : vector<2x3xf32>
      %352 = vector.multi_reduction <maximumf>, %351, %cst_237 [2] : vector<2x3x4xf32> to vector<2x3xf32>
      %353 = vector.shape_cast %352 : vector<2x3xf32> to vector<2x3x1xf32>
      %354 = vector.broadcast %353 : vector<2x3x1xf32> to vector<2x3x4xf32>
      %355 = arith.subf %351, %354 : vector<2x3x4xf32>
      %356 = math.exp %355 : vector<2x3x4xf32>
      %cst_238 = arith.constant dense<0.000000e+00> : vector<2x3xf32>
      %357 = vector.multi_reduction <add>, %356, %cst_238 [2] : vector<2x3x4xf32> to vector<2x3xf32>
      %358 = vector.shape_cast %357 : vector<2x3xf32> to vector<2x3x1xf32>
      %359 = tpu.reciprocal %358 {approx = true} : vector<2x3x1xf32> -> vector<2x3x1xf32>
      %360 = vector.broadcast %359 : vector<2x3x1xf32> to vector<2x3x4xf32>
      %361 = arith.mulf %356, %360 : vector<2x3x4xf32>
      %362 = vector.broadcast %5 : vector<2x1x4xf32> to vector<2x3x4xf32>
      %363 = arith.mulf %361, %362 : vector<2x3x4xf32>
      %cst_239 = arith.constant dense<0.000000e+00> : vector<2x3xf32>
      %364 = vector.multi_reduction <add>, %363, %cst_239 [2] : vector<2x3x4xf32> to vector<2x3xf32>
      %365 = vector.shape_cast %364 : vector<2x3xf32> to vector<2x3x1xf32>
      %cst_240 = arith.constant 9.99999971E-10 : f32
      %366 = vector.broadcast %cst_240 : f32 to vector<2x3x1xf32>
      %367 = arith.addf %365, %366 : vector<2x3x1xf32>
      %368 = tpu.reciprocal %367 {approx = true} : vector<2x3x1xf32> -> vector<2x3x1xf32>
      %369 = vector.broadcast %368 : vector<2x3x1xf32> to vector<2x3x4xf32>
      %370 = arith.mulf %363, %369 : vector<2x3x4xf32>
      %c0_241 = arith.constant 0 : index
      %c0_242 = arith.constant 0 : index
      %c0_243 = arith.constant 0 : index
      %371 = vector.load %arg2[%c0_241, %c0_242, %c0_243] : memref<2x20x32xbf16, #tpu.memory_space<vmem>>, vector<2x20x32xbf16>
      "tpu.trace_start"() <{level = 10 : i32, message = "bkd,bnd->bkn"}> : () -> ()
      %cst_244 = arith.constant dense<0.000000e+00> : vector<2x3x20xf32>
      %372 = tpu.matmul %347, %371, %cst_244 {dimension_numbers = #tpu.dot_dimension_numbers<[2], [2], [1], [1], [0, 0, 0, 1, 1, 1], [0], [0]>} : vector<2x3x32xbf16>, vector<2x20x32xbf16>, vector<2x3x20xf32> -> vector<2x3x20xf32>
      "tpu.trace_stop"() : () -> ()
      %373 = vector.broadcast %4 : vector<2x1x20xf32> to vector<2x3x20xf32>
      %374 = arith.addf %372, %373 : vector<2x3x20xf32>
      %cst_245 = arith.constant dense<0xFF800000> : vector<2x3xf32>
      %375 = vector.multi_reduction <maximumf>, %374, %cst_245 [2] : vector<2x3x20xf32> to vector<2x3xf32>
      %376 = vector.shape_cast %375 : vector<2x3xf32> to vector<2x3x1xf32>
      %377 = vector.broadcast %376 : vector<2x3x1xf32> to vector<2x3x20xf32>
      %378 = arith.subf %374, %377 : vector<2x3x20xf32>
      %379 = math.exp %378 : vector<2x3x20xf32>
      %380 = vector.extract_strided_slice %379 {offsets = [0, 0, 0], sizes = [2, 3, 5], strides = [1, 1, 1]} : vector<2x3x20xf32> to vector<2x3x5xf32>
      %cst_246 = arith.constant dense<0.000000e+00> : vector<2x3xf32>
      %381 = vector.multi_reduction <add>, %380, %cst_246 [2] : vector<2x3x5xf32> to vector<2x3xf32>
      %382 = vector.shape_cast %381 : vector<2x3xf32> to vector<2x3x1xf32>
      %383 = vector.extract_strided_slice %370 {offsets = [0, 0, 0], sizes = [2, 3, 1], strides = [1, 1, 1]} : vector<2x3x4xf32> to vector<2x3x1xf32>
      %cst_247 = arith.constant 9.99999971E-10 : f32
      %384 = vector.broadcast %cst_247 : f32 to vector<2x3x1xf32>
      %385 = arith.addf %382, %384 : vector<2x3x1xf32>
      %386 = tpu.reciprocal %385 {approx = true} : vector<2x3x1xf32> -> vector<2x3x1xf32>
      %387 = arith.mulf %383, %386 : vector<2x3x1xf32>
      %388 = vector.broadcast %387 : vector<2x3x1xf32> to vector<2x3x5xf32>
      %389 = arith.mulf %388, %380 : vector<2x3x5xf32>
      %390 = vector.extract_strided_slice %379 {offsets = [0, 0, 5], sizes = [2, 3, 5], strides = [1, 1, 1]} : vector<2x3x20xf32> to vector<2x3x5xf32>
      %cst_248 = arith.constant dense<0.000000e+00> : vector<2x3xf32>
      %391 = vector.multi_reduction <add>, %390, %cst_248 [2] : vector<2x3x5xf32> to vector<2x3xf32>
      %392 = vector.shape_cast %391 : vector<2x3xf32> to vector<2x3x1xf32>
      %393 = vector.extract_strided_slice %370 {offsets = [0, 0, 1], sizes = [2, 3, 1], strides = [1, 1, 1]} : vector<2x3x4xf32> to vector<2x3x1xf32>
      %cst_249 = arith.constant 9.99999971E-10 : f32
      %394 = vector.broadcast %cst_249 : f32 to vector<2x3x1xf32>
      %395 = arith.addf %392, %394 : vector<2x3x1xf32>
      %396 = tpu.reciprocal %395 {approx = true} : vector<2x3x1xf32> -> vector<2x3x1xf32>
      %397 = arith.mulf %393, %396 : vector<2x3x1xf32>
      %398 = vector.broadcast %397 : vector<2x3x1xf32> to vector<2x3x5xf32>
      %399 = arith.mulf %398, %390 : vector<2x3x5xf32>
      %400 = vector.extract_strided_slice %379 {offsets = [0, 0, 10], sizes = [2, 3, 5], strides = [1, 1, 1]} : vector<2x3x20xf32> to vector<2x3x5xf32>
      %cst_250 = arith.constant dense<0.000000e+00> : vector<2x3xf32>
      %401 = vector.multi_reduction <add>, %400, %cst_250 [2] : vector<2x3x5xf32> to vector<2x3xf32>
      %402 = vector.shape_cast %401 : vector<2x3xf32> to vector<2x3x1xf32>
      %403 = vector.extract_strided_slice %370 {offsets = [0, 0, 2], sizes = [2, 3, 1], strides = [1, 1, 1]} : vector<2x3x4xf32> to vector<2x3x1xf32>
      %cst_251 = arith.constant 9.99999971E-10 : f32
      %404 = vector.broadcast %cst_251 : f32 to vector<2x3x1xf32>
      %405 = arith.addf %402, %404 : vector<2x3x1xf32>
      %406 = tpu.reciprocal %405 {approx = true} : vector<2x3x1xf32> -> vector<2x3x1xf32>
      %407 = arith.mulf %403, %406 : vector<2x3x1xf32>
      %408 = vector.broadcast %407 : vector<2x3x1xf32> to vector<2x3x5xf32>
      %409 = arith.mulf %408, %400 : vector<2x3x5xf32>
      %410 = vector.extract_strided_slice %379 {offsets = [0, 0, 15], sizes = [2, 3, 5], strides = [1, 1, 1]} : vector<2x3x20xf32> to vector<2x3x5xf32>
      %cst_252 = arith.constant dense<0.000000e+00> : vector<2x3xf32>
      %411 = vector.multi_reduction <add>, %410, %cst_252 [2] : vector<2x3x5xf32> to vector<2x3xf32>
      %412 = vector.shape_cast %411 : vector<2x3xf32> to vector<2x3x1xf32>
      %413 = vector.extract_strided_slice %370 {offsets = [0, 0, 3], sizes = [2, 3, 1], strides = [1, 1, 1]} : vector<2x3x4xf32> to vector<2x3x1xf32>
      %cst_253 = arith.constant 9.99999971E-10 : f32
      %414 = vector.broadcast %cst_253 : f32 to vector<2x3x1xf32>
      %415 = arith.addf %412, %414 : vector<2x3x1xf32>
      %416 = tpu.reciprocal %415 {approx = true} : vector<2x3x1xf32> -> vector<2x3x1xf32>
      %417 = arith.mulf %413, %416 : vector<2x3x1xf32>
      %418 = vector.broadcast %417 : vector<2x3x1xf32> to vector<2x3x5xf32>
      %419 = arith.mulf %418, %410 : vector<2x3x5xf32>
      %420 = tpu.concatenate %389, %399, %409, %419 in 2 : vector<2x3x5xf32>, vector<2x3x5xf32>, vector<2x3x5xf32>, vector<2x3x5xf32> -> vector<2x3x20xf32>
      %421 = arith.truncf %420 : vector<2x3x20xf32> to vector<2x3x20xbf16>
      "tpu.trace_start"() <{level = 10 : i32, message = "bkn,bnd->bkd"}> : () -> ()
      %cst_254 = arith.constant dense<0.000000e+00> : vector<2x3x32xf32>
      %422 = tpu.matmul %421, %371, %cst_254 {dimension_numbers = #tpu.dot_dimension_numbers<[2], [1], [1], [2], [0, 0, 0, 1, 1, 2], [0], [0]>} : vector<2x3x20xbf16>, vector<2x20x32xbf16>, vector<2x3x32xf32> -> vector<2x3x32xf32>
      "tpu.trace_stop"() : () -> ()
      %423 = vector.extract_strided_slice %422 {offsets = [0, 0, 0], sizes = [2, 1, 32], strides = [1, 1, 1]} : vector<2x3x32xf32> to vector<2x1x32xf32>
      %424 = vector.shape_cast %423 : vector<2x1x32xf32> to vector<2x32xf32>
      %425 = arith.truncf %424 : vector<2x32xf32> to vector<2x32xbf16>
      %cst_255 = arith.constant dense<0.000000e+00> : vector<2x32xf32>
      %426 = tpu.matmul %425, %8, %cst_255 {dimension_numbers = #tpu.dot_dimension_numbers<[1], [0], [0], [1], [0, 0, 1, 1], [], []>} : vector<2x32xbf16>, vector<32x32xbf16>, vector<2x32xf32> -> vector<2x32xf32>
      %427 = arith.truncf %117 : vector<2x32xf32> to vector<2x32xbf16>
      %cst_256 = arith.constant dense<0.000000e+00> : vector<2x32xf32>
      %428 = tpu.matmul %427, %9, %cst_256 {dimension_numbers = #tpu.dot_dimension_numbers<[1], [0], [0], [1], [0, 0, 1, 1], [], []>} : vector<2x32xbf16>, vector<32x32xbf16>, vector<2x32xf32> -> vector<2x32xf32>
      %429 = arith.addf %426, %428 : vector<2x32xf32>
      %430 = math.tanh %429 : vector<2x32xf32>
      %431 = vector.shape_cast %430 : vector<2x32xf32> to vector<1x2x32xf32>
      %432 = vector.extract_strided_slice %422 {offsets = [0, 1, 0], sizes = [2, 1, 32], strides = [1, 1, 1]} : vector<2x3x32xf32> to vector<2x1x32xf32>
      %433 = vector.shape_cast %432 : vector<2x1x32xf32> to vector<2x32xf32>
      %434 = arith.truncf %433 : vector<2x32xf32> to vector<2x32xbf16>
      %cst_257 = arith.constant dense<0.000000e+00> : vector<2x32xf32>
      %435 = tpu.matmul %434, %8, %cst_257 {dimension_numbers = #tpu.dot_dimension_numbers<[1], [0], [0], [1], [0, 0, 1, 1], [], []>} : vector<2x32xbf16>, vector<32x32xbf16>, vector<2x32xf32> -> vector<2x32xf32>
      %436 = arith.truncf %221 : vector<2x32xf32> to vector<2x32xbf16>
      %cst_258 = arith.constant dense<0.000000e+00> : vector<2x32xf32>
      %437 = tpu.matmul %436, %9, %cst_258 {dimension_numbers = #tpu.dot_dimension_numbers<[1], [0], [0], [1], [0, 0, 1, 1], [], []>} : vector<2x32xbf16>, vector<32x32xbf16>, vector<2x32xf32> -> vector<2x32xf32>
      %438 = arith.addf %435, %437 : vector<2x32xf32>
      %439 = math.tanh %438 : vector<2x32xf32>
      %440 = vector.shape_cast %439 : vector<2x32xf32> to vector<1x2x32xf32>
      %441 = vector.extract_strided_slice %422 {offsets = [0, 2, 0], sizes = [2, 1, 32], strides = [1, 1, 1]} : vector<2x3x32xf32> to vector<2x1x32xf32>
      %442 = vector.shape_cast %441 : vector<2x1x32xf32> to vector<2x32xf32>
      %443 = arith.truncf %442 : vector<2x32xf32> to vector<2x32xbf16>
      %cst_259 = arith.constant dense<0.000000e+00> : vector<2x32xf32>
      %444 = tpu.matmul %443, %8, %cst_259 {dimension_numbers = #tpu.dot_dimension_numbers<[1], [0], [0], [1], [0, 0, 1, 1], [], []>} : vector<2x32xbf16>, vector<32x32xbf16>, vector<2x32xf32> -> vector<2x32xf32>
      %445 = arith.truncf %325 : vector<2x32xf32> to vector<2x32xbf16>
      %cst_260 = arith.constant dense<0.000000e+00> : vector<2x32xf32>
      %446 = tpu.matmul %445, %9, %cst_260 {dimension_numbers = #tpu.dot_dimension_numbers<[1], [0], [0], [1], [0, 0, 1, 1], [], []>} : vector<2x32xbf16>, vector<32x32xbf16>, vector<2x32xf32> -> vector<2x32xf32>
      %447 = arith.addf %444, %446 : vector<2x32xf32>
      %448 = math.tanh %447 : vector<2x32xf32>
      %449 = vector.shape_cast %448 : vector<2x32xf32> to vector<1x2x32xf32>
      %450 = tpu.concatenate %431, %440, %449 in 0 : vector<1x2x32xf32>, vector<1x2x32xf32>, vector<1x2x32xf32> -> vector<3x2x32xf32>
      %451 = arith.index_cast %arg24 : i32 to index
      %c0_261 = arith.constant 0 : index
      %c0_262 = arith.constant 0 : index
      %c0_263 = arith.constant 0 : index
      %452 = vector.load %arg17[%451, %c0_261, %c0_262, %c0_263] : memref<3x3x2x32xf32, #tpu.memory_space<vmem>>, vector<1x3x2x32xf32>
      %453 = vector.shape_cast %452 : vector<1x3x2x32xf32> to vector<3x2x32xf32>
      %454 = vector.shape_cast %450 : vector<3x2x32xf32> to vector<1x3x2x32xf32>
      tpu.vector_store %arg17[%451, %c0_261, %c0_262, %c0_263], %454 {strides = array<i32>} : memref<3x3x2x32xf32, #tpu.memory_space<vmem>>, vector<1x3x2x32xf32>,
      %455 = arith.index_cast %arg24 : i32 to index
      %c0_264 = arith.constant 0 : index
      %c0_265 = arith.constant 0 : index
      %c0_266 = arith.constant 0 : index
      %456 = vector.load %arg18[%455, %c0_264, %c0_265, %c0_266] : memref<3x2x3x20xf32, #tpu.memory_space<vmem>>, vector<1x2x3x20xf32>
      %457 = vector.shape_cast %456 : vector<1x2x3x20xf32> to vector<2x3x20xf32>
      %458 = vector.shape_cast %420 : vector<2x3x20xf32> to vector<1x2x3x20xf32>
      tpu.vector_store %arg18[%455, %c0_264, %c0_265, %c0_266], %458 {strides = array<i32>} : memref<3x2x3x20xf32, #tpu.memory_space<vmem>>, vector<1x2x3x20xf32>,
      %c0_267 = arith.constant 0 : index
      %c0_268 = arith.constant 0 : index
      %c0_269 = arith.constant 0 : index
      %459 = vector.load %arg23[%c0_267, %c0_268, %c0_269] : memref<3x2x32xf32, #tpu.memory_space<vmem>>, vector<3x2x32xf32>
      %460 = arith.select %16, %450, %459 : vector<3x2x32xf32>
      %c0_270 = arith.constant 0 : index
      %c0_271 = arith.constant 0 : index
      %c0_272 = arith.constant 0 : index
      %461 = vector.load %arg23[%c0_270, %c0_271, %c0_272] : memref<3x2x32xf32, #tpu.memory_space<vmem>>, vector<3x2x32xf32>
      tpu.vector_store %arg23[%c0_270, %c0_271, %c0_272], %460 {strides = array<i32>} : memref<3x2x32xf32, #tpu.memory_space<vmem>>, vector<3x2x32xf32>,
    }
    %c3_i32_18 = arith.constant 3 : i32
    %c0_i32_19 = arith.constant 0 : i32
    %11 = arith.cmpi eq, %arg0, %c0_i32_19 : i32
    %12 = arith.extui %11 : i1 to i32
    %c0_i32_20 = arith.constant 0 : i32
    %13 = arith.cmpi ne, %12, %c0_i32_20 : i32
    scf.if %13 {
      %c0_21 = arith.constant 0 : index
      %c0_22 = arith.constant 0 : index
      %c0_23 = arith.constant 0 : index
      %c0_24 = arith.constant 0 : index
      %14 = vector.load %arg21[%c0_21, %c0_22, %c0_23, %c0_24] : memref<3x2x2x32xf32, #tpu.memory_space<vmem>>, vector<3x2x2x32xf32>
      %c0_25 = arith.constant 0 : index
      %c0_26 = arith.constant 0 : index
      %c0_27 = arith.constant 0 : index
      %c0_28 = arith.constant 0 : index
      %15 = vector.load %arg19[%c0_25, %c0_26, %c0_27, %c0_28] : memref<3x2x2x32xf32, #tpu.memory_space<vmem>>, vector<3x2x2x32xf32>
      tpu.vector_store %arg19[%c0_25, %c0_26, %c0_27, %c0_28], %14 {strides = array<i32>} : memref<3x2x2x32xf32, #tpu.memory_space<vmem>>, vector<3x2x2x32xf32>,
      %c0_29 = arith.constant 0 : index
      %c0_30 = arith.constant 0 : index
      %c0_31 = arith.constant 0 : index
      %c0_32 = arith.constant 0 : index
      %16 = vector.load %arg22[%c0_29, %c0_30, %c0_31, %c0_32] : memref<3x2x2x32xf32, #tpu.memory_space<vmem>>, vector<3x2x2x32xf32>
      %c0_33 = arith.constant 0 : index
      %c0_34 = arith.constant 0 : index
      %c0_35 = arith.constant 0 : index
      %c0_36 = arith.constant 0 : index
      %17 = vector.load %arg20[%c0_33, %c0_34, %c0_35, %c0_36] : memref<3x2x2x32xf32, #tpu.memory_space<vmem>>, vector<3x2x2x32xf32>
      tpu.vector_store %arg20[%c0_33, %c0_34, %c0_35, %c0_36], %16 {strides = array<i32>} : memref<3x2x2x32xf32, #tpu.memory_space<vmem>>, vector<3x2x2x32xf32>,
    } else {
    }
    return
  }
  func.func @transform_0(%arg0: i32) -> (i32, i32, i32) {
    %c0_i32 = arith.constant 0 : i32
    %c0_i32_0 = arith.constant 0 : i32
    %c0_i32_1 = arith.constant 0 : i32
    return %arg0, %c0_i32, %c0_i32_0 : i32, i32, i32
  }
  func.func @transform_1(%arg0: i32) -> (i32, i32, i32) {
    %c0_i32 = arith.constant 0 : i32
    %c0_i32_0 = arith.constant 0 : i32
    %c0_i32_1 = arith.constant 0 : i32
    %c0_i32_2 = arith.constant 0 : i32
    return %c0_i32, %c0_i32_0, %c0_i32_1 : i32, i32, i32
  }
  func.func @transform_2(%arg0: i32) -> (i32, i32, i32) {
    %c0_i32 = arith.constant 0 : i32
    %c0_i32_0 = arith.constant 0 : i32
    %c0_i32_1 = arith.constant 0 : i32
    %c0_i32_2 = arith.constant 0 : i32
    return %c0_i32, %c0_i32_0, %c0_i32_1 : i32, i32, i32
  }
  func.func @transform_3(%arg0: i32) -> (i32, i32, i32) {
    %c0_i32 = arith.constant 0 : i32
    %c0_i32_0 = arith.constant 0 : i32
    %c0_i32_1 = arith.constant 0 : i32
    %c0_i32_2 = arith.constant 0 : i32
    return %c0_i32, %c0_i32_0, %c0_i32_1 : i32, i32, i32
  }
  func.func @transform_4(%arg0: i32) -> (i32, i32, i32) {
    %c0_i32 = arith.constant 0 : i32
    %c0_i32_0 = arith.constant 0 : i32
    %c0_i32_1 = arith.constant 0 : i32
    %c0_i32_2 = arith.constant 0 : i32
    return %c0_i32, %c0_i32_0, %c0_i32_1 : i32, i32, i32
  }
  func.func @transform_5(%arg0: i32) -> (i32, i32, i32) {
    %c0_i32 = arith.constant 0 : i32
    %c0_i32_0 = arith.constant 0 : i32
    %c0_i32_1 = arith.constant 0 : i32
    %c0_i32_2 = arith.constant 0 : i32
    return %c0_i32, %c0_i32_0, %c0_i32_1 : i32, i32, i32
  }
  func.func @transform_6(%arg0: i32) -> (i32, i32) {
    %c0_i32 = arith.constant 0 : i32
    %c0_i32_0 = arith.constant 0 : i32
    %c0_i32_1 = arith.constant 0 : i32
    return %c0_i32, %c0_i32_0 : i32, i32
  }
  func.func @transform_7(%arg0: i32) -> (i32, i32, i32, i32) {
    %c0_i32 = arith.constant 0 : i32
    %c0_i32_0 = arith.constant 0 : i32
    %c0_i32_1 = arith.constant 0 : i32
    %c0_i32_2 = arith.constant 0 : i32
    %c0_i32_3 = arith.constant 0 : i32
    return %c0_i32, %c0_i32_0, %c0_i32_1, %c0_i32_2 : i32, i32, i32, i32
  }
  func.func @transform_8(%arg0: i32) -> (i32, i32, i32, i32) {
    %c0_i32 = arith.constant 0 : i32
    %c0_i32_0 = arith.constant 0 : i32
    %c0_i32_1 = arith.constant 0 : i32
    %c0_i32_2 = arith.constant 0 : i32
    %c0_i32_3 = arith.constant 0 : i32
    return %c0_i32, %c0_i32_0, %c0_i32_1, %c0_i32_2 : i32, i32, i32, i32
  }
  func.func @transform_9(%arg0: i32) -> (i32, i32, i32, i32) {
    %c0_i32 = arith.constant 0 : i32
    %c0_i32_0 = arith.constant 0 : i32
    %c0_i32_1 = arith.constant 0 : i32
    %c0_i32_2 = arith.constant 0 : i32
    %c0_i32_3 = arith.constant 0 : i32
    return %c0_i32, %c0_i32_0, %c0_i32_1, %c0_i32_2 : i32, i32, i32, i32
  }
  func.func @transform_10(%arg0: i32) -> (i32, i32) {
    %c0_i32 = arith.constant 0 : i32
    %c0_i32_0 = arith.constant 0 : i32
    %c0_i32_1 = arith.constant 0 : i32
    return %c0_i32, %c0_i32_0 : i32, i32
  }
  func.func @transform_11(%arg0: i32) -> (i32, i32) {
    %c0_i32 = arith.constant 0 : i32
    %c0_i32_0 = arith.constant 0 : i32
    %c0_i32_1 = arith.constant 0 : i32
    return %c0_i32, %c0_i32_0 : i32, i32
  }
  func.func @transform_12(%arg0: i32) -> (i32, i32) {
    %c0_i32 = arith.constant 0 : i32
    %c0_i32_0 = arith.constant 0 : i32
    %c0_i32_1 = arith.constant 0 : i32
    return %c0_i32, %c0_i32_0 : i32, i32
  }
  func.func @transform_13(%arg0: i32) -> (i32, i32, i32, i32) {
    %c0_i32 = arith.constant 0 : i32
    %c0_i32_0 = arith.constant 0 : i32
    %c0_i32_1 = arith.constant 0 : i32
    %c0_i32_2 = arith.constant 0 : i32
    %c0_i32_3 = arith.constant 0 : i32
    return %c0_i32, %c0_i32_0, %c0_i32_1, %c0_i32_2 : i32, i32, i32, i32
  }
  func.func @transform_14(%arg0: i32) -> (i32, i32, i32, i32) {
    %c0_i32 = arith.constant 0 : i32
    %c0_i32_0 = arith.constant 0 : i32
    %c0_i32_1 = arith.constant 0 : i32
    %c0_i32_2 = arith.constant 0 : i32
    %c0_i32_3 = arith.constant 0 : i32
    return %c0_i32, %c0_i32_0, %c0_i32_1, %c0_i32_2 : i32, i32, i32, i32
  }
  func.func @transform_15(%arg0: i32) -> (i32, i32, i32) {
    %c0_i32 = arith.constant 0 : i32
    %c0_i32_0 = arith.constant 0 : i32
    %c0_i32_1 = arith.constant 0 : i32
    %c0_i32_2 = arith.constant 0 : i32
    return %c0_i32, %c0_i32_0, %c0_i32_1 : i32, i32, i32
  }
  func.func @transform_16(%arg0: i32) -> (i32, i32, i32, i32) {
    %c0_i32 = arith.constant 0 : i32
    %c0_i32_0 = arith.constant 0 : i32
    %c0_i32_1 = arith.constant 0 : i32
    %c0_i32_2 = arith.constant 0 : i32
    return %arg0, %c0_i32, %c0_i32_0, %c0_i32_1 : i32, i32, i32, i32
  }
  func.func @transform_17(%arg0: i32) -> (i32, i32, i32, i32) {
    %c0_i32 = arith.constant 0 : i32
    %c0_i32_0 = arith.constant 0 : i32
    %c0_i32_1 = arith.constant 0 : i32
    %c0_i32_2 = arith.constant 0 : i32
    return %arg0, %c0_i32, %c0_i32_0, %c0_i32_1 : i32, i32, i32, i32
  }
  func.func @transform_18(%arg0: i32) -> (i32, i32, i32, i32) {
    %c0_i32 = arith.constant 0 : i32
    %c0_i32_0 = arith.constant 0 : i32
    %c0_i32_1 = arith.constant 0 : i32
    %c0_i32_2 = arith.constant 0 : i32
    %c0_i32_3 = arith.constant 0 : i32
    return %c0_i32, %c0_i32_0, %c0_i32_1, %c0_i32_2 : i32, i32, i32, i32
  }
  func.func @transform_19(%arg0: i32) -> (i32, i32, i32, i32) {
    %c0_i32 = arith.constant 0 : i32
    %c0_i32_0 = arith.constant 0 : i32
    %c0_i32_1 = arith.constant 0 : i32
    %c0_i32_2 = arith.constant 0 : i32
    %c0_i32_3 = arith.constant 0 : i32
    return %c0_i32, %c0_i32_0, %c0_i32_1, %c0_i32_2 : i32, i32, i32, i32
  }
}

</mosaic_0001>

<bundles_post_ra>
// kernel: tpu_custom_call.1
= control target key start
LH: loop header
LB: loop body
LE: loop exit
PB: predicated region body
PF: predicated region fallthrough
CT: control target
= control target key end

     0   :  { %s4836_s0 = inlined_call_operand.hbm [shape: f32[3,2,32], index: 0, kind: input, shape index: {}]   ;;  %s4837_s1 = inlined_call_operand.hbm [shape: bf16[2,20,32], index: 1, kind: input, shape index: {}]   ;;  %s4838_s2 = inlined_call_operand.hbm [shape: bf16[2,4,32], index: 2, kind: input, shape index: {}]   ;;  %s4839_s3 = inlined_call_operand.hbm [shape: f32[2,1,4], index: 3, kind: input, shape index: {}]   ;;  %s4840_s4 = inlined_call_operand.hbm [shape: f32[2,1,20], index: 4, kind: input, shape index: {}]   ;;  %s4841_s5 = inlined_call_operand.hbm [shape: f32[2,1,4], index: 5, kind: input, shape index: {}]   ;;  %s4842_s6 = inlined_call_operand.hbm [shape: bf16[32,384], index: 6, kind: input, shape index: {}]   ;;  %s4843_s7 = inlined_call_operand.hbm [shape: bf16[3,2,32,128], index: 7, kind: input, shape index: {}]   ;;  %s4844_s8 = inlined_call_operand.hbm [shape: bf16[3,2,32,128], index: 8, kind: input, shape index: {}]   ;;  %s4845_s9 = inlined_call_operand.hbm [shape: f32[3,2,1,128], index: 9, kind: input, shape index: {}]   ;;  %s4846_s10 = inlined_call_operand.hbm [shape: bf16[32,64], index: 10, kind: input, shape index: {}]   ;;  %s4847_s11 = inlined_call_operand.hbm [shape: bf16[32,32], index: 11, kind: input, shape index: {}]   ;;  %s4848_s12 = inlined_call_operand.hbm [shape: bf16[32,32], index: 12, kind: input, shape index: {}]   ;;  %s4849_s13 = inlined_call_operand.hbm [shape: f32[3,2,2,32], index: 13, kind: input, shape index: {}]   ;;  %s4850_s14 = inlined_call_operand.hbm [shape: f32[3,2,2,32], index: 14, kind: input, shape index: {}]   ;;  %s4851_s15 = inlined_call_operand.hbm [shape: f32[3,2,32], index: 15, kind: input, shape index: {}]   ;;  %s4852_s16 = inlined_call_operand.hbm [shape: f32[3,3,2,32], index: 16, kind: output, shape index: {0}]   ;;  %s4853_s17 = inlined_call_operand.hbm [shape: f32[3,2,3,20], index: 17, kind: output, shape index: {1}]   ;;  %s4854_s18 = inlined_call_operand.hbm [shape: f32[3,2,2,32], index: 18, kind: output, shape index: {2}]   ;;  %s4855_s19 = inlined_call_operand.hbm [shape: f32[3,2,2,32], index: 19, kind: output, shape index: {3}]  }
   0x1   :  { %4872 = sst [smem:[#allocation57_spill]] %s4836_s0 }
   0x2   :  { %4873 = sst [smem:[#allocation58_spill]] %s4837_s1 }
   0x3   :  { %4874 = sst [smem:[#allocation59_spill]] %s4838_s2 }
   0x4   :  { %4875 = sst [smem:[#allocation60_spill]] %s4839_s3 }
   0x5   :  { %4876 = sst [smem:[#allocation61_spill]] %s4854_s18 }
   0x6   :  { %4877 = sst [smem:[#allocation62_spill]] %s4855_s19 }
   0x7   :  { %25 = vsyncpa [#allocation6], 0 }
   0x8   :  { %26 = vsyncpa [#allocation9], 0 }
   0x9   :  { %27 = vsyncpa [#allocation12], 0 }
   0xa   :  { %28 = vsyncpa [#allocation15], 0 }
   0xb   :  { %29 = vsyncpa [#allocation18], 0 }
   0xc   :  { %30 = vsyncpa [#allocation21], 0 }
   0xd   :  { %31 = vsyncpa [#allocation24], 0 }
   0xe   :  { %32 = vsyncpa [#allocation27], 0 }
   0xf   :  { %33 = vsyncpa [#allocation30], 0 }
  0x10   :  { %34 = vsyncpa [#allocation7], 0 }
  0x11   :  { %35 = vsyncpa [#allocation33], 0 }
  0x12   :  { %36 = vsyncpa [#allocation36], 0  ;;  %s3818_s0 = smov [#allocation8]   ;;  %s4878_s1 = sld [smem:[#allocation58_spill]] }
  0x13   :  { %s54_s30 = sshll.u32 %s3818_s0, 4  ;;  %s55_s30 = int_to_ptr.vmem [resolvable:$true] %s54_s30 }
  0x18   :  { %s3346_s22 = scalar_lea.hbm %s4878_s1, 384 }
  0x19   :  { %p3347_p0 = scmp.ne.s32.totalorder %s4878_s1, %s3346_s22  ;;  %p3350_p1 = scmp.lt.u32.totalorder %s3346_s22, %s4878_s1 }
  0x1b   :  { %p3352_p2 = pnand %p3350_p1, %p3347_p0 }
  0x1d   :  { %3355 = shalt.err (!%p3352_p2)
}
  0x1e   :  { %s3356_s3 = scalar_lea.vmem %s55_s30, 384  ;;  %p3361_p4 = scmp.lt.s32.totalorder %s55_s30, %s55_s30 }
  0x1f   :  { %p3357_p3 = scmp.ne.s32.totalorder %s55_s30, %s3356_s3  ;;  %p3362_p5 = scmp.lt.s32.totalorder %s3356_s3, %s3356_s3 }
  0x21   :  { %p3363_p6 = por %p3362_p5, %p3361_p4 }
  0x23   :  { %p3364_p7 = pnand %p3363_p6, %p3357_p3 }
  0x25   :  { %3367 = shalt.err (!%p3364_p7)
}
  0x26   :  { %s4862_s26 = smov 64   ;;  %s4864_s27 = smov 4  }
  0x27   :  { %60 = dma.hbm_to_vmem [thread:$0]  %s4878_s1, 384, %s55_s30, [#allocation9], %s4862_s26, %s4862_s26, %s4864_s27  }
  0x28   :  { %s3821_s0 = smov [#allocation11]   ;;  %s4879_s2 = sld [smem:[#allocation60_spill]] }
  0x29   :  { %s78_s20 = sshll.u32 %s3821_s0, 4  ;;  %s79_s20 = int_to_ptr.vmem [resolvable:$true] %s78_s20 }
  0x2e   :  { %s3368_s23 = scalar_lea.hbm %s4879_s2, 32 }
  0x2f   :  { %p3369_p8 = scmp.ne.s32.totalorder %s4879_s2, %s3368_s23  ;;  %p3372_p9 = scmp.lt.u32.totalorder %s3368_s23, %s4879_s2 }
  0x31   :  { %p3374_p10 = pnand %p3372_p9, %p3369_p8 }
  0x33   :  { %3377 = shalt.err (!%p3374_p10)
}
  0x34   :  { %s3378_s18 = scalar_lea.vmem %s79_s20, 32  ;;  %p3383_p12 = scmp.lt.s32.totalorder %s79_s20, %s79_s20 }
  0x35   :  { %p3379_p11 = scmp.ne.s32.totalorder %s79_s20, %s3378_s18  ;;  %p3384_p13 = scmp.lt.s32.totalorder %s3378_s18, %s3378_s18 }
  0x37   :  { %p3385_p0 = por %p3384_p13, %p3383_p12 }
  0x39   :  { %p3386_p1 = pnand %p3385_p0, %p3379_p11 }
  0x3b   :  { %3389 = shalt.err (!%p3386_p1)
}
  0x3c   :  { %s3822_s30 = smov 16   ;;  %s3823_s1 = smov 1  }
  0x3d   :  { %84 = dma.hbm_to_vmem [thread:$0]  %s4879_s2, 32, %s79_s20, [#allocation12], %s3822_s30, %s3822_s30, %s3823_s1  }
  0x3e   :  { %s3824_s19 = smov [#allocation14]   ;;  %s3825_s21 = smov [#allocation17]  }
  0x3f   :  { %s102_s0 = sshll.u32 %s3824_s19, 4  ;;  %s126_s22 = sshll.u32 %s3825_s21, 4  ;;  %s103_s0 = int_to_ptr.vmem [resolvable:$true] %s102_s0  ;;  %s3989_s22 = int_to_ptr.vmem [resolvable:$true] %s126_s22 }
  0x40   :  { %s3390_s24 = scalar_lea.hbm %s4841_s5, 32 }
  0x41   :  { %p3391_p2 = scmp.ne.s32.totalorder %s4841_s5, %s3390_s24  ;;  %p3394_p3 = scmp.lt.u32.totalorder %s3390_s24, %s4841_s5 }
  0x43   :  { %p3396_p4 = pnand %p3394_p3, %p3391_p2 }
  0x45   :  { %3399 = shalt.err (!%p3396_p4)
}
  0x46   :  { %s3400_s20 = scalar_lea.vmem %s103_s0, 32  ;;  %p3405_p6 = scmp.lt.s32.totalorder %s103_s0, %s103_s0 }
  0x47   :  { %p3401_p5 = scmp.ne.s32.totalorder %s103_s0, %s3400_s20  ;;  %p3406_p7 = scmp.lt.s32.totalorder %s3400_s20, %s3400_s20 }
  0x49   :  { %p3407_p8 = por %p3406_p7, %p3405_p6 }
  0x4b   :  { %p3408_p9 = pnand %p3407_p8, %p3401_p5 }
  0x4d   :  { %3411 = shalt.err (!%p3408_p9)
}
  0x4e   :  { %108 = dma.hbm_to_vmem [thread:$0]  %s4841_s5, 32, %s103_s0, [#allocation15], %s3822_s30, %s3822_s30, %s3823_s1  }
  0x4f   :  { %s3412_s26 = scalar_lea.hbm %s4843_s7, 1536 }
  0x50   :  { %p3413_p10 = scmp.ne.s32.totalorder %s4843_s7, %s3412_s26  ;;  %p3416_p11 = scmp.lt.u32.totalorder %s3412_s26, %s4843_s7 }
  0x52   :  { %p3418_p12 = pnand %p3416_p11, %p3413_p10 }
  0x54   :  { %3421 = shalt.err (!%p3418_p12)
}
  0x55   :  { %s3422_s24 = scalar_lea.vmem %s3989_s22, 1536  ;;  %p3427_p0 = scmp.lt.s32.totalorder %s3989_s22, %s3989_s22 }
  0x56   :  { %p3423_p13 = scmp.ne.s32.totalorder %s3989_s22, %s3422_s24  ;;  %p3428_p1 = scmp.lt.s32.totalorder %s3422_s24, %s3422_s24 }
  0x58   :  { %p3429_p2 = por %p3428_p1, %p3427_p0 }
  0x5a   :  { %p3430_p3 = pnand %p3429_p2, %p3423_p13 }
  0x5c   :  { %3433 = shalt.err (!%p3430_p3)
}
  0x5d   :  { %s4880_s5 = smov 4   ;;  %s4881_s0 = smov 64  }
  0x5e   :  { %132 = dma.hbm_to_vmem [thread:$0]  %s4843_s7, 1536, %s3989_s22, [#allocation18], %s4881_s0, %s4881_s0, %s4880_s5  }
  0x5f   :  { %s3826_s20 = smov [#allocation20]   ;;  %s3827_s28 = smov [#allocation23]  }
  0x60   :  { %s150_s2 = sshll.u32 %s3826_s20, 4  ;;  %s174_s29 = sshll.u32 %s3827_s28, 4  ;;  %s151_s2 = int_to_ptr.vmem [resolvable:$true] %s150_s2  ;;  %s4026_s29 = int_to_ptr.vmem [resolvable:$true] %s174_s29 }
  0x61   :  { %s3434_s27 = scalar_lea.hbm %s4845_s9, 96 }
  0x62   :  { %p3435_p4 = scmp.ne.s32.totalorder %s4845_s9, %s3434_s27  ;;  %p3438_p5 = scmp.lt.u32.totalorder %s3434_s27, %s4845_s9 }
  0x64   :  { %p3440_p6 = pnand %p3438_p5, %p3435_p4 }
  0x66   :  { %3443 = shalt.err (!%p3440_p6)
}
  0x67   :  { %s3444_s7 = scalar_lea.vmem %s151_s2, 96  ;;  %p3449_p8 = scmp.lt.s32.totalorder %s151_s2, %s151_s2 }
  0x68   :  { %p3445_p7 = scmp.ne.s32.totalorder %s151_s2, %s3444_s7  ;;  %p3450_p9 = scmp.lt.s32.totalorder %s3444_s7, %s3444_s7 }
  0x6a   :  { %p3451_p10 = por %p3450_p9, %p3449_p8 }
  0x6c   :  { %p3452_p11 = pnand %p3451_p10, %p3445_p7 }
  0x6e   :  { %3455 = shalt.err (!%p3452_p11)
}
  0x6f   :  { %156 = dma.hbm_to_vmem [thread:$0]  %s4845_s9, 96, %s151_s2, [#allocation21], %s3822_s30, %s3822_s30, %s3823_s1  }
  0x70   :  { %s3456_s28 = scalar_lea.hbm %s4847_s11, 256 }
  0x71   :  { %p3457_p12 = scmp.ne.s32.totalorder %s4847_s11, %s3456_s28  ;;  %p3460_p13 = scmp.lt.u32.totalorder %s3456_s28, %s4847_s11 }
  0x73   :  { %p3462_p0 = pnand %p3460_p13, %p3457_p12 }
  0x75   :  { %3465 = shalt.err (!%p3462_p0)
}
  0x76   :  { %s3466_s18 = scalar_lea.vmem %s4026_s29, 256  ;;  %p3471_p2 = scmp.lt.s32.totalorder %s4026_s29, %s4026_s29 }
  0x77   :  { %p3467_p1 = scmp.ne.s32.totalorder %s4026_s29, %s3466_s18  ;;  %p3472_p3 = scmp.lt.s32.totalorder %s3466_s18, %s3466_s18 }
  0x79   :  { %p3473_p4 = por %p3472_p3, %p3471_p2 }
  0x7b   :  { %p3474_p5 = pnand %p3473_p4, %p3467_p1 }
  0x7d   :  { %3477 = shalt.err (!%p3474_p5)
}
  0x7e   :  { %180 = dma.hbm_to_vmem [thread:$0]  %s4847_s11, 256, %s4026_s29, [#allocation24], %s4881_s0, %s4881_s0, %s4880_s5  }
  0x7f   :  { %s3828_s23 = smov [#allocation26]   ;;  %s3829_s7 = smov [#allocation5]  }
  0x80   :  { %s198_s24 = sshll.u32 %s3828_s23, 4  ;;  %s42_s22 = sshll.u32 %s3829_s7, 4  ;;  %s199_s24 = int_to_ptr.vmem [resolvable:$true] %s198_s24  ;;  %s4063_s22 = int_to_ptr.vmem [resolvable:$true] %s42_s22 }
  0x81   :  { %s3478_s20 = scalar_lea.hbm %s4849_s13, 192 }
  0x82   :  { %p3479_p6 = scmp.ne.s32.totalorder %s4849_s13, %s3478_s20  ;;  %p3482_p7 = scmp.lt.u32.totalorder %s3478_s20, %s4849_s13 }
  0x84   :  { %p3484_p8 = pnand %p3482_p7, %p3479_p6 }
  0x86   :  { %3487 = shalt.err (!%p3484_p8)
}
  0x87   :  { %s3488_s11 = scalar_lea.vmem %s199_s24, 192  ;;  %p3493_p10 = scmp.lt.s32.totalorder %s199_s24, %s199_s24 }
  0x88   :  { %p3489_p9 = scmp.ne.s32.totalorder %s199_s24, %s3488_s11  ;;  %p3494_p11 = scmp.lt.s32.totalorder %s3488_s11, %s3488_s11 }
  0x8a   :  { %p3495_p12 = por %p3494_p11, %p3493_p10 }
  0x8c   :  { %p3496_p13 = pnand %p3495_p12, %p3489_p9 }
  0x8e   :  { %3499 = shalt.err (!%p3496_p13)
}
  0x8f   :  { %s3830_s29 = smov 32   ;;  %s3831_s21 = smov 2  }
  0x90   :  { %204 = dma.hbm_to_vmem [thread:$0]  %s4849_s13, 192, %s199_s24, [#allocation27], %s3830_s29, %s3830_s29, %s3831_s21  }
  0x91   :  { %s4882_s7 = sld [smem:[#allocation57_spill]] }
  0x97   :  { %s3500_s25 = scalar_lea.hbm %s4882_s7, 96 }
  0x98   :  { %p3501_p0 = scmp.ne.s32.totalorder %s4882_s7, %s3500_s25  ;;  %p3504_p1 = scmp.lt.u32.totalorder %s3500_s25, %s4882_s7 }
  0x9a   :  { %p3506_p2 = pnand %p3504_p1, %p3501_p0 }
  0x9c   :  { %3509 = shalt.err (!%p3506_p2)
}
  0x9d   :  { %s3510_s26 = scalar_lea.vmem %s4063_s22, 96  ;;  %p3515_p4 = scmp.lt.s32.totalorder %s4063_s22, %s4063_s22 }
  0x9e   :  { %p3511_p3 = scmp.ne.s32.totalorder %s4063_s22, %s3510_s26  ;;  %p3516_p5 = scmp.lt.s32.totalorder %s3510_s26, %s3510_s26 }
  0xa0   :  { %p3517_p6 = por %p3516_p5, %p3515_p4 }
  0xa2   :  { %p3518_p7 = pnand %p3517_p6, %p3511_p3 }
  0xa4   :  { %3521 = shalt.err (!%p3518_p7)
}
  0xa5   :  { %48 = dma.hbm_to_vmem [thread:$0]  %s4882_s7, 96, %s4063_s22, [#allocation6], %s3830_s29, %s3830_s29, %s3831_s21  }
  0xa6   :  { %s3832_s27 = smov [#allocation10]   ;;  %s3833_s18 = smov [#allocation13]  }
  0xa7   :  { %s66_s11 = sshll.u32 %s3832_s27, 4  ;;  %s90_s9 = sshll.u32 %s3833_s18, 4  ;;  %s67_s11 = int_to_ptr.vmem [resolvable:$true] %s66_s11  ;;  %s4100_s9 = int_to_ptr.vmem [resolvable:$true] %s90_s9 }
  0xa8   :  { %s4883_s25 = sld [smem:[#allocation59_spill]] }
  0xae   :  { %s3522_s3 = scalar_lea.hbm %s4883_s25, 64 }
  0xaf   :  { %p3523_p8 = scmp.ne.s32.totalorder %s4883_s25, %s3522_s3  ;;  %p3526_p9 = scmp.lt.u32.totalorder %s3522_s3, %s4883_s25 }
  0xb1   :  { %p3528_p10 = pnand %p3526_p9, %p3523_p8 }
  0xb3   :  { %3531 = shalt.err (!%p3528_p10)
}
  0xb4   :  { %s3532_s22 = scalar_lea.vmem %s67_s11, 64  ;;  %p3537_p12 = scmp.lt.s32.totalorder %s67_s11, %s67_s11 }
  0xb5   :  { %p3533_p11 = scmp.ne.s32.totalorder %s67_s11, %s3532_s22  ;;  %p3538_p13 = scmp.lt.s32.totalorder %s3532_s22, %s3532_s22 }
  0xb7   :  { %p3539_p0 = por %p3538_p13, %p3537_p12 }
  0xb9   :  { %p3540_p1 = pnand %p3539_p0, %p3533_p11 }
  0xbb   :  { %3543 = shalt.err (!%p3540_p1)
}
  0xbc   :  { %72 = dma.hbm_to_vmem [thread:$0]  %s4883_s25, 64, %s67_s11, [#allocation9], %s3830_s29, %s3830_s29, %s3831_s21  }
  0xbd   :  { %s3544_s18 = scalar_lea.hbm %s4840_s4, 32 }
  0xbe   :  { %p3545_p2 = scmp.ne.s32.totalorder %s4840_s4, %s3544_s18  ;;  %p3548_p3 = scmp.lt.u32.totalorder %s3544_s18, %s4840_s4 }
  0xc0   :  { %p3550_p4 = pnand %p3548_p3, %p3545_p2 }
  0xc2   :  { %3553 = shalt.err (!%p3550_p4)
}
  0xc3   :  { %s3554_s28 = scalar_lea.vmem %s4100_s9, 32  ;;  %p3559_p6 = scmp.lt.s32.totalorder %s4100_s9, %s4100_s9 }
  0xc4   :  { %p3555_p5 = scmp.ne.s32.totalorder %s4100_s9, %s3554_s28  ;;  %p3560_p7 = scmp.lt.s32.totalorder %s3554_s28, %s3554_s28 }
  0xc6   :  { %p3561_p8 = por %p3560_p7, %p3559_p6 }
  0xc8   :  { %p3562_p9 = pnand %p3561_p8, %p3555_p5 }
  0xca   :  { %3565 = shalt.err (!%p3562_p9)
}
  0xcb   :  { %96 = dma.hbm_to_vmem [thread:$0]  %s4840_s4, 32, %s4100_s9, [#allocation12], %s3822_s30, %s3822_s30, %s3823_s1  }
  0xcc   :  { %s3834_s19 = smov [#allocation16]   ;;  %s3566_s13 = scalar_lea.hbm %s4842_s6, 768 }
  0xcd   :  { %s114_s26 = sshll.u32 %s3834_s19, 4  ;;  %p3567_p10 = scmp.ne.s32.totalorder %s4842_s6, %s3566_s13  ;;  %s115_s26 = int_to_ptr.vmem [resolvable:$true] %s114_s26 }
  0xce   :  { %p3570_p11 = scmp.lt.u32.totalorder %s3566_s13, %s4842_s6 }
  0xd0   :  { %p3572_p12 = pnand %p3570_p11, %p3567_p10 }
  0xd2   :  { %3575 = shalt.err (!%p3572_p12)
}
  0xd3   :  { %s3576_s23 = scalar_lea.vmem %s115_s26, 768  ;;  %p3581_p0 = scmp.lt.s32.totalorder %s115_s26, %s115_s26 }
  0xd4   :  { %p3577_p13 = scmp.ne.s32.totalorder %s115_s26, %s3576_s23  ;;  %p3582_p1 = scmp.lt.s32.totalorder %s3576_s23, %s3576_s23 }
  0xd6   :  { %p3583_p2 = por %p3582_p1, %p3581_p0 }
  0xd8   :  { %p3584_p3 = pnand %p3583_p2, %p3577_p13 }
  0xda   :  { %3587 = shalt.err (!%p3584_p3)
}
  0xdb   :  { %s3835_s4 = smov 192   ;;  %s3836_s30 = smov 12  }
  0xdc   :  { %120 = dma.hbm_to_vmem [thread:$0]  %s4842_s6, 768, %s115_s26, [#allocation15], %s3835_s4, %s3835_s4, %s3836_s30  }
  0xdd   :  { %s3837_s3 = smov [#allocation19]   ;;  %s3838_s28 = smov [#allocation22]  }
  0xde   :  { %s138_s20 = sshll.u32 %s3837_s3, 4  ;;  %s162_s11 = sshll.u32 %s3838_s28, 4  ;;  %s139_s20 = int_to_ptr.vmem [resolvable:$true] %s138_s20  ;;  %s163_s11 = int_to_ptr.vmem [resolvable:$true] %s162_s11 }
  0xdf   :  { %s3588_s22 = scalar_lea.hbm %s4844_s8, 1536 }
  0xe0   :  { %p3589_p4 = scmp.ne.s32.totalorder %s4844_s8, %s3588_s22  ;;  %p3592_p5 = scmp.lt.u32.totalorder %s3588_s22, %s4844_s8 }
  0xe2   :  { %p3594_p6 = pnand %p3592_p5, %p3589_p4 }
  0xe4   :  { %3597 = shalt.err (!%p3594_p6)
}
  0xe5   :  { %s3598_s6 = scalar_lea.vmem %s139_s20, 1536  ;;  %p3603_p8 = scmp.lt.s32.totalorder %s139_s20, %s139_s20 }
  0xe6   :  { %p3599_p7 = scmp.ne.s32.totalorder %s139_s20, %s3598_s6  ;;  %p3604_p9 = scmp.lt.s32.totalorder %s3598_s6, %s3598_s6 }
  0xe8   :  { %p3605_p10 = por %p3604_p9, %p3603_p8 }
  0xea   :  { %p3606_p11 = pnand %p3605_p10, %p3599_p7 }
  0xec   :  { %3609 = shalt.err (!%p3606_p11)
}
  0xed   :  { %144 = dma.hbm_to_vmem [thread:$0]  %s4844_s8, 1536, %s139_s20, [#allocation18], %s4881_s0, %s4881_s0, %s4880_s5  }
  0xee   :  { %s3610_s4 = scalar_lea.hbm %s4846_s10, 256 }
  0xef   :  { %p3611_p12 = scmp.ne.s32.totalorder %s4846_s10, %s3610_s4  ;;  %p3614_p13 = scmp.lt.u32.totalorder %s3610_s4, %s4846_s10 }
  0xf1   :  { %p3616_p0 = pnand %p3614_p13, %p3611_p12 }
  0xf3   :  { %3619 = shalt.err (!%p3616_p0)
}
  0xf4   :  { %s3620_s28 = scalar_lea.vmem %s163_s11, 256  ;;  %p3625_p2 = scmp.lt.s32.totalorder %s163_s11, %s163_s11 }
  0xf5   :  { %p3621_p1 = scmp.ne.s32.totalorder %s163_s11, %s3620_s28  ;;  %p3626_p3 = scmp.lt.s32.totalorder %s3620_s28, %s3620_s28 }
  0xf7   :  { %p3627_p4 = por %p3626_p3, %p3625_p2 }
  0xf9   :  { %p3628_p5 = pnand %p3627_p4, %p3621_p1 }
  0xfb   :  { %3631 = shalt.err (!%p3628_p5)
}
  0xfc   :  { %168 = dma.hbm_to_vmem [thread:$0]  %s4846_s10, 256, %s163_s11, [#allocation21], %s4881_s0, %s4881_s0, %s4880_s5  }
  0xfd   :  { %s3839_s25 = smov [#allocation25]   ;;  %s3840_s22 = smov [#allocation28]  }
  0xfe   :  { %s186_s19 = sshll.u32 %s3839_s25, 4  ;;  %s210_s7 = sshll.u32 %s3840_s22, 4  ;;  %s187_s19 = int_to_ptr.vmem [resolvable:$true] %s186_s19  ;;  %s211_s7 = int_to_ptr.vmem [resolvable:$true] %s210_s7 }
  0xff   :  { %s3632_s27 = scalar_lea.hbm %s4848_s12, 256 }
 0x100   :  { %p3633_p6 = scmp.ne.s32.totalorder %s4848_s12, %s3632_s27  ;;  %p3636_p7 = scmp.lt.u32.totalorder %s3632_s27, %s4848_s12 }
 0x102   :  { %p3638_p8 = pnand %p3636_p7, %p3633_p6 }
 0x104   :  { %3641 = shalt.err (!%p3638_p8)
}
 0x105   :  { %s3642_s10 = scalar_lea.vmem %s187_s19, 256  ;;  %p3647_p10 = scmp.lt.s32.totalorder %s187_s19, %s187_s19 }
 0x106   :  { %p3643_p9 = scmp.ne.s32.totalorder %s187_s19, %s3642_s10  ;;  %p3648_p11 = scmp.lt.s32.totalorder %s3642_s10, %s3642_s10 }
 0x108   :  { %p3649_p12 = por %p3648_p11, %p3647_p10 }
 0x10a   :  { %p3650_p13 = pnand %p3649_p12, %p3643_p9 }
 0x10c   :  { %3653 = shalt.err (!%p3650_p13)
}
 0x10d   :  { %192 = dma.hbm_to_vmem [thread:$0]  %s4848_s12, 256, %s187_s19, [#allocation24], %s4881_s0, %s4881_s0, %s4880_s5  }
 0x10e   :  { %s3654_s1 = scalar_lea.hbm %s4850_s14, 192 }
 0x10f   :  { %p3655_p0 = scmp.ne.s32.totalorder %s4850_s14, %s3654_s1  ;;  %p3658_p1 = scmp.lt.u32.totalorder %s3654_s1, %s4850_s14 }
 0x111   :  { %p3660_p2 = pnand %p3658_p1, %p3655_p0 }
 0x113   :  { %3663 = shalt.err (!%p3660_p2)
}
 0x114   :  { %s3664_s20 = scalar_lea.vmem %s211_s7, 192  ;;  %p3669_p4 = scmp.lt.s32.totalorder %s211_s7, %s211_s7 }
 0x115   :  { %p3665_p3 = scmp.ne.s32.totalorder %s211_s7, %s3664_s20  ;;  %p3670_p5 = scmp.lt.s32.totalorder %s3664_s20, %s3664_s20 }
 0x117   :  { %p3671_p6 = por %p3670_p5, %p3669_p4 }
 0x119   :  { %p3672_p7 = pnand %p3671_p6, %p3665_p3 }
 0x11b   :  { %3675 = shalt.err (!%p3672_p7)
}
 0x11c   :  { %216 = dma.hbm_to_vmem [thread:$0]  %s4850_s14, 192, %s211_s7, [#allocation27], %s3830_s29, %s3830_s29, %s3831_s21  }
 0x11d   :  { %s3841_s0 = smov [#allocation29]   ;;  %s3676_s13 = scalar_lea.hbm %s4851_s15, 96 }
 0x11e   :  { %s222_s25 = sshll.u32 %s3841_s0, 4  ;;  %p3677_p8 = scmp.ne.s32.totalorder %s4851_s15, %s3676_s13  ;;  %s223_s25 = int_to_ptr.vmem [resolvable:$true] %s222_s25 }
 0x11f   :  { %p3680_p9 = scmp.lt.u32.totalorder %s3676_s13, %s4851_s15 }
 0x121   :  { %p3682_p10 = pnand %p3680_p9, %p3677_p8 }
 0x123   :  { %3685 = shalt.err (!%p3682_p10)
}
 0x124   :  { %s3686_s18 = scalar_lea.vmem %s223_s25, 96  ;;  %p3691_p12 = scmp.lt.s32.totalorder %s223_s25, %s223_s25 }
 0x125   :  { %p3687_p11 = scmp.ne.s32.totalorder %s223_s25, %s3686_s18  ;;  %p3692_p13 = scmp.lt.s32.totalorder %s3686_s18, %s3686_s18 }
 0x127   :  { %p3693_p0 = por %p3692_p13, %p3691_p12 }
 0x129   :  { %p3694_p1 = pnand %p3693_p0, %p3687_p11 }
 0x12b   :  { %3697 = shalt.err (!%p3694_p1)
}
 0x12c   :  { %228 = dma.hbm_to_vmem [thread:$0]  %s4851_s15, 96, %s223_s25, [#allocation30], %s3830_s29, %s3830_s29, %s3831_s21  }
 0x12d   :  { %3790 = dma.done.wait [#allocation6], 96  }
 0x12e   :  { %3791 = vsyncadd [#allocation6], 4294967200 }
 0x12f   :  { %3792 = dma.done.wait [#allocation9], 448  }
 0x130   :  { %3793 = vsyncadd [#allocation9], 4294966848 }
 0x131   :  { %3794 = dma.done.wait [#allocation12], 64  }
 0x132   :  { %3795 = vsyncadd [#allocation12], 4294967232 }
 0x133   :  { %3796 = dma.done.wait [#allocation15], 800  }
 0x134   :  { %3797 = vsyncadd [#allocation15], 4294966496 }
 0x135   :  { %3798 = dma.done.wait [#allocation18], 3072  }
 0x136   :  { %3799 = vsyncadd [#allocation18], 4294964224 }
 0x137   :  { %3800 = dma.done.wait [#allocation21], 352  }
 0x138   :  { %3801 = vsyncadd [#allocation21], 4294966944 }
 0x139   :  { %3802 = dma.done.wait [#allocation24], 512  }
 0x13a   :  { %3803 = vsyncadd [#allocation24], 4294966784 }
 0x13b   :  { %3804 = dma.done.wait [#allocation27], 384  }
 0x13c   :  { %3805 = vsyncadd [#allocation27], 4294966912 }
 0x13d   :  { %3806 = dma.done.wait [#allocation30], 96  }
 0x13e   :  { %3807 = vsyncadd [#allocation30], 4294967200  ;;  %v4224_v0 = vld [vmem:[#allocation11] ss:$0 sm:$0xff]  ;;  %v4226_v1 = vld [vmem:[#allocation11 + $0x1] ss:$0 sm:$0xff] }
 0x13f   :  { %v4228_v2 = vld [vmem:[#allocation13] ss:$0 sm:$0xff]  ;;  %v4230_v3 = vld [vmem:[#allocation13 + $0x1] ss:$0 sm:$0xff]  ;;  %v4232_v4 = vld [vmem:[#allocation14] ss:$0 sm:$0xff] }
 0x140   :  { %v4234_v5 = vld [vmem:[#allocation14 + $0x1] ss:$0 sm:$0xff]  ;;  %v4236_v6 = vld [vmem:[#allocation16] sm:$0xff]  ;;  %v4238_v7 = vld [vmem:[#allocation16 + $0x8] sm:$0xf]  ;;  %vm288_vm0 = vcmask 254976  }
 0x141   :  { %4884 = vst [vmem:[#allocation49_spill] sm:$0xff] %v4236_v6  ;;  %4885 = vst [vmem:[#allocation50_spill] sm:$0xff] %v4238_v7  ;;  %v4240_v8 = vld [vmem:[#allocation16 + $0xc] sm:$0xff]  ;;  %v4242_v9 = vld [vmem:[#allocation16 + $0x14] sm:$0xf]  ;;  %s4291_s15 = smov 0  }
 0x142   :  { %4886 = vst [vmem:[#allocation51_spill] sm:$0xff] %v4240_v8  ;;  %4887 = vst [vmem:[#allocation52_spill] sm:$0xff] %v4242_v9  ;;  %v4244_v10 = vld [vmem:[#allocation16 + $0x18] sm:$0xff]  ;;  %v4246_v11 = vld [vmem:[#allocation16 + $0x20] sm:$0xf] }
 0x143   :  { %4888 = vst [vmem:[#allocation53_spill] sm:$0xff] %v4244_v10  ;;  %4889 = vst [vmem:[#allocation54_spill] sm:$0xff] %v4246_v11  ;;  %v4248_v12 = vld [vmem:[#allocation16 + $0x24] sm:$0xff]  ;;  %v4250_v13 = vld [vmem:[#allocation16 + $0x2c] sm:$0xf] }
 0x144   :  { %4890 = vst [vmem:[#allocation55_spill] sm:$0xff] %v4248_v12  ;;  %4891 = vst [vmem:[#allocation56_spill] sm:$0xff] %v4250_v13  ;;  %v4252_v14 = vld [vmem:[#allocation22] sm:$0xf]  ;;  %v4254_v15 = vld [vmem:[#allocation22 + $0x4] sm:$0xf] }
 0x145   :  { %v4256_v16 = vld [vmem:[#allocation22 + $0x8] sm:$0xf]  ;;  %v4258_v17 = vld [vmem:[#allocation22 + $0xc] sm:$0xf]  ;;  %v4260_v18 = vld [vmem:[#allocation23] sm:$0xf] }
 0x146   :  { %v4262_v19 = vld [vmem:[#allocation23 + $0x4] sm:$0xf]  ;;  %v4264_v20 = vld [vmem:[#allocation23 + $0x8] sm:$0xf]  ;;  %v4266_v21 = vld [vmem:[#allocation23 + $0xc] sm:$0xf] }
 0x147   :  { %v4268_v22 = vld [vmem:[#allocation25] sm:$0xf]  ;;  %v4270_v23 = vld [vmem:[#allocation25 + $0x4] sm:$0xf]  ;;  %v4272_v24 = vld [vmem:[#allocation25 + $0x8] sm:$0xf] }
 0x148   :  { %v4274_v25 = vld [vmem:[#allocation25 + $0xc] sm:$0xf]  ;;  %v282_v26 = vld [vmem:[#allocation26] sm:$0x3]  ;;  %v283_v27 = vld [vmem:[#allocation26 + $0x2] sm:$0x3] }
 0x149   :  { %289 = vst.msk [vmem:[#allocation2] sm:$0x3] %vm288_vm0, %v282_v26  ;;  %v284_v28 = vld [vmem:[#allocation26 + $0x4] sm:$0x3]  ;;  %v285_v29 = vld [vmem:[#allocation26 + $0x6] sm:$0x3] }
 0x14a   :  { %290 = vst.msk [vmem:[#allocation2 + $0x2] sm:$0x3] %vm288_vm0, %v283_v27  ;;  %291 = vst.msk [vmem:[#allocation2 + $0x4] sm:$0x3] %vm288_vm0, %v284_v28  ;;  %v286_v30 = vld [vmem:[#allocation26 + $0x8] sm:$0x3] }
 0x14b   :  { %292 = vst.msk [vmem:[#allocation2 + $0x6] sm:$0x3] %vm288_vm0, %v285_v29  ;;  %v287_v31 = vld [vmem:[#allocation26 + $0xa] sm:$0x3]  ;;  %v295_v32 = vld [vmem:[#allocation28] sm:$0x3] }
 0x14c   :  { %293 = vst.msk [vmem:[#allocation2 + $0x8] sm:$0x3] %vm288_vm0, %v286_v30  ;;  %294 = vst.msk [vmem:[#allocation2 + $0xa] sm:$0x3] %vm288_vm0, %v287_v31  ;;  %v296_v33 = vld [vmem:[#allocation28 + $0x2] sm:$0x3] }
 0x14d   :  { %301 = vst.msk [vmem:[#allocation3] sm:$0x3] %vm288_vm0, %v295_v32  ;;  %v297_v34 = vld [vmem:[#allocation28 + $0x4] sm:$0x3]  ;;  %v298_v35 = vld [vmem:[#allocation28 + $0x6] sm:$0x3] }
 0x14e   :  { %302 = vst.msk [vmem:[#allocation3 + $0x2] sm:$0x3] %vm288_vm0, %v296_v33  ;;  %303 = vst.msk [vmem:[#allocation3 + $0x4] sm:$0x3] %vm288_vm0, %v297_v34  ;;  %v299_v36 = vld [vmem:[#allocation28 + $0x8] sm:$0x3] }
 0x14f   :  { %304 = vst.msk [vmem:[#allocation3 + $0x6] sm:$0x3] %vm288_vm0, %v298_v35  ;;  %v300_v37 = vld [vmem:[#allocation28 + $0xa] sm:$0x3]  ;;  %v307_v38 = vld [vmem:[#allocation29] sm:$0x3] }
 0x150   :  { %305 = vst.msk [vmem:[#allocation3 + $0x8] sm:$0x3] %vm288_vm0, %v299_v36  ;;  %306 = vst.msk [vmem:[#allocation3 + $0xa] sm:$0x3] %vm288_vm0, %v300_v37  ;;  %v308_v39 = vld [vmem:[#allocation29 + $0x2] sm:$0x3] }
 0x151   :  { %310 = vst.msk [vmem:[#allocation4] sm:$0x3] %vm288_vm0, %v307_v38  ;;  %v309_v40 = vld [vmem:[#allocation29 + $0x4] sm:$0x3]  ;;  %311 = vst.msk [vmem:[#allocation4 + $0x2] sm:$0x3] %vm288_vm0, %v308_v39 }
 0x152   :  { %312 = vst.msk [vmem:[#allocation4 + $0x4] sm:$0x3] %vm288_vm0, %v309_v40 }
 0x153 LB: > { %v4892_v12 = vld [vmem:[#allocation55_spill] sm:$0xff]  ;;  %v4893_v10 = vld [vmem:[#allocation53_spill] sm:$0xff]  ;;  %v4896_v9 = vld [vmem:[#allocation52_spill] sm:$0xff]  ;;  %v4869_v44 = vmov 0.0   ;;  %s2760_s2 = sshll.u32 %s3816_s15, 1  ;;  %vm3843_vm1 = vmmov 0   ;;  %s3816_s15 = sphi %s4291_s15, %s344_s15  }
 0x154   : > { %v4894_v8 = vld [vmem:[#allocation51_spill] sm:$0xff]  ;;  %v4895_v6 = vld [vmem:[#allocation49_spill] sm:$0xff]  ;;  %v4897_v7 = vld [vmem:[#allocation50_spill] sm:$0xff]  ;;  %2931 = vmatprep.subr.bf16.mxu1 %v4869_v44  ;;  %v2765_v45 = vcombine.high %v4893_v10, %v4892_v12  ;;  %v2764_v47 = vcombine.low %v4893_v10, %v4892_v12  ;;  %2935 = vmatprep.mubr.msk.bf16.mxu1 %vm3843_vm1, %v4869_v44  ;;  %s349_s10 = scalar_lea.vmem [#allocation5], %s2760_s2  ;;  %v3844_v49 = vmov 0   ;;  %vm384_vm2 = vcmask 261120  }
 0x155   : > { %v2762_v41 = vcombine.high %v4895_v6, %v4894_v8  ;;  %v2763_v42 = vcombine.low %v4897_v7, %v4896_v9  ;;  %v2761_v43 = vcombine.low %v4895_v6, %v4894_v8  ;;  %v4898_v13 = vld [vmem:[#allocation56_spill] sm:$0xff]  ;;  %v4899_v11 = vld [vmem:[#allocation54_spill] sm:$0xff]  ;;  %v350_v48 = vld [vmem:[%s349_s10] sm:$0x3]  ;;  %420 = vmatprep.mubr.bf16.mxu0 %v3844_v49  ;;  %3221 = vset.pattern.permute.xlu1 %v3844_v49  ;;  %s3845_s11 = smov 64   ;;  %s3846_s23 = smov 32  }
 0x156   : > { %v2766_v46 = vcombine.low %v4899_v11, %v4898_v13  ;;  %v351_v50 = vpack.c.bf16 %v350_v48, %v350_v48  ;;  %v3227_v51 = vld [vmem:[#allocation17] sm:$0xff]   ;;  %v3229_v53 = vld [vmem:[#allocation17 + $0x8] sm:$0xff]   ;;  %v471_v38 = vld [vmem:[#allocation3] sm:$0x3]  ;;  %vm1803_vm3 = vcmask 1040384   ;;  %vm1806_vm4 = vcmask 1041408  }
 0x157   : > { %388 = vmatprep.subr.bf16.mxu0 %v2762_v41  ;;  %2932 = vmatpush3.bf16.msra.mxu1 %v2763_v42  ;;  %v3228_v52 = vld [vmem:[#allocation19] sm:$0xff]   ;;  %v3230_v55 = vld [vmem:[#allocation19 + $0x8] sm:$0xff]   ;;  %s3848_s4 = smov 96   ;;  %vm1917_vm5 = vcmask 26624   ;;  %vm2104_vm6 = vcmask 157696   ;;  %s3849_s30 = smov 118  }
 0x158   : > { %389 = vmatpush1.bf16.msra.mxu0 %v2761_v43  ;;  %2933 = vmatprep.subr.bf16.mxu1 %v4869_v44  ;;  %v469_v54 = vld [vmem:[#allocation4] sm:$0x3]  ;;  %v470_v56 = vld [vmem:[#allocation2] sm:$0x3]  ;;  %v2775_v27 = vld [vmem:[#allocation20] ss:$0 sm:$0xff] }
 0x159   : > { %390 = vmatprep.subr.bf16.mxu0 %v2765_v45  ;;  %v472_v57 = vpack.c.bf16 %v469_v54, %v469_v54  ;;  %v477_v58 = vpack.c.bf16 %v470_v56, %v470_v56  ;;  %v650_v54 = vld [vmem:[#allocation2 + $0x2] sm:$0x3]  ;;  %v3235_v56 = vld [vmem:[#allocation19 + $0x20] sm:$0xff]   ;;  %s3850_s1 = smov 123   ;;  %s3851_s9 = smov 113   ;;  %vm2117_vm7 = vcmask 34816  }
 0x15a   : > { %p347_p2 = scmp.lt.s32.totalorder %s3816_s15, 3  ;;  %s2848_s28 = sshll.u32 %s3816_s15, 3  ;;  %vm2234_vm9 = vcmask 39936   ;;  %vm2240_vm10 = vcmask 121856   ;;  %vm2237_vm11 = vcmask 80896   ;;  %vm2246_vm12 = vcmask 162816  }
 0x15b   : > { %2934 = vmatpush3.bf16.msra.mxu1 %v2766_v46  ;;  %s2637_s8 = scalar_lea.vmem [#allocation32], %s2848_s28  ;;  %vm2397_vm13 = vcmask 1041409   ;;  %s2631_s20 = smul.u32 6, %s3816_s15 }
 0x15c   : > { %391 = vmatpush1.bf16.msra.mxu0 %v2764_v47  ;;  %2947 = vmatprep.subr.bf16.mxu1 %v4869_v44  ;;  %s629_s3 = scalar_select %p347_p2, 1, 0 }
 0x15d   : > { %2939 = vmatprep.subr.bf16.mxu0 %v4869_v44  ;;  %s2632_s12 = scalar_lea.vmem [#allocation31], %s2631_s20  ;;  %s344_s15 = sadd.s32 1, %s3816_s15  }
 0x15e   : > { %2936 = vmatmul.mubr.msk.bf16.vlgmr.msra.gmra.mrb[0].mxu1 %vm384_vm2, %v351_v50  ;;  %p341_p3 = scmp.ge.s32.totalorder %s344_s15, 3  }
 0x15f   : > { %2767 = vmatmul.mubr.msk.bf16.vlgmr.msra.gmra.mrb[0].mxu0 %vm384_vm2, %v351_v50  ;;  %2948 = vmatpush3.bf16.msra.mxu1 %v3227_v51  ;;  %v3231_v50 = vld [vmem:[#allocation19 + $0x10] sm:$0xff]   ;;  %s3855_s5 = smov (%p341_p3), [#allocation32]   ;;  %s3856_s25 = smov (%p341_p3), [#allocation31]  }
 0x160   : > { %2940 = vmatpush3.bf16.msra.mxu0 %v3228_v52  ;;  %2949 = vmatprep.subr.bf16.mxu1 %v4869_v44  ;;  %v3232_v51 = vld [vmem:[#allocation17 + $0x10] sm:$0xff]   ;;  %v3233_v52 = vld [vmem:[#allocation19 + $0x18] sm:$0xff]   ;;  %s2694_s0 = sshll.u32 (%p341_p3), %s3855_s5, 4  ;;  %s2682_s19 = sshll.u32 (%p341_p3), %s3856_s25, 4  ;;  %s2695_s0 = int_to_ptr.vmem [resolvable:$true] %s2694_s0  ;;  %s4762_s19 = int_to_ptr.vmem [resolvable:$true] %s2682_s19 }
 0x161   : > { %2941 = vmatprep.subr.bf16.mxu0 %v4869_v44  ;;  %2951 = vmatprep.mubr.msk.bf16.mxu1 %vm3843_vm1, %v4869_v44  ;;  %s3698_s22 = scalar_lea.vmem (%p341_p3), %s2695_s0, 384  ;;  %p3703_p5 = scmp.lt.s32.totalorder (%p341_p3), %s2695_s0, %s2695_s0 }
 0x162   : > { %2943 = vmatprep.mubr.msk.bf16.mxu0 %vm3843_vm1, %v4869_v44  ;;  %p3699_p4 = scmp.ne.s32.totalorder (%p341_p3), %s2695_s0, %s3698_s22  ;;  %p3704_p6 = scmp.lt.s32.totalorder (%p341_p3), %s3698_s22, %s3698_s22 }
 0x163   : > { %2950 = vmatpush3.bf16.msra.mxu1 %v3229_v53  ;;  %v3234_v53 = vld [vmem:[#allocation17 + $0x18] sm:$0xff]  }
 0x164   : > { %2942 = vmatpush3.bf16.msra.mxu0 %v3230_v55  ;;  %2963 = vmatprep.subr.bf16.mxu1 %v4869_v44  ;;  %v659_v55 = vpack.c.bf16 %v650_v54, %v650_v54  ;;  %p3705_p7 = por (%p341_p3), %p3704_p6, %p3703_p5 }
 0x165   : > { %2955 = vmatprep.subr.bf16.mxu0 %v4869_v44 }
 0x166   : > { %2952 = vmatmul.mubr.msk.bf16.vlgmr.msra.gmra.mrb[4].mxu1 %vm384_vm2, %v472_v57  ;;  %p3706_p8 = pnand (%p341_p3), %p3705_p7, %p3699_p4 }
 0x167   : > { %2944 = vmatmul.mubr.msk.bf16.vlgmr.msra.gmra.mrb[4].mxu0 %vm384_vm2, %v477_v58  ;;  %2967 = vmatprep.mubr.msk.bf16.mxu1 %vm3843_vm1, %v4869_v44  ;;  %v3237_v58 = vld [vmem:[#allocation19 + $0x28] sm:$0xff]  }
 0x168   : > { %2959 = vmatprep.mubr.msk.bf16.mxu0 %vm3843_vm1, %v4869_v44  ;;  %2956 = vmatpush3.bf16.msra.mxu0 %v3231_v50  ;;  %v2791_v50 = vld [vmem:[#allocation20 + $0x2] ss:$0 sm:$0xff] }
 0x169   : > { %2964 = vmatpush3.bf16.msra.mxu1 %v3232_v51  ;;  %2957 = vmatprep.subr.bf16.mxu0 %v4869_v44 }
 0x16a   : > { %2965 = vmatprep.subr.bf16.mxu1 %v4869_v44 }
 0x16c   : > { %2958 = vmatpush3.bf16.msra.mxu0 %v3233_v52 }
 0x16d   : > { %2966 = vmatpush3.bf16.msra.mxu1 %v3234_v53  ;;  %2971 = vmatprep.subr.bf16.mxu0 %v4869_v44 }
 0x16e   : > { %2979 = vmatprep.subr.bf16.mxu1 %v4869_v44 }
 0x16f   : > { %2960 = vmatmul.mubr.msk.bf16.vlgmr.msra.gmra.mrb[8].mxu0 %vm384_vm2, %v659_v55 }
 0x170   : > { %2972 = vmatpush3.bf16.msra.mxu0 %v3235_v56  ;;  %2975 = vmatprep.mubr.msk.bf16.mxu0 %vm3843_vm1, %v4869_v44 }
 0x171   : > { %2973 = vmatprep.subr.bf16.mxu0 %v4869_v44 }
 0x174   : > { %2974 = vmatpush3.bf16.msra.mxu0 %v3237_v58 }
 0x175   : > { %2987 = vmatprep.subr.bf16.mxu0 %v4869_v44 }
 0x232   : > { %v422_v59 = vpop.f32.mrb[0].mxu0 }
 0x233   : > { %v4331_v60 = vpop.f32.mrb[1].mxu0 }
 0x234   : > { %v426_v61 = vpop.f32.mrb[2].mxu0 }
 0x235   : > { %v427_v62 = vpop.f32.mrb[3].mxu0 }
 0x239   : > { %v586_v63 = vpop.f32.mrb[4].mxu1 }
 0x23a   : > { %v531_v26 = vpop.f32.mrb[4].mxu0  ;;  %v2953_v28 = vpop.f32.mrb[5].mxu1 }
 0x23b   : > { %v587_v29 = vadd.f32 %v586_v63, %v531_v26  ;;  %v2945_v30 = vpop.f32.mrb[5].mxu0  ;;  %v589_v31 = vpop.f32.mrb[6].mxu1 }
 0x23c   : > { %v534_v32 = vpop.f32.mrb[6].mxu0  ;;  %v2954_v33 = vpop.f32.mrb[7].mxu1 }
 0x23d   : > { %v599_v34 = vadd.f32 %v2775_v27, %v587_v29  ;;  %v2946_v35 = vpop.f32.mrb[7].mxu0  ;;  %v836_v27 = vld [vmem:[#allocation3 + $0x4] sm:$0x3]  ;;  %v3236_v32 = vld [vmem:[#allocation17 + $0x20] sm:$0xff]  }
 0x23e   : > { %v832_v35 = vld [vmem:[#allocation4 + $0x2] sm:$0x3] }
 0x23f   : > { %v600_v36 = vadd.f32 %v599_v34, %v422_v59  ;;  %v834_v59 = vld [vmem:[#allocation2 + $0x4] sm:$0x3] }
 0x240   : > { %v843_v61 = vpack.c.bf16 %v834_v59, %v834_v59  ;;  %v3238_v34 = vld [vmem:[#allocation17 + $0x28] sm:$0xff]  }
 0x241   : > { %3255 = vtanh.f32 %v600_v36  ;;  %v2776_v39 = vmul.f32 -1.442695, %v600_v36  ;;  %v837_v36 = vpack.c.bf16 %v832_v35, %v832_v35 }
 0x242   : > { %2976 = vmatmul.mubr.msk.bf16.vlgmr.msra.gmra.mrb[12].mxu0 %vm384_vm2, %v843_v61  ;;  %v714_v28 = vpop.f32.mrb[8].mxu0 }
 0x243   : > { %3257 = vpow2.f32 %v2776_v39  ;;  %2991 = vmatprep.mubr.msk.bf16.mxu0 %vm3843_vm1, %v4869_v44  ;;  %v2961_v29 = vpop.f32.mrb[9].mxu0 }
 0x244   : > { %v717_v30 = vpop.f32.mrb[10].mxu0 }
 0x245   : > { %v2962_v31 = vpop.f32.mrb[11].mxu0 }
 0x246   : > { %v3239_v31 = vld [vmem:[#allocation19 + $0x30] sm:$0xff]  }
 0x247   : > { %2988 = vmatpush3.bf16.msra.mxu0 %v3239_v31 }
 0x248   : > { %2989 = vmatprep.subr.bf16.mxu0 %v4869_v44 }
 0x24b   : > { %v3256_v37 = vpop.eup %3255 }
 0x24c   : > { %614 = vrot.lane.b32.xlu0 %v3256_v37, %s3845_s11 }
 0x24d   : > { %v3258_v40 = vpop.eup %3257 }
 0x24e   : > { %v604_v41 = vadd.f32 1.0, %v3258_v40 }
 0x250   : > { %609 = vrot.lane.b32.xlu0 %v471_v38, %s3846_s23  ;;  %3259 = vrcp.f32 %v604_v41 }
 0x25a   : > { %v3260_v42 = vpop.eup %3259 }
 0x2be   : > { %v615_v43 = vpop.permute.xlu0 %614 }
 0x2bf   : > { %v617_v45 = vmul.f32 %v3260_v42, %v615_v43 }
 0x2c1   : > { %619 = vrot.lane.b32.xlu1 %v617_v45, %s3846_s23 }
 0x2c2   : > { %v4336_v46 = vpop.permute.xlu0 %609 }
 0x2c3   : > { %v612_v47 = vmul.f32 %v3260_v42, %v4336_v46 }
 0x315   : > { %v898_v37 = vpop.f32.mrb[12].mxu0 }
 0x316   : > { %v2977_v38 = vpop.f32.mrb[13].mxu0 }
 0x317   : > { %v901_v39 = vpop.f32.mrb[14].mxu0 }
 0x318   : > { %v2978_v40 = vpop.f32.mrb[15].mxu0 }
 0x333   : > { %v620_v48 = vpop.permute.xlu1 %619 }
 0x334   : > { %v4339_v49 = vadd.f32 %v620_v48, %v612_v47 }
 0x336   : > { %3261 = vtanh.f32 %v4339_v49 }
 0x340   : > { %v3262_v57 = vpop.eup %3261 }
 0x341   : > { %625 = vrot.lane.b32.xlu1 %v3262_v57, %s3845_s11 }
 0x3b3   : > { %v626_v62 = vpop.permute.xlu1 %625 }
 0x3b4   : > { %v4355_v63 = vmul.f32 %v3260_v42, %v626_v62 }
 0x3b6   : > { %v653_v26 = vpack.c.bf16 %v4355_v63, %v4355_v63 }
 0x3b8   : > { %721 = vrot.lane.b32.xlu0 %v653_v26, %s3846_s23 }
 0x3bc   : > { %977 = vrot.lane.b32.xlu0 %v836_v27, %s3846_s23 }
 0x42a   : > { %v722_v33 = vpop.permute.xlu0 %721 }
 0x42b   : > { %2968 = vmatmul.mubr.msk.bf16.vlgmr.msra.gmra.mrb[8].mxu1 %vm384_vm2, %v722_v33  ;;  %v3241_v33 = vld [vmem:[#allocation19 + $0x38] sm:$0xff]  }
 0x42c   : > { %2980 = vmatpush3.bf16.msra.mxu1 %v3236_v32  ;;  %2983 = vmatprep.mubr.msk.bf16.mxu1 %vm3843_vm1, %v4869_v44  ;;  %v3240_v32 = vld [vmem:[#allocation17 + $0x30] sm:$0xff]  }
 0x42d   : > { %2981 = vmatprep.subr.bf16.mxu1 %v4869_v44  ;;  %2990 = vmatpush3.bf16.msra.mxu0 %v3241_v33 }
 0x42e   : > { %3019 = vmatprep.subr.bf16.mxu0 %v4869_v44 }
 0x430   : > { %2982 = vmatpush3.bf16.msra.mxu1 %v3238_v34  ;;  %v3242_v34 = vld [vmem:[#allocation17 + $0x38] sm:$0xff]  }
 0x431   : > { %2995 = vmatprep.subr.bf16.mxu1 %v4869_v44 }
 0x433   : > { %2984 = vmatmul.mubr.msk.bf16.vlgmr.msra.gmra.mrb[12].mxu1 %vm384_vm2, %v837_v36  ;;  %v1014_v36 = vld [vmem:[#allocation2 + $0x6] sm:$0x3] }
 0x434   : > { %2999 = vmatprep.mubr.msk.bf16.mxu1 %vm3843_vm1, %v4869_v44  ;;  %2996 = vmatpush3.bf16.msra.mxu1 %v3240_v32 }
 0x435   : > { %2997 = vmatprep.subr.bf16.mxu1 %v4869_v44 }
 0x438   : > { %2998 = vmatpush3.bf16.msra.mxu1 %v3242_v34 }
 0x439   : > { %3003 = vmatprep.subr.bf16.mxu1 %v4869_v44 }
 0x4fe   : > { %v772_v41 = vpop.f32.mrb[8].mxu1 }
 0x4ff   : > { %v4369_v42 = vadd.f32 %v772_v41, %v714_v28  ;;  %v2969_v43 = vpop.f32.mrb[9].mxu1  ;;  %v4374_v28 = vpop.permute.xlu0 %977  ;;  %v1200_v41 = vld [vmem:[#allocation3 + $0x8] sm:$0x3] }
 0x500   : > { %v775_v45 = vpop.f32.mrb[10].mxu1  ;;  %v3243_v43 = vld [vmem:[#allocation19 + $0x40] sm:$0xff]  }
 0x501   : > { %v2970_v47 = vpop.f32.mrb[11].mxu1 }
 0x502   : > { %v3244_v47 = vld [vmem:[#allocation19 + $0x48] sm:$0xff]  }
 0x506   : > { %v953_v48 = vpop.f32.mrb[12].mxu1 }
 0x507   : > { %v954_v51 = vadd.f32 %v953_v48, %v898_v37  ;;  %v2985_v52 = vpop.f32.mrb[13].mxu1  ;;  %v1023_v37 = vpack.c.bf16 %v1014_v36, %v1014_v36  ;;  %v1198_v48 = vld [vmem:[#allocation2 + $0x8] sm:$0x3] }
 0x508   : > { %v956_v53 = vpop.f32.mrb[14].mxu1  ;;  %v3246_v52 = vld [vmem:[#allocation17 + $0x48] sm:$0xff]  }
 0x509   : > { %v967_v54 = vadd.f32 %v2791_v50, %v954_v51  ;;  %v2986_v55 = vpop.f32.mrb[15].mxu1  ;;  %2992 = vmatmul.mubr.msk.bf16.vlgmr.msra.gmra.mrb[16].mxu0 %vm384_vm2, %v1023_v37  ;;  %v1207_v50 = vpack.c.bf16 %v1198_v48, %v1198_v48  ;;  %v3245_v51 = vld [vmem:[#allocation17 + $0x40] sm:$0xff]  }
 0x50a   : > { %3023 = vmatprep.mubr.msk.bf16.mxu0 %vm3843_vm1, %v4869_v44  ;;  %v1196_v53 = vld [vmem:[#allocation4 + $0x4] sm:$0x3]  ;;  %v2783_v48 = vld [vmem:[#allocation20 + $0x1] ss:$0 sm:$0xff] }
 0x50b   : > { %v968_v56 = vadd.f32 %v967_v54, %v4331_v60  ;;  %v1201_v54 = vpack.c.bf16 %v1196_v53, %v1196_v53 }
 0x50d   : > { %3263 = vtanh.f32 %v968_v56  ;;  %v2792_v58 = vmul.f32 -1.442695, %v968_v56 }
 0x50f   : > { %3265 = vpow2.f32 %v2792_v58 }
 0x517   : > { %v3264_v57 = vpop.eup %3263 }
 0x518   : > { %982 = vrot.lane.b32.xlu1 %v3264_v57, %s3845_s11 }
 0x519   : > { %v3266_v59 = vpop.eup %3265 }
 0x51a   : > { %v972_v61 = vadd.f32 1.0, %v3266_v59 }
 0x51c   : > { %3267 = vrcp.f32 %v972_v61 }
 0x526   : > { %v3268_v62 = vpop.eup %3267 }
 0x527   : > { %v980_v29 = vmul.f32 %v3268_v62, %v4374_v28 }
 0x58a   : > { %v983_v26 = vpop.permute.xlu1 %982 }
 0x58b   : > { %v985_v27 = vmul.f32 %v3268_v62, %v983_v26 }
 0x58d   : > { %987 = vrot.lane.b32.xlu1 %v985_v27, %s3846_s23 }
 0x5dc   : > { %v1078_v55 = vpop.f32.mrb[16].mxu0 }
 0x5dd   : > { %v2993_v56 = vpop.f32.mrb[17].mxu0 }
 0x5de   : > { %v1081_v57 = vpop.f32.mrb[18].mxu0  ;;  %v3248_v56 = vld [vmem:[#allocation19 + $0x58] sm:$0xff]  }
 0x5df   : > { %v2994_v58 = vpop.f32.mrb[19].mxu0  ;;  %v4418_v57 = vld [vmem:[#allocation2 + $0xa] sm:$0x3] }
 0x5e0   : > { %v1387_v58 = vpack.c.bf16 %v4418_v57, %v4418_v57 }
 0x5ff   : > { %v988_v30 = vpop.permute.xlu1 %987 }
 0x600   : > { %v4377_v60 = vadd.f32 %v988_v30, %v980_v29  ;;  %v2807_v29 = vld [vmem:[#allocation20 + $0x4] ss:$0 sm:$0xff] }
 0x602   : > { %3269 = vtanh.f32 %v4377_v60 }
 0x60c   : > { %v3270_v35 = vpop.eup %3269 }
 0x60d   : > { %993 = vrot.lane.b32.xlu0 %v3270_v35, %s3845_s11 }
 0x67f   : > { %v994_v38 = vpop.permute.xlu0 %993 }
 0x680   : > { %v4388_v39 = vmul.f32 %v3268_v62, %v994_v38 }
 0x682   : > { %v1017_v40 = vpack.c.bf16 %v4388_v39, %v4388_v39 }
 0x684   : > { %1085 = vrot.lane.b32.xlu1 %v1017_v40, %s3846_s23 }
 0x688   : > { %1341 = vrot.lane.b32.xlu1 %v1200_v41, %s3846_s23 }
 0x6f6   : > { %v1086_v45 = vpop.permute.xlu1 %1085 }
 0x6f7   : > { %3000 = vmatmul.mubr.msk.bf16.vlgmr.msra.gmra.mrb[16].mxu1 %vm384_vm2, %v1086_v45 }
 0x6f8   : > { %3004 = vmatpush3.bf16.msra.mxu1 %v3243_v43  ;;  %3007 = vmatprep.mubr.msk.bf16.mxu1 %vm3843_vm1, %v4869_v44 }
 0x6f9   : > { %3005 = vmatprep.subr.bf16.mxu1 %v4869_v44 }
 0x6fa   : > { %v4409_v45 = vpop.permute.xlu1 %1341 }
 0x6fc   : > { %3006 = vmatpush3.bf16.msra.mxu1 %v3244_v47 }
 0x6fd   : > { %3011 = vmatprep.subr.bf16.mxu1 %v4869_v44 }
 0x6ff   : > { %3008 = vmatmul.mubr.msk.bf16.vlgmr.msra.gmra.mrb[0].mxu1 %vm384_vm2, %v1207_v50 }
 0x700   : > { %3012 = vmatpush3.bf16.msra.mxu1 %v3245_v51  ;;  %3015 = vmatprep.mubr.msk.bf16.mxu1 %vm3843_vm1, %v4869_v44 }
 0x701   : > { %3013 = vmatprep.subr.bf16.mxu1 %v4869_v44 }
 0x704   : > { %3014 = vmatpush3.bf16.msra.mxu1 %v3246_v52  ;;  %v786_v52 = vadd.f32 %v2783_v48, %v4369_v42  ;;  %v3249_v42 = vld [vmem:[#allocation17 + $0x50] sm:$0xff]  }
 0x705   : > { %3043 = vmatprep.subr.bf16.mxu1 %v4869_v44 }
 0x70b   : > { %3016 = vmatmul.mubr.msk.bf16.vlgmr.msra.gmra.mrb[0].mxu1 %vm384_vm2, %v1201_v54 }
 0x70c   : > { %3047 = vmatprep.mubr.msk.bf16.mxu1 %vm3843_vm1, %v4869_v44 }
 0x7ca   : > { %v1136_v59 = vpop.f32.mrb[16].mxu1 }
 0x7cb   : > { %v1137_v61 = vadd.f32 %v1136_v59, %v1078_v55  ;;  %v3001_v62 = vpop.f32.mrb[17].mxu1  ;;  %v3247_v55 = vld [vmem:[#allocation19 + $0x50] sm:$0xff]   ;;  %v3250_v59 = vld [vmem:[#allocation17 + $0x58] sm:$0xff]  }
 0x7cc   : > { %v1139_v26 = vpop.f32.mrb[18].mxu1  ;;  %3020 = vmatpush3.bf16.msra.mxu0 %v3247_v55  ;;  %v2799_v62 = vld [vmem:[#allocation20 + $0x3] ss:$0 sm:$0xff]  ;;  %v2815_v55 = vld [vmem:[#allocation20 + $0x5] ss:$0 sm:$0xff] }
 0x7cd   : > { %v3002_v27 = vpop.f32.mrb[19].mxu1  ;;  %3021 = vmatprep.subr.bf16.mxu0 %v4869_v44  ;;  %v1150_v26 = vadd.f32 %v2799_v62, %v1137_v61 }
 0x7d0   : > { %3022 = vmatpush3.bf16.msra.mxu0 %v3248_v56 }
 0x7d1   : > { %3027 = vmatprep.subr.bf16.mxu0 %v4869_v44 }
 0x7d3   : > { %3024 = vmatmul.mubr.msk.bf16.vlgmr.msra.gmra.mrb[20].mxu0 %vm384_vm2, %v1387_v58 }
 0x7d4   : > { %3028 = vmatpush3.bf16.msra.mxu0 %v3249_v42  ;;  %3031 = vmatprep.mubr.msk.bf16.mxu0 %vm3843_vm1, %v4869_v44 }
 0x7d5   : > { %3029 = vmatprep.subr.bf16.mxu0 %v4869_v44 }
 0x7d8   : > { %3030 = vmatpush3.bf16.msra.mxu0 %v3250_v59 }
 0x7d9   : > { %3035 = vmatprep.subr.bf16.mxu0 %v4869_v44 }
 0x7de   : > { %v1317_v30 = vpop.f32.mrb[0].mxu1 }
 0x7df   : > { %v3151_v31 = vadd.f32 %v2807_v29, %v1317_v30  ;;  %v3017_v32 = vpop.f32.mrb[1].mxu1 }
 0x7e0   : > { %v1320_v33 = vpop.f32.mrb[2].mxu1  ;;  %v652_v32 = vld [vmem:[#allocation3 + $0x2] sm:$0x3] }
 0x7e1   : > { %3271 = vtanh.f32 %v3151_v31  ;;  %v3018_v34 = vpop.f32.mrb[3].mxu1  ;;  %v2808_v36 = vmul.f32 -1.442695, %v3151_v31  ;;  %v1016_v33 = vld [vmem:[#allocation3 + $0x6] sm:$0x3] }
 0x7e2   : > { %v2800_v34 = vmul.f32 -1.442695, %v1150_v26 }
 0x7e3   : > { %3273 = vpow2.f32 %v2808_v36 }
 0x7eb   : > { %v3272_v35 = vpop.eup %3271 }
 0x7ec   : > { %1346 = vrot.lane.b32.xlu0 %v3272_v35, %s3845_s11 }
 0x7ed   : > { %v3274_v37 = vpop.eup %3273 }
 0x7ee   : > { %v1336_v38 = vadd.f32 1.0, %v3274_v37 }
 0x7f0   : > { %3275 = vrcp.f32 %v1336_v38 }
 0x7fa   : > { %v3276_v40 = vpop.eup %3275 }
 0x7fb   : > { %v1344_v47 = vmul.f32 %v3276_v40, %v4409_v45 }
 0x85e   : > { %v1347_v41 = vpop.permute.xlu0 %1346 }
 0x85f   : > { %v1349_v43 = vmul.f32 %v3276_v40, %v1347_v41 }
 0x861   : > { %1351 = vrot.lane.b32.xlu0 %v1349_v43, %s3846_s23 }
 0x8a6   : > { %v1442_v36 = vpop.f32.mrb[20].mxu0 }
 0x8a7   : > { %v3025_v37 = vpop.f32.mrb[21].mxu0 }
 0x8a8   : > { %v1445_v38 = vpop.f32.mrb[22].mxu0 }
 0x8d3   : > { %v1352_v50 = vpop.permute.xlu0 %1351 }
 0x8d4   : > { %v4412_v51 = vadd.f32 %v1352_v50, %v1344_v47  ;;  %v2784_v50 = vmul.f32 -1.442695, %v786_v52 }
 0x8d6   : > { %3277 = vtanh.f32 %v4412_v51 }
 0x8d7   : > { %3279 = vtanh.f32 %v786_v52  ;;  %v1380_v52 = vld [vmem:[#allocation3 + $0xa] sm:$0x3] }
 0x8d8   : > { %3281 = vtanh.f32 %v1150_v26 }
 0x8d9   : > { %3283 = vpow2.f32 %v2800_v34 }
 0x8e0   : > { %v3278_v53 = vpop.eup %3277 }
 0x8e1   : > { %1357 = vrot.lane.b32.xlu1 %v3278_v53, %s3845_s11  ;;  %v3280_v54 = vpop.eup %3279 }
 0x8e2   : > { %v3282_v31 = vpop.eup %3281 }
 0x8e3   : > { %v3284_v61 = vpop.eup %3283 }
 0x8e4   : > { %v1154_v35 = vadd.f32 1.0, %v3284_v61 }
 0x8e5   : > { %800 = vrot.lane.b32.xlu1 %v3280_v54, %s3845_s11 }
 0x8e6   : > { %3285 = vrcp.f32 %v1154_v35 }
 0x8e7   : > { %3287 = vpow2.f32 %v2784_v50 }
 0x8f0   : > { %v4440_v43 = vpop.eup %3285 }
 0x8f1   : > { %v3288_v53 = vpop.eup %3287 }
 0x8f2   : > { %v790_v59 = vadd.f32 1.0, %v3288_v53 }
 0x953   : > { %v1358_v27 = vpop.permute.xlu1 %1357 }
 0x954   : > { %v4429_v29 = vmul.f32 %v3276_v40, %v1358_v27  ;;  %v3026_v40 = vpop.f32.mrb[23].mxu0 }
 0x956   : > { %v1381_v30 = vpack.c.bf16 %v4429_v29, %v4429_v29 }
 0x958   : > { %1449 = vrot.lane.b32.xlu0 %v1381_v30, %s3846_s23  ;;  %v801_v30 = vpop.permute.xlu1 %800 }
 0x95c   : > { %1164 = vrot.lane.b32.xlu0 %v3282_v31, %s3845_s11 }
 0x960   : > { %795 = vrot.lane.b32.xlu0 %v652_v32, %s3846_s23 }
 0x964   : > { %1159 = vrot.lane.b32.xlu0 %v1016_v33, %s3846_s23 }
 0x9ca   : > { %v1450_v41 = vpop.permute.xlu0 %1449 }
 0x9cb   : > { %3032 = vmatmul.mubr.msk.bf16.vlgmr.msra.gmra.mrb[24].mxu0 %vm384_vm2, %v1450_v41 }
 0x9cc   : > { %3039 = vmatprep.mubr.msk.bf16.mxu0 %vm3843_vm1, %v4869_v44 }
 0x9ce   : > { %v1165_v47 = vpop.permute.xlu0 %1164 }
 0x9cf   : > { %v1167_v48 = vmul.f32 %v4440_v43, %v1165_v47 }
 0x9d1   : > { %1169 = vrot.lane.b32.xlu0 %v1167_v48, %s3846_s23 }
 0x9d2   : > { %v4447_v34 = vpop.permute.xlu0 %795 }
 0x9d6   : > { %v4449_v35 = vpop.permute.xlu0 %1159 }
 0x9d7   : > { %v1162_v38 = vmul.f32 %v4440_v43, %v4449_v35 }
 0xa43   : > { %v1170_v37 = vpop.permute.xlu0 %1169 }
 0xa44   : > { %v4453_v40 = vadd.f32 %v1170_v37, %v1162_v38 }
 0xa9e   : > { %v1500_v54 = vpop.f32.mrb[24].mxu0 }
 0xa9f   : > { %v1501_v56 = vadd.f32 %v1500_v54, %v1442_v36  ;;  %v3033_v58 = vpop.f32.mrb[25].mxu0 }
 0xaa0   : > { %v1503_v42 = vpop.f32.mrb[26].mxu0 }
 0xaa1   : > { %v1514_v62 = vadd.f32 %v2815_v55, %v1501_v56  ;;  %v3034_v26 = vpop.f32.mrb[27].mxu0  ;;  %v2817_v56 = vcombine.low %v4252_v14, %v4254_v15 }
 0xaa2   : > { %v2818_v26 = vcombine.low %v4256_v16, %v4258_v17 }
 0xaa3   : > { %3289 = vtanh.f32 %v1514_v62  ;;  %v2816_v33 = vmul.f32 -1.442695, %v1514_v62  ;;  %3044 = vmatpush3.bf16.msra.mxu1 %v2817_v56  ;;  %3036 = vmatpush3.bf16.msra.mxu0 %v2817_v56 }
 0xaa4   : > { %3291 = vrcp.f32 %v790_v59  ;;  %3045 = vmatprep.subr.bf16.mxu1 %v4869_v44  ;;  %3037 = vmatprep.subr.bf16.mxu0 %v4869_v44 }
 0xaa5   : > { %3293 = vpow2.f32 %v2816_v33 }
 0xaa7   : > { %3046 = vmatpush3.bf16.msra.mxu1 %v2818_v26  ;;  %3038 = vmatpush3.bf16.msra.mxu0 %v2818_v26 }
 0xaa8   : > { %3051 = vmatprep.subr.bf16.mxu0 %v4869_v44  ;;  %3059 = vmatprep.subr.bf16.mxu1 %v4869_v44 }
 0xaad   : > { %v3290_v27 = vpop.eup %3289 }
 0xaae   : > { %1528 = vrot.lane.b32.xlu1 %v3290_v27, %s3845_s11  ;;  %v3292_v31 = vpop.eup %3291 }
 0xaaf   : > { %v803_v32 = vmul.f32 %v3292_v31, %v801_v30  ;;  %v3294_v61 = vpop.eup %3293  ;;  %v798_v50 = vmul.f32 %v3292_v31, %v4447_v34 }
 0xab0   : > { %v1518_v36 = vadd.f32 1.0, %v3294_v61 }
 0xab2   : > { %805 = vrot.lane.b32.xlu1 %v803_v32, %s3846_s23  ;;  %3295 = vrcp.f32 %v1518_v36 }
 0xab3   : > { %3297 = vtanh.f32 %v4453_v40 }
 0xab6   : > { %1523 = vrot.lane.b32.xlu1 %v1380_v52, %s3846_s23 }
 0xabc   : > { %v3296_v41 = vpop.eup %3295 }
 0xabd   : > { %v3298_v55 = vpop.eup %3297 }
 0xb20   : > { %v1529_v47 = vpop.permute.xlu1 %1528 }
 0xb21   : > { %v1531_v48 = vmul.f32 %v3296_v41, %v1529_v47 }
 0xb23   : > { %1533 = vrot.lane.b32.xlu1 %v1531_v48, %s3846_s23 }
 0xb24   : > { %v806_v53 = vpop.permute.xlu1 %805 }
 0xb25   : > { %v4458_v54 = vadd.f32 %v806_v53, %v798_v50  ;;  %v1811_v50 = vld [vmem:[#allocation10] sm:$0x3]  ;;  %v3847_v53 = vmov 1966171168  }
 0xb27   : > { %3299 = vtanh.f32 %v4458_v54  ;;  %1175 = vrot.lane.b32.xlu1 %v3298_v55, %s3845_s11  ;;  %v1620_v55 = vunpack.c.l.s4 %v3847_v53 }
 0xb28   : > { %v4467_v42 = vpop.permute.xlu1 %1523 }
 0xb29   : > { %v1526_v59 = vmul.f32 %v3296_v41, %v4467_v42 }
 0xb31   : > { %v3300_v58 = vpop.eup %3299 }
 0xb32   : > { %811 = vrot.lane.b32.xlu0 %v3300_v58, %s3845_s11  ;;  %v1829_v58 = vsel %vm384_vm2, %v1811_v50, 0 }
 0xb95   : > { %v1534_v62 = vpop.permute.xlu1 %1533 }
 0xb96   : > { %v4472_v27 = vadd.f32 %v1534_v62, %v1526_v59  ;;  %v1812_v59 = vld [vmem:[#allocation10 + $0x2] sm:$0x3] }
 0xb97   : > { %v1875_v62 = vsel %vm384_vm2, %v1812_v59, 0 }
 0xb98   : > { %3301 = vtanh.f32 %v4472_v27 }
 0xb99   : > { %v1176_v30 = vpop.permute.xlu1 %1175 }
 0xb9a   : > { %v4478_v32 = vmul.f32 %v4440_v43, %v1176_v30 }
 0xb9c   : > { %v1643_v61 = vpack.c.bf16 %v4478_v32, %v4478_v32 }
 0xba2   : > { %v3302_v52 = vpop.eup %3301 }
 0xba3   : > { %1539 = vrot.lane.b32.xlu0 %v3302_v52, %s3845_s11 }
 0xba4   : > { %v812_v33 = vpop.permute.xlu0 %811 }
 0xba5   : > { %v4483_v36 = vmul.f32 %v3292_v31, %v812_v33 }
 0xba7   : > { %v1559_v37 = vpack.c.bf16 %v4483_v36, %v4483_v36  ;;  %1645 = vrot.lane.b32.xlu0 %v1643_v61, %s3846_s23 }
 0xba9   : > { %1561 = vrot.lane.b32.xlu1 %v1559_v37, %s3846_s23 }
 0xc15   : > { %v1540_v38 = vpop.permute.xlu0 %1539 }
 0xc16   : > { %v4489_v47 = vmul.f32 %v3296_v41, %v1540_v38 }
 0xc18   : > { %v1713_v43 = vpack.c.bf16 %v4489_v47, %v4489_v47 }
 0xc19   : > { %v4493_v48 = vpop.permute.xlu0 %1645 }
 0xc1a   : > { %1715 = vrot.lane.b32.xlu1 %v1713_v43, %s3846_s23  ;;  %3048 = vmatmul.mubr.msk.bf16.vlgmr.msra.gmra.mrb[20].mxu1 %vm384_vm2, %v4493_v48 }
 0xc1b   : > { %v4498_v31 = vpop.permute.xlu1 %1561  ;;  %3061 = vmatprep.mubr.msk.bf16.mxu1 %vm3843_vm1, %v4869_v44  ;;  %3060 = vmatpush3.bf16.xpose.msra.mxu1 %v1829_v58 }
 0xc1c   : > { %3040 = vmatmul.mubr.msk.bf16.vlgmr.msra.gmra.mrb[28].mxu0 %vm384_vm2, %v4498_v31  ;;  %3071 = vmatprep.subr.bf16.mxu1 %v4869_v44 }
 0xc1d   : > { %3052 = vmatpush3.bf16.msra.mxu0 %v2817_v56  ;;  %3055 = vmatprep.mubr.msk.bf16.mxu0 %vm3843_vm1, %v4869_v44  ;;  %v1622_v56 = vlaneseq }
 0xc1e   : > { %3053 = vmatprep.subr.bf16.mxu0 %v4869_v44 }
 0xc1f   : > { %v1623_v30 = vshrl.u32 %v1622_v56, 7 }
 0xc21   : > { %3054 = vmatpush3.bf16.msra.mxu0 %v2818_v26  ;;  %v1621_v26 = vunpack.c.0.s8 %v1620_v55  ;;  %v1785_v37 = vsub.s32 0, %v1623_v30 }
 0xc22   : > { %3065 = vmatprep.subr.bf16.mxu0 %v4869_v44 }
 0xc23   : > { %v1624_v52 = vsub.s32 %v1621_v26, %v1623_v30 }
 0xc8c   : > { %v4508_v41 = vpop.permute.xlu1 %1715 }
 0xc8d   : > { %3056 = vmatmul.mubr.msk.bf16.vlgmr.msra.gmra.mrb[32].mxu0 %vm384_vm2, %v4508_v41 }
 0xc8e   : > { %3067 = vmatprep.mubr.msk.bf16.mxu0 %vm3843_vm1, %v4869_v44  ;;  %3066 = vmatpush3.bf16.xpose.msra.mxu0 %v1875_v62 }
 0xc8f   : > { %3079 = vmatprep.subr.bf16.mxu0 %v4869_v44 }
 0xced   : > { %v1684_v33 = vpop.f32.mrb[20].mxu1 }
 0xcee   : > { %v1697_v61 = vrot.slane %v1684_v33, %v1624_v52  ;;  %v3049_v38 = vpop.f32.mrb[21].mxu1 }
 0xcef   : > { %v1612_v43 = vpop.f32.mrb[28].mxu0  ;;  %v1687_v53 = vpop.f32.mrb[22].mxu1 }
 0xcf0   : > { %v1698_v6 = vcombine.high %v1697_v61, %v1697_v61  ;;  %v1705_v50 = vrot.slane %v1697_v61, %v1624_v52  ;;  %v1625_v58 = vrot.slane %v1612_v43, %v1624_v52  ;;  %v3041_v7 = vpop.f32.mrb[29].mxu0  ;;  %v3050_v8 = vpop.f32.mrb[23].mxu1 }
 0xcf1   : > { %v1615_v59 = vpop.f32.mrb[30].mxu0  ;;  %v3251_v7 = vld [vmem:[#allocation8] sm:$0xff]  }
 0xcf2   : > { %v1712_v9 = vrot.slane %v1698_v6, %v1624_v52  ;;  %v1786_v62 = vrot.slane %v1705_v50, %v1785_v37  ;;  %v1626_v55 = vcombine.high %v1625_v58, %v1625_v58  ;;  %v1633_v56 = vrot.slane %v1625_v58, %v1624_v52  ;;  %v3042_v10 = vpop.f32.mrb[31].mxu0  ;;  %v3252_v6 = vld [vmem:[#allocation8 + $0xc] sm:$0xff]  }
 0xcf4   : > { %v1790_v44 = vrot.slane %v1712_v9, %v1785_v37  ;;  %v1640_v26 = vrot.slane %v1626_v55, %v1624_v52  ;;  %v1804_v11 = vsel %vm1803_vm3, %v1633_v56, %v1786_v62  ;;  %v1999_v9 = vsel %vm384_vm2, %v3251_v7, 0 }
 0xcf5   : > { %v2059_v62 = vsel %vm384_vm2, %v3252_v6, 0 }
 0xcf6   : > { %v1805_v33 = vsel %vm1803_vm3, %v1640_v26, %v1790_v44 }
 0xd60   : > { %v1754_v30 = vpop.f32.mrb[32].mxu0 }
 0xd61   : > { %v1767_v38 = vrot.slane %v1754_v30, %v1624_v52  ;;  %v3057_v12 = vpop.f32.mrb[33].mxu0 }
 0xd62   : > { %v1757_v53 = vpop.f32.mrb[34].mxu0 }
 0xd63   : > { %v1768_v13 = vcombine.high %v1767_v38, %v1767_v38  ;;  %v1775_v61 = vrot.slane %v1767_v38, %v1624_v52  ;;  %v3058_v43 = vpop.f32.mrb[35].mxu0 }
 0xd65   : > { %v1782_v8 = vrot.slane %v1768_v13, %v1624_v52  ;;  %v1796_v59 = vrot.slane %v1775_v61, %v1785_v37  ;;  %v4900_v13 = vmov 0.0   ;;  %v4532_v52 = vld [vmem:[#allocation8 + $0x14] ss:$0 sps:$4 sm:$0x33]  }
 0xd66   : > { %v2062_v55 = vsel %vm384_vm2, %v4532_v52, 0 }
 0xd67   : > { %v1800_v50 = vrot.slane %v1782_v8, %v1785_v37  ;;  %v1807_v58 = vsel %vm1806_vm4, %v1804_v11, %v1796_v59  ;;  %v4528_v11 = vld [vmem:[#allocation8 + $0x8] ss:$0 sps:$4 sm:$0x33]  }
 0xd68   : > { %v1809_v10 = vpack.c.bf16 %v1807_v58, %v1807_v58  ;;  %v2002_v37 = vsel %vm384_vm2, %v4528_v11, 0 }
 0xd69   : > { %v1808_v44 = vsel %vm1806_vm4, %v1805_v33, %v1800_v50 }
 0xd6a   : > { %1985 = vrot.lane.b32.xlu1 %v1809_v10, %s3848_s4  ;;  %3062 = vmatmul.mubr.msk.bf16.vlgmr.msra.gmra.mrb[24].mxu1 %vm384_vm2, %v1809_v10  ;;  %v1810_v12 = vpack.c.bf16 %v1808_v44, %v1808_v44 }
 0xd6b   : > { %3072 = vmatpush3.bf16.xpose.msra.mxu1 %v1999_v9  ;;  %3075 = vmatprep.mubr.msk.bf16.mxu1 %vm3843_vm1, %v4900_v13 }
 0xd6c   : > { %2045 = vrot.lane.b32.xlu0 %v1810_v12, %s3848_s4  ;;  %3068 = vmatmul.mubr.msk.bf16.vlgmr.msra.gmra.mrb[36].mxu0 %vm384_vm2, %v1810_v12 }
 0xd6d   : > { %3080 = vmatpush3.bf16.xpose.msra.mxu0 %v2059_v62  ;;  %3073 = vmatprep.subr.bf16.mxu1 %v4900_v13 }
 0xd6e   : > { %3081 = vmatprep.subr.bf16.mxu0 %v4900_v13  ;;  %3083 = vmatprep.mubr.msk.bf16.mxu0 %vm3843_vm1, %v4900_v13 }
 0xd73   : > { %3074 = vmatpush3.bf16.xpose.msra.mxu1 %v2002_v37 }
 0xd74   : > { %3087 = vmatprep.subr.bf16.mxu1 %v4900_v13 }
 0xd75   : > { %3082 = vmatpush3.bf16.xpose.msra.mxu0 %v2062_v55 }
 0xd76   : > { %3095 = vmatprep.subr.bf16.mxu0 %v4900_v13 }
 0xddc   : > { %v1986_v56 = vpop.permute.xlu1 %1985 }
 0xddd   : > { %3076 = vmatmul.mubr.msk.bf16.vlgmr.msra.gmra.mrb[28].mxu1 %vm384_vm2, %v1986_v56 }
 0xdde   : > { %v2046_v26 = vpop.permute.xlu0 %2045  ;;  %3088 = vmatpush3.bf16.msra.mxu1 %v3251_v7  ;;  %3091 = vmatprep.mubr.msk.bf16.mxu1 %vm3843_vm1, %v4900_v13 }
 0xddf   : > { %3084 = vmatmul.mubr.msk.bf16.vlgmr.msra.gmra.mrb[40].mxu0 %vm384_vm2, %v2046_v26  ;;  %3089 = vmatprep.subr.bf16.mxu1 %v4900_v13 }
 0xde0   : > { %3096 = vmatpush3.bf16.msra.mxu0 %v3252_v6  ;;  %3099 = vmatprep.mubr.msk.bf16.mxu0 %vm3843_vm1, %v4900_v13 }
 0xde1   : > { %3097 = vmatprep.subr.bf16.mxu0 %v4900_v13 }
 0xe3d   : > { %v1865_v33 = vpop.f32.mrb[24].mxu1 }
 0xe3e   : > { %v1866_v30 = vadd.f32 %v4224_v0, %v1865_v33  ;;  %v3063_v38 = vpop.f32.mrb[25].mxu1 }
 0xe3f   : > { %v1868_v53 = vpop.f32.mrb[26].mxu1  ;;  %v1911_v61 = vpop.f32.mrb[36].mxu0 }
 0xe40   : > { %v1912_v43 = vadd.f32 %v4226_v1, %v1911_v61  ;;  %v3064_v7 = vpop.f32.mrb[27].mxu1  ;;  %v3069_v8 = vpop.f32.mrb[37].mxu0  ;;  %v1918_v59 = vsel %vm1917_vm5, %v1866_v30, -inf }
 0xe41   : > { %1919 = vmax.xlane.f32.xlu1 %v1918_v59  ;;  %v1914_v6 = vpop.f32.mrb[38].mxu0 }
 0xe42   : > { %v3070_v50 = vpop.f32.mrb[39].mxu0  ;;  %v1921_v58 = vsel %vm1917_vm5, %v1912_v43, -inf }
 0xe43   : > { %1922 = vmax.xlane.f32.xlu0 %v1921_v58 }
 0xeb0   : > { %v2038_v10 = vpop.f32.mrb[28].mxu1 }
 0xeb1   : > { %v3077_v9 = vpop.f32.mrb[29].mxu1  ;;  %v2039_v26 = vadd.f32 %v4228_v2, %v2038_v10 }
 0xeb2   : > { %v2041_v44 = vpop.f32.mrb[30].mxu1  ;;  %v2098_v12 = vpop.f32.mrb[40].mxu0 }
 0xeb3   : > { %v2099_v62 = vadd.f32 %v4230_v3, %v2098_v12  ;;  %v3078_v37 = vpop.f32.mrb[31].mxu1  ;;  %v3085_v55 = vpop.f32.mrb[41].mxu0  ;;  %v2105_v53 = vsel %vm2104_vm6, %v2039_v26, -inf }
 0xeb4   : > { %v2101_v56 = vpop.f32.mrb[42].mxu0 }
 0xeb5   : > { %v3086_v33 = vpop.f32.mrb[43].mxu0  ;;  %v2108_v38 = vsel %vm2104_vm6, %v2099_v62, -inf }
 0xeb6   : > { %2109 = vmax.xlane.f32.xlu0 %v2108_v38 }
 0xeba   : > { %2106 = vmax.xlane.f32.xlu0 %v2105_v53 }
 0xece   : > { %v1920_v61 = vpop.xlane.xlu1 %1919 }
 0xecf   : > { %v1924_v7 = vsub.f32 %v1866_v30, %v1920_v61 }
 0xed0   : > { %v1923_v8 = vpop.xlane.xlu0 %1922 }
 0xed1   : > { %v1926_v59 = vmul.f32 1.442695, %v1924_v7  ;;  %v1925_v6 = vsub.f32 %v1912_v43, %v1923_v8 }
 0xed3   : > { %3303 = vpow2.f32 %v1926_v59  ;;  %v1928_v50 = vmul.f32 1.442695, %v1925_v6 }
 0xed5   : > { %3305 = vpow2.f32 %v1928_v50 }
 0xedd   : > { %v3304_v58 = vpop.eup %3303 }
 0xede   : > { %v1930_v9 = vsel %vm1917_vm5, %v3304_v58, 0.0 }
 0xedf   : > { %v3306_v44 = vpop.eup %3305  ;;  %1931 = vadd.xlane.f32.xlu0 %v1930_v9 }
 0xee0   : > { %v1933_v10 = vsel %vm1917_vm5, %v3306_v44, 0.0 }
 0xee1   : > { %1934 = vadd.xlane.f32.xlu1 %v1933_v10 }
 0xf43   : > { %v2110_v12 = vpop.xlane.xlu0 %2109 }
 0xf44   : > { %v2112_v37 = vsub.f32 %v2099_v62, %v2110_v12 }
 0xf46   : > { %v2115_v55 = vmul.f32 1.442695, %v2112_v37 }
 0xf47   : > { %v2107_v56 = vpop.xlane.xlu0 %2106 }
 0xf48   : > { %3307 = vpow2.f32 %v2115_v55  ;;  %v2111_v30 = vsub.f32 %v2039_v26, %v2107_v56 }
 0xf4a   : > { %v2113_v33 = vmul.f32 1.442695, %v2111_v30 }
 0xf4c   : > { %3309 = vpow2.f32 %v2113_v33 }
 0xf52   : > { %v4560_v43 = vpop.eup %3307 }
 0xf53   : > { %2176 = vrot.lane.b32.xlu0 %v4560_v43, %s3849_s30  ;;  %v2121_v7 = vsel %vm2117_vm7, %v4560_v43, 0.0 }
 0xf56   : > { %v4563_v38 = vpop.eup %3309 }
 0xf57   : > { %2174 = vrot.lane.b32.xlu0 %v4563_v38, %s3849_s30  ;;  %2144 = vrot.lane.b32.xlu1 %v4563_v38, %s3850_s1  ;;  %v2118_v53 = vsel %vm2117_vm7, %v4563_v38, 0.0 }
 0xf5b   : > { %2146 = vrot.lane.b32.xlu1 %v4560_v43, %s3850_s1 }
 0xf5f   : > { %2206 = vrot.lane.b32.xlu1 %v4560_v43, %s3851_s9 }
 0xf63   : > { %2204 = vrot.lane.b32.xlu1 %v4563_v38, %s3851_s9 }
 0xf6c   : > { %v1932_v62 = vpop.xlane.xlu0 %1931 }
 0xf6e   : > { %v1935_v26 = vpop.xlane.xlu1 %1934 }
 0xf6f   : > { %3311 = vrcp.f32 %v1935_v26 }
 0xf70   : > { %3313 = vrcp.f32 %v1932_v62 }
 0xf76   : > { %2119 = vadd.xlane.f32.xlu0 %v2118_v53 }
 0xf79   : > { %v3312_v61 = vpop.eup %3311 }
 0xf7a   : > { %2122 = vadd.xlane.f32.xlu0 %v2121_v7  ;;  %v1939_v8 = vmul.f32 %v3312_v61, %v3306_v44  ;;  %v3314_v59 = vpop.eup %3313 }
 0xf7b   : > { %v1938_v9 = vmul.f32 %v3314_v59, %v3304_v58 }
 0xf7c   : > { %v1953_v6 = vmul.f32 %v4234_v5, %v1939_v8  ;;  %v3852_v8 = vmov 1  }
 0xf7d   : > { %v1952_v10 = vmul.f32 %v4232_v4, %v1938_v9  ;;  %3222 = vset.pattern.permute.xlu0 %v3852_v8 }
 0xf7e   : > { %v1957_v50 = vsel %vm1917_vm5, %v1953_v6, 0.0 }
 0xf7f   : > { %1958 = vadd.xlane.f32.xlu0 %v1957_v50  ;;  %v1954_v12 = vsel %vm1917_vm5, %v1952_v10, 0.0 }
 0xf87   : > { %1955 = vadd.xlane.f32.xlu1 %v1954_v12 }
 0xfc5   : > { %v2177_v37 = vpop.permute.xlu0 %2176 }
 0xfc6   : > { %v2183_v33 = vsel %vm2117_vm7, %v2177_v37, 0.0 }
 0xfc9   : > { %v2145_v55 = vpop.permute.xlu1 %2144  ;;  %v2175_v62 = vpop.permute.xlu0 %2174 }
 0xfca   : > { %v2150_v56 = vsel %vm2117_vm7, %v2145_v55, 0.0  ;;  %v2180_v53 = vsel %vm2117_vm7, %v2175_v62, 0.0 }
 0xfcb   : > { %2151 = vadd.xlane.f32.xlu1 %v2150_v56 }
 0xfcd   : > { %v2147_v30 = vpop.permute.xlu1 %2146 }
 0xfce   : > { %v2153_v44 = vsel %vm2117_vm7, %v2147_v30, 0.0 }
 0xfcf   : > { %2154 = vadd.xlane.f32.xlu0 %v2153_v44  ;;  %2184 = vadd.xlane.f32.xlu1 %v2183_v33 }
 0xfd1   : > { %v2207_v58 = vpop.permute.xlu1 %2206 }
 0xfd2   : > { %v2213_v26 = vsel %vm2117_vm7, %v2207_v58, 0.0 }
 0xfd3   : > { %2214 = vadd.xlane.f32.xlu0 %v2213_v26  ;;  %2181 = vadd.xlane.f32.xlu1 %v2180_v53 }
 0xfd5   : > { %v2205_v61 = vpop.permute.xlu1 %2204 }
 0xfd6   : > { %v2210_v7 = vsel %vm2117_vm7, %v2205_v61, 0.0 }
 0xfd7   : > { %2211 = vadd.xlane.f32.xlu0 %v2210_v7 }
0x1003   : > { %v2120_v59 = vpop.xlane.xlu0 %2119 }
0x1004   : > { %v2124_v56 = vadd.f32 1e-09, %v2120_v59 }
0x1007   : > { %v2123_v50 = vpop.xlane.xlu0 %2122 }
0x1008   : > { %v2125_v12 = vadd.f32 1e-09, %v2123_v50 }
0x100c   : > { %v1959_v9 = vpop.xlane.xlu0 %1958 }
0x100d   : > { %v1961_v37 = vadd.f32 1e-09, %v1959_v9 }
0x100f   : > { %3315 = vrcp.f32 %v1961_v37 }
0x1010   : > { %3317 = vrcp.f32 %v2125_v12 }
0x1014   : > { %v1956_v55 = vpop.xlane.xlu1 %1955 }
0x1015   : > { %v1960_v30 = vadd.f32 1e-09, %v1956_v55 }
0x1017   : > { %3319 = vrcp.f32 %v1960_v30 }
0x1018   : > { %3321 = vrcp.f32 %v2124_v56 }
0x1019   : > { %v3316_v44 = vpop.eup %3315 }
0x101a   : > { %v1965_v33 = vmul.f32 %v3316_v44, %v1953_v6  ;;  %v3318_v62 = vpop.eup %3317 }
0x101c   : > { %v2129_v58 = vmul.f32 %v3318_v62, %v1965_v33 }
0x101e   : > { %2137 = vperm.xlu1 %3221, %v2129_v58  }
0x1021   : > { %v3320_v26 = vpop.eup %3319 }
0x1022   : > { %v1964_v53 = vmul.f32 %v3320_v26, %v1952_v10  ;;  %v3322_v61 = vpop.eup %3321  ;;  %v630_v26 = vstv %s629_s3 }
0x1023   : > { %vm4585_vm8 = vcmp.eq.s32.totalorder %v630_v26, 1 }
0x1024   : > { %v2128_v7 = vmul.f32 %v3322_v61, %v1964_v53 }
0x1026   : > { %2132 = vperm.xlu1 %3221, %v2128_v7  }
0x102a   : > { %3223 = vset.pattern.permute.xlu1 %v3852_v8 }
0x1058   : > { %v2152_v50 = vpop.xlane.xlu1 %2151 }
0x1059   : > { %v2156_v9 = vadd.f32 1e-09, %v2152_v50  ;;  %v3853_v50 = vmov 2  }
0x105b   : > { %3323 = vrcp.f32 %v2156_v9 }
0x105c   : > { %v2185_v12 = vpop.xlane.xlu1 %2184  ;;  %v2155_v59 = vpop.xlane.xlu0 %2154 }
0x105d   : > { %v2157_v37 = vadd.f32 1e-09, %v2155_v59  ;;  %v2187_v56 = vadd.f32 1e-09, %v2185_v12 }
0x105f   : > { %3325 = vrcp.f32 %v2157_v37 }
0x1060   : > { %v2182_v55 = vpop.xlane.xlu1 %2181  ;;  %v2215_v30 = vpop.xlane.xlu0 %2214 }
0x1061   : > { %v2186_v6 = vadd.f32 1e-09, %v2182_v55  ;;  %v2217_v10 = vadd.f32 1e-09, %v2215_v30  ;;  %v643_v55 = vsel %vm4585_vm8, %v4339_v49, %v4336_v46  ;;  %v2250_v46 = vsel %vm1806_vm4, %v4528_v11, 0 }
0x1062   : > { %3090 = vmatpush3.bf16.msra.mxu1 %v2250_v46  ;;  %v3341_v49 = vld [vmem:[#allocation2] sm:$0x3] }
0x1063   : > { %3327 = vrcp.f32 %v2186_v6  ;;  %v3854_v6 = vmov 3   ;;  %3103 = vmatprep.subr.bf16.mxu1 %v4900_v13 }
0x1064   : > { %3329 = vrcp.f32 %v2187_v56  ;;  %v2212_v58 = vpop.xlane.xlu0 %2211 }
0x1065   : > { %v3324_v44 = vpop.eup %3323  ;;  %3331 = vrcp.f32 %v2217_v10  ;;  %v2216_v61 = vadd.f32 1e-09, %v2212_v58  ;;  %v2296_v58 = vsel %vm1806_vm4, %v4532_v52, 0 }
0x1066   : > { %v2160_v62 = vmul.f32 %v3324_v44, %v1964_v53  ;;  %3098 = vmatpush3.bf16.msra.mxu0 %v2296_v58 }
0x1067   : > { %3333 = vrcp.f32 %v2216_v61  ;;  %3119 = vmatprep.subr.bf16.mxu0 %v4900_v13 }
0x1068   : > { %2164 = vperm.xlu1 %3223, %v2160_v62  }
0x1069   : > { %v3326_v8 = vpop.eup %3325 }
0x106a   : > { %v2161_v7 = vmul.f32 %v3326_v8, %v1965_v33 }
0x106c   : > { %3224 = vset.pattern.permute.xlu1 %v3853_v50  ;;  %2169 = vperm.xlu0 %3222, %v2161_v7  }
0x106d   : > { %v3328_v9 = vpop.eup %3327 }
0x106e   : > { %v2190_v59 = vmul.f32 %v3328_v9, %v1964_v53  ;;  %v3330_v37 = vpop.eup %3329 }
0x106f   : > { %v2191_v56 = vmul.f32 %v3330_v37, %v1965_v33  ;;  %v3332_v30 = vpop.eup %3331 }
0x1070   : > { %2194 = vperm.xlu1 %3224, %v2190_v59   ;;  %645 = vrot.lane.b32.xlu0 %v643_v55, %s3848_s4  ;;  %v2221_v44 = vmul.f32 %v3332_v30, %v1965_v33 }
0x1071   : > { %3226 = vset.pattern.permute.xlu0 %v3854_v6  ;;  %v3334_v10 = vpop.eup %3333 }
0x1072   : > { %v2220_v62 = vmul.f32 %v3334_v10, %v1964_v53 }
0x1074   : > { %2199 = vperm.xlu1 %3224, %v2191_v56  }
0x1078   : > { %3225 = vset.pattern.permute.xlu1 %v3854_v6 }
0x1079   : > { %2229 = vperm.xlu1 %3225, %v2221_v44  }
0x107d   : > { %2224 = vperm.xlu1 %3225, %v2220_v62   ;;  %v4614_v62 = vcombine.low %v4268_v22, %v4270_v23 }
0x1081   : > { %633 = vrot.lane.b32.xlu1 %v3341_v49, %s3848_s4 }
0x109d   : > { %v2138_v33 = vpop.permute.xlu1 %2137 }
0x109e   : > { %v2141_v11 = vmul.f32 %v4560_v43, %v2138_v33 }
0x10a5   : > { %v2133_v8 = vpop.permute.xlu1 %2132 }
0x10a6   : > { %v2140_v44 = vmul.f32 %v4563_v38, %v2133_v8 }
0x10e7   : > { %v2165_v53 = vpop.permute.xlu1 %2164 }
0x10e8   : > { %v2172_v37 = vmul.f32 %v4563_v38, %v2165_v53  ;;  %v4624_v53 = vcombine.low %v4272_v24, %v4274_v25 }
0x10ea   : > { %v2235_v49 = vsel %vm2234_vm9, %v2140_v44, %v2172_v37 }
0x10eb   : > { %v2170_v26 = vpop.permute.xlu0 %2169 }
0x10ec   : > { %v2173_v50 = vmul.f32 %v4560_v43, %v2170_v26 }
0x10ee   : > { %v2236_v55 = vsel %vm2234_vm9, %v2141_v11, %v2173_v50  ;;  %v3344_v11 = vld [vmem:[#allocation2 + $0x6] sm:$0x3] }
0x10ef   : > { %v2195_v61 = vpop.permute.xlu1 %2194  ;;  %v646_v52 = vpop.permute.xlu0 %645 }
0x10f0   : > { %648 = vst.msk [vmem:[#allocation3] sm:$0x3] %vm288_vm0, %v646_v52  ;;  %v2202_v6 = vmul.f32 %v4563_v38, %v2195_v61  ;;  %v3342_v52 = vld [vmem:[#allocation2 + $0x2] sm:$0x3] }
0x10f2   : > { %v2238_v33 = vsel %vm2237_vm11, %v2235_v49, %v2202_v6 }
0x10f3   : > { %v2200_v7 = vpop.permute.xlu1 %2199 }
0x10f4   : > { %v2203_v9 = vmul.f32 %v4560_v43, %v2200_v7 }
0x10f6   : > { %v2239_v30 = vsel %vm2237_vm11, %v2236_v55, %v2203_v9  ;;  %v3343_v9 = vld [vmem:[#allocation2 + $0x4] sm:$0x3] }
0x10f8   : > { %v2230_v59 = vpop.permute.xlu1 %2229 }
0x10f9   : > { %v2233_v56 = vmul.f32 %v4560_v43, %v2230_v59 }
0x10fb   : > { %v2242_v10 = vsel %vm2240_vm10, %v2239_v30, %v2233_v56 }
0x10fc   : > { %v2244_v58 = vpack.c.bf16 %v2242_v10, %v2242_v10  ;;  %2639 = vst.msk [vmem:[%s2637_s8 + $0x4] sm:$0x7] %vm2104_vm6, %v2242_v10  ;;  %v2225_v46 = vpop.permute.xlu1 %2224 }
0x10fd   : > { %v2232_v43 = vmul.f32 %v4563_v38, %v2225_v46 }
0x10fe   : > { %3100 = vmatmul.mubr.msk.bf16.vlgmr.msra.gmra.mrb[44].mxu0 %vm2246_vm12, %v2244_v58 }
0x10ff   : > { %v2241_v8 = vsel %vm2240_vm10, %v2238_v33, %v2232_v43  ;;  %3120 = vmatpush3.bf16.msra.mxu0 %v4614_v62  ;;  %3123 = vmatprep.mubr.msk.bf16.mxu0 %vm3843_vm1, %v4900_v13 }
0x1100   : > { %v2243_v26 = vpack.c.bf16 %v2241_v8, %v2241_v8  ;;  %2638 = vst.msk [vmem:[%s2637_s8] sm:$0x7] %vm2104_vm6, %v2241_v8  ;;  %v634_v61 = vpop.permute.xlu1 %633  ;;  %3121 = vmatprep.subr.bf16.mxu0 %v4900_v13 }
0x1101   : > { %v636_v38 = vsel %vm4585_vm8, %v4355_v63, %v634_v61  ;;  %v825_v63 = vsel %vm4585_vm8, %v4458_v54, %v4447_v34  ;;  %v2842_v34 = vcombine.low %v4264_v20, %v4266_v21 }
0x1102   : > { %3092 = vmatmul.mubr.msk.bf16.vlgmr.msra.gmra.mrb[32].mxu1 %vm2246_vm12, %v2243_v26  ;;  %638 = vrot.lane.b32.xlu1 %v636_v38, %s3846_s23 }
0x1103   : > { %3104 = vmatpush3.bf16.msra.mxu1 %v4614_v62  ;;  %3122 = vmatpush3.bf16.msra.mxu0 %v4624_v53 }
0x1104   : > { %3105 = vmatprep.subr.bf16.mxu1 %v4900_v13  ;;  %3107 = vmatprep.mubr.msk.bf16.mxu1 %vm3843_vm1, %v4900_v13 }
0x1105   : > { %3127 = vmatprep.subr.bf16.mxu0 %v4900_v13 }
0x1106   : > { %3124 = vmatmul.mubr.msk.bf16.vlgmr.msra.gmra.mrb[48].mxu0 %vm384_vm2, %v4493_v48  ;;  %816 = vrot.lane.b32.xlu1 %v3342_v52, %s3848_s4  ;;  %v2841_v48 = vcombine.low %v4260_v18, %v4262_v19 }
0x1107   : > { %3106 = vmatpush3.bf16.msra.mxu1 %v4624_v53  ;;  %3131 = vmatprep.mubr.msk.bf16.mxu0 %vm3843_vm1, %v4900_v13 }
0x1108   : > { %3111 = vmatprep.subr.bf16.mxu1 %v4900_v13  ;;  %3128 = vmatpush3.bf16.msra.mxu0 %v2841_v48 }
0x1109   : > { %3129 = vmatprep.subr.bf16.mxu0 %v4900_v13 }
0x110a   : > { %3108 = vmatmul.mubr.msk.bf16.vlgmr.msra.gmra.mrb[36].mxu1 %vm384_vm2, %v4498_v31  ;;  %827 = vrot.lane.b32.xlu1 %v825_v63, %s3848_s4 }
0x110b   : > { %3115 = vmatprep.mubr.msk.bf16.mxu1 %vm3843_vm1, %v4900_v13  ;;  %3112 = vmatpush3.bf16.msra.mxu1 %v2841_v48 }
0x110c   : > { %3113 = vmatprep.subr.bf16.mxu1 %v4900_v13  ;;  %3130 = vmatpush3.bf16.msra.mxu0 %v2842_v34 }
0x110f   : > { %3114 = vmatpush3.bf16.msra.mxu1 %v2842_v34 }
0x1110   : > { %3135 = vmatprep.subr.bf16.mxu1 %v4900_v13 }
0x1174   : > { %v639_v54 = vpop.permute.xlu1 %638 }
0x1175   : > { %642 = vst.msk [vmem:[#allocation2] sm:$0x3] %vm288_vm0, %v639_v54 }
0x1178   : > { %v817_v31 = vpop.permute.xlu1 %816 }
0x1179   : > { %v819_v7 = vsel %vm4585_vm8, %v4483_v36, %v817_v31 }
0x117a   : > { %821 = vrot.lane.b32.xlu0 %v819_v7, %s3846_s23 }
0x117c   : > { %v828_v50 = vpop.permute.xlu1 %827 }
0x117d   : > { %830 = vst.msk [vmem:[#allocation3 + $0x2] sm:$0x3] %vm288_vm0, %v828_v50 }
0x117e   : > { %998 = vrot.lane.b32.xlu0 %v3343_v9, %s3848_s4 }
0x1182   : > { %1180 = vrot.lane.b32.xlu0 %v3344_v11, %s3848_s4 }
0x1186   : > { %1544 = vrot.lane.b32.xlu0 %v4418_v57, %s3848_s4 }
0x11d1   : > { %v2332_v59 = vpop.f32.mrb[44].mxu0 }
0x11d2   : > { %v2339_v37 = vpack.c.bf16 %v2332_v59, %v2332_v59  ;;  %v3101_v55 = vpop.f32.mrb[45].mxu0 }
0x11d3   : > { %v2335_v56 = vpop.f32.mrb[46].mxu0 }
0x11d4   : > { %v2395_v6 = vunpack.c.l.b16 %v2339_v37  ;;  %v3102_v36 = vpop.f32.mrb[47].mxu0 }
0x11d5   : > { %v2286_v30 = vpop.f32.mrb[32].mxu1  ;;  %v2640_v36 = vld [vmem:[#allocation4] sm:$0x3] }
0x11d6   : > { %v2338_v44 = vpack.c.bf16 %v2286_v30, %v2286_v30  ;;  %v3093_v10 = vpop.f32.mrb[33].mxu1  ;;  %v2396_v46 = vrot.slane %v2395_v6, 7  ;;  %v2584_v33 = vrot.slane %v2395_v6, 1 }
0x11d7   : > { %v2289_v58 = vpop.f32.mrb[34].mxu1 }
0x11d8   : > { %v2394_v49 = vunpack.c.l.b16 %v2338_v44  ;;  %v3094_v43 = vpop.f32.mrb[35].mxu1  ;;  %v2641_v44 = vld [vmem:[#allocation4 + $0x2] sm:$0x3] }
0x11da   : > { %v2398_v8 = vsel %vm2397_vm13, %v2396_v46, %v2394_v49  ;;  %v2496_v26 = vrot.slane %v2394_v49, 1  ;;  %v2583_v61 = vrot.slane %v2394_v49, 2 }
0x11db   : > { %v2399_v38 = vpack.c.b16 %v2398_v8, %v2398_v8 }
0x11dc   : > { %v2497_v57 = vsel %vm2397_vm13, %v2395_v6, %v2496_v26  ;;  %v2585_v52 = vsel %vm2397_vm13, %v2584_v33, %v2583_v61  ;;  %v2642_v26 = vld [vmem:[#allocation4 + $0x4] sm:$0x3] }
0x11dd   : > { %v2498_v63 = vpack.c.b16 %v2497_v57, %v2497_v57  ;;  %3116 = vmatmul.mubr.msk.bf16.vlgmr.msra.gmra.mrb[36].mxu1 %vm384_vm2, %v2399_v38  ;;  %v2586_v54 = vpack.c.b16 %v2585_v52, %v2585_v52 }
0x11de   : > { %3136 = vmatpush3.bf16.msra.mxu1 %v4614_v62  ;;  %3139 = vmatprep.mubr.msk.bf16.mxu1 %vm3843_vm1, %v4900_v13 }
0x11df   : > { %3132 = vmatmul.mubr.msk.bf16.vlgmr.msra.gmra.mrb[48].mxu0 %vm384_vm2, %v2498_v63  ;;  %3137 = vmatprep.subr.bf16.mxu1 %v4900_v13  ;;  %v2652_v63 = vld [vmem:[#allocation2] sm:$0x3] (%p341_p3) }
0x11e0   :  { %2659 = vst.msk [vmem:[#allocation34] sm:$0x3] (%p341_p3), %vm288_vm0, %v2652_v63 }
0x11e2   : > { %3138 = vmatpush3.bf16.msra.mxu1 %v4624_v53 }
0x11e3   : > { %3143 = vmatprep.subr.bf16.mxu1 %v4900_v13 }
0x11e5   : > { %3140 = vmatmul.mubr.msk.bf16.vlgmr.msra.gmra.mrb[40].mxu1 %vm384_vm2, %v4508_v41 }
0x11e6   : > { %3144 = vmatpush3.bf16.msra.mxu1 %v2841_v48  ;;  %3147 = vmatprep.mubr.msk.bf16.mxu1 %vm3843_vm1, %v4900_v13 }
0x11e7   : > { %3145 = vmatprep.subr.bf16.mxu1 %v4900_v13  ;;  %v3345_v13 = vld [vmem:[#allocation2 + $0x8] sm:$0x3] }
0x11ea   : > { %3146 = vmatpush3.bf16.msra.mxu1 %v2842_v34  ;;  %v1007_v34 = vsel %vm4585_vm8, %v4377_v60, %v4374_v28  ;;  %v1553_v28 = vsel %vm4585_vm8, %v4472_v27, %v4467_v42 }
0x11ec   : > { %v822_v62 = vpop.permute.xlu0 %821 }
0x11ed   : > { %824 = vst.msk [vmem:[#allocation2 + $0x2] sm:$0x3] %vm288_vm0, %v822_v62 }
0x11f0   : > { %v999_v31 = vpop.permute.xlu0 %998 }
0x11f1   : > { %3148 = vmatmul.mubr.msk.bf16.vlgmr.msra.gmra.mrb[40].mxu1 %vm384_vm2, %v2586_v54  ;;  %v1001_v53 = vsel %vm4585_vm8, %v4388_v39, %v999_v31  ;;  %v1189_v39 = vsel %vm4585_vm8, %v4453_v40, %v4449_v35 }
0x11f2   : > { %1003 = vrot.lane.b32.xlu1 %v1001_v53, %s3846_s23 }
0x11f4   : > { %v1181_v41 = vpop.permute.xlu0 %1180  ;;  %v2653_v62 = vld [vmem:[#allocation2 + $0x2] sm:$0x3] (%p341_p3) }
0x11f5   : > { %v1183_v48 = vsel %vm4585_vm8, %v4478_v32, %v1181_v41  ;;  %v1371_v32 = vsel %vm4585_vm8, %v4412_v51, %v4409_v45  ;;  %2660 = vst.msk [vmem:[#allocation34 + $0x2] sm:$0x3] (%p341_p3), %vm288_vm0, %v2653_v62  ;;  %v2665_v41 = vld [vmem:[#allocation3] sm:$0x3] (%p341_p3) }
0x11f6   : > { %1362 = vrot.lane.b32.xlu1 %v3345_v13, %s3848_s4  ;;  %1185 = vrot.lane.b32.xlu0 %v1183_v48, %s3846_s23  ;;  %v2666_v48 = vld [vmem:[#allocation3 + $0x2] sm:$0x3] (%p341_p3)  ;;  %2671 = vst.msk [vmem:[#allocation35] sm:$0x3] (%p341_p3), %vm288_vm0, %v2665_v41 }
0x11f7   :  { %2672 = vst.msk [vmem:[#allocation35 + $0x2] sm:$0x3] (%p341_p3), %vm288_vm0, %v2666_v48 }
0x11f8   : > { %v1545_v60 = vpop.permute.xlu0 %1544 }
0x11f9   : > { %v1547_v42 = vsel %vm4585_vm8, %v4489_v47, %v1545_v60 }
0x11fa   : > { %1009 = vrot.lane.b32.xlu1 %v1007_v34, %s3848_s4 }
0x11fe   : > { %1191 = vrot.lane.b32.xlu1 %v1189_v39, %s3848_s4 }
0x1202   : > { %1373 = vrot.lane.b32.xlu1 %v1371_v32, %s3848_s4 }
0x1206   : > { %1555 = vrot.lane.b32.xlu1 %v1553_v28, %s3848_s4 }
0x1264   : > { %v1004_v7 = vpop.permute.xlu1 %1003 }
0x1265   : > { %1006 = vst.msk [vmem:[#allocation2 + $0x4] sm:$0x3] %vm288_vm0, %v1004_v7 }
0x1268   : > { %v1186_v35 = vpop.permute.xlu0 %1185  ;;  %v1363_v40 = vpop.permute.xlu1 %1362 }
0x1269   : > { %1188 = vst.msk [vmem:[#allocation2 + $0x6] sm:$0x3] %vm288_vm0, %v1186_v35  ;;  %v1365_v45 = vsel %vm4585_vm8, %v4429_v29, %v1363_v40 }
0x126a   : > { %1367 = vrot.lane.b32.xlu0 %v1365_v45, %s3846_s23 }
0x126c   : > { %v1010_v51 = vpop.permute.xlu1 %1009  ;;  %v2654_v54 = vld [vmem:[#allocation2 + $0x4] sm:$0x3] (%p341_p3) }
0x126d   : > { %1012 = vst.msk [vmem:[#allocation3 + $0x4] sm:$0x3] %vm288_vm0, %v1010_v51  ;;  %2661 = vst.msk [vmem:[#allocation34 + $0x4] sm:$0x3] (%p341_p3), %vm288_vm0, %v2654_v54 }
0x126e   : > { %1549 = vrot.lane.b32.xlu0 %v1547_v42, %s3846_s23 }
0x1270   : > { %v1192_v27 = vpop.permute.xlu1 %1191  ;;  %v2655_v12 = vld [vmem:[#allocation2 + $0x6] sm:$0x3] (%p341_p3) }
0x1271   : > { %1194 = vst.msk [vmem:[#allocation3 + $0x6] sm:$0x3] %vm288_vm0, %v1192_v27  ;;  %2662 = vst.msk [vmem:[#allocation34 + $0x6] sm:$0x3] (%p341_p3), %vm288_vm0, %v2655_v12 }
0x1274   : > { %v1374_v50 = vpop.permute.xlu1 %1373  ;;  %v2667_v0 = vld [vmem:[#allocation3 + $0x4] sm:$0x3] (%p341_p3) }
0x1275   : > { %1376 = vst.msk [vmem:[#allocation3 + $0x8] sm:$0x3] %vm288_vm0, %v1374_v50  ;;  %2673 = vst.msk [vmem:[#allocation35 + $0x4] sm:$0x3] (%p341_p3), %vm288_vm0, %v2667_v0 }
0x1278   : > { %v1556_v9 = vpop.permute.xlu1 %1555  ;;  %v2668_v1 = vld [vmem:[#allocation3 + $0x6] sm:$0x3] (%p341_p3) }
0x1279   : > { %1558 = vst.msk [vmem:[#allocation3 + $0xa] sm:$0x3] %vm288_vm0, %v1556_v9  ;;  %2674 = vst.msk [vmem:[#allocation35 + $0x6] sm:$0x3] (%p341_p3), %vm288_vm0, %v2668_v1 }
0x127c   :  { %v2669_v2 = vld [vmem:[#allocation3 + $0x8] sm:$0x3] (%p341_p3) }
0x127d   :  { %2675 = vst.msk [vmem:[#allocation35 + $0x8] sm:$0x3] (%p341_p3), %vm288_vm0, %v2669_v2 }
0x1280   :  { %v2670_v3 = vld [vmem:[#allocation3 + $0xa] sm:$0x3] (%p341_p3) }
0x1281   :  { %2676 = vst.msk [vmem:[#allocation35 + $0xa] sm:$0x3] (%p341_p3), %vm288_vm0, %v2670_v3 }
0x12b0   : > { %v2449_v29 = vpop.f32.mrb[36].mxu1 }
0x12b1   : > { %3335 = vtanh.f32 %v2449_v29  ;;  %v3117_v11 = vpop.f32.mrb[37].mxu1 }
0x12b2   : > { %v2452_v59 = vpop.f32.mrb[38].mxu1  ;;  %v2536_v37 = vpop.f32.mrb[48].mxu0 }
0x12b3   : > { %3337 = vtanh.f32 %v2536_v37  ;;  %v3118_v55 = vpop.f32.mrb[39].mxu1  ;;  %v3133_v47 = vpop.f32.mrb[49].mxu0 }
0x12b4   : > { %v2539_v56 = vpop.f32.mrb[50].mxu0 }
0x12b5   : > { %v3134_v6 = vpop.f32.mrb[51].mxu0 }
0x12bb   : > { %v3336_v30 = vpop.eup %3335 }
0x12bc   : > { %2633 = vst.msk [vmem:[%s2632_s12] sm:$0x3] %vm288_vm0, %v3336_v30  ;;  %v2643_v10 = vsel %vm4585_vm8, %v3336_v30, %v2640_v36 }
0x12bd   : > { %v3338_v58 = vpop.eup %3337  ;;  %2646 = vst.msk [vmem:[#allocation4] sm:$0x3] %vm288_vm0, %v2643_v10 }
0x12be   : > { %2634 = vst.msk [vmem:[%s2632_s12 + $0x2] sm:$0x3] %vm288_vm0, %v3338_v58  ;;  %v2644_v46 = vsel %vm4585_vm8, %v3338_v58, %v2641_v44 }
0x12bf   : > { %2647 = vst.msk [vmem:[#allocation4 + $0x2] sm:$0x3] %vm288_vm0, %v2644_v46 }
0x12c4   : > { %v2624_v49 = vpop.f32.mrb[40].mxu1 }
0x12c5   : > { %3339 = vtanh.f32 %v2624_v49  ;;  %v3149_v43 = vpop.f32.mrb[41].mxu1 }
0x12c6   : > { %v2627_v33 = vpop.f32.mrb[42].mxu1 }
0x12c7   : > { %v3150_v8 = vpop.f32.mrb[43].mxu1 }
0x12cf   : > { %v3340_v61 = vpop.eup %3339 }
0x12d0   : > { %2635 = vst.msk [vmem:[%s2632_s12 + $0x4] sm:$0x3] %vm288_vm0, %v3340_v61  ;;  %v2645_v38 = vsel %vm4585_vm8, %v3340_v61, %v2642_v26 }
0x12d1   : > { %2648 = vst.msk [vmem:[#allocation4 + $0x4] sm:$0x3] %vm288_vm0, %v2645_v38 }
0x12db   :  { %343 = sbr.rel (!%p341_p3) target bundleno = 339 (0x153), region = 217 }
0x12dc   : > { %v1368_v57 = vpop.permute.xlu0 %1367 }
0x12dd   : > { %1370 = vst.msk [vmem:[#allocation2 + $0x8] sm:$0x3] %vm288_vm0, %v1368_v57 }
0x12e0   : > { %v1550_v52 = vpop.permute.xlu0 %1549 }
0x12e1   : > { %1552 = vst.msk [vmem:[#allocation2 + $0xa] sm:$0x3] %vm288_vm0, %v1550_v52 }
0x12e4   :  { %v2656_v31 = vld [vmem:[#allocation2 + $0x8] sm:$0x3] }
0x12e5   :  { %2663 = vst.msk [vmem:[#allocation34 + $0x8] sm:$0x3] %vm288_vm0, %v2656_v31 }
0x12e8   :  { %v2657_v53 = vld [vmem:[#allocation2 + $0xa] sm:$0x3] }
0x12e9   :  { %2664 = vst.msk [vmem:[#allocation34 + $0xa] sm:$0x3] %vm288_vm0, %v2657_v53 }
0x12ea   :  { %3709 = shalt.err (!%p3706_p8)
}
0x12eb   :  { %s3710_s27 = scalar_lea.hbm %s4853_s17, 384 }
0x12ec   :  { %p3711_p9 = scmp.ne.s32.totalorder %s4853_s17, %s3710_s27  ;;  %p3714_p10 = scmp.lt.u32.totalorder %s3710_s27, %s4853_s17 }
0x12ee   :  { %p3716_p11 = pnand %p3714_p10, %p3711_p9 }
0x12f0   :  { %3719 = shalt.err (!%p3716_p11)
}
0x12f1   :  { %s4903_s7 = smov 4   ;;  %s4904_s15 = smov 64  }
0x12f2   :  { %2700 = dma.vmem_to_hbm [thread:$0]  %s2695_s0, 384, %s4853_s17, [#allocation33], %s4904_s15, %s4904_s15, %s4903_s7  }
0x12f3   :  { %s3720_s11 = scalar_lea.vmem %s4762_s19, 288  ;;  %p3725_p13 = scmp.lt.s32.totalorder %s4762_s19, %s4762_s19 }
0x12f4   :  { %p3721_p12 = scmp.ne.s32.totalorder %s4762_s19, %s3720_s11  ;;  %p3726_p0 = scmp.lt.s32.totalorder %s3720_s11, %s3720_s11 }
0x12f6   :  { %p3727_p1 = por %p3726_p0, %p3725_p13 }
0x12f8   :  { %p3728_p2 = pnand %p3727_p1, %p3721_p12 }
0x12fa   :  { %3731 = shalt.err (!%p3728_p2)
}
0x12fb   :  { %s3732_s30 = scalar_lea.hbm %s4852_s16, 288 }
0x12fc   :  { %p3733_p3 = scmp.ne.s32.totalorder %s4852_s16, %s3732_s30  ;;  %p3736_p4 = scmp.lt.u32.totalorder %s3732_s30, %s4852_s16 }
0x12fe   :  { %p3738_p5 = pnand %p3736_p4, %p3733_p3 }
0x1300   :  { %3741 = shalt.err (!%p3738_p5)
}
0x1301   :  { %2688 = dma.vmem_to_hbm [thread:$0]  %s4762_s19, 288, %s4852_s16, [#allocation7], %s3830_s29, %s3830_s29, %s3831_s21  }
0x1302   :  { %s3857_s20 = smov [#allocation34]   ;;  %s3858_s5 = smov [#allocation35]  }
0x1303   :  { %s2706_s12 = sshll.u32 %s3857_s20, 4  ;;  %s2718_s0 = sshll.u32 %s3858_s5, 4  ;;  %s2707_s12 = int_to_ptr.vmem [resolvable:$true] %s2706_s12  ;;  %s4799_s0 = int_to_ptr.vmem [resolvable:$true] %s2718_s0 }
0x1304   :  { %s3742_s25 = scalar_lea.vmem %s2707_s12, 192  ;;  %p3747_p7 = scmp.lt.s32.totalorder %s2707_s12, %s2707_s12 }
0x1305   :  { %p3743_p6 = scmp.ne.s32.totalorder %s2707_s12, %s3742_s25  ;;  %p3748_p8 = scmp.lt.s32.totalorder %s3742_s25, %s3742_s25 }
0x1307   :  { %p3749_p9 = por %p3748_p8, %p3747_p7 }
0x1309   :  { %p3750_p10 = pnand %p3749_p9, %p3743_p6 }
0x130b   :  { %3753 = shalt.err (!%p3750_p10)
}
0x130c   :  { %s4905_s24 = sld [smem:[#allocation61_spill]] }
0x1312   :  { %s3754_s27 = scalar_lea.hbm %s4905_s24, 192 }
0x1313   :  { %p3755_p11 = scmp.ne.s32.totalorder %s4905_s24, %s3754_s27  ;;  %p3758_p12 = scmp.lt.u32.totalorder %s3754_s27, %s4905_s24 }
0x1315   :  { %p3760_p13 = pnand %p3758_p12, %p3755_p11 }
0x1317   :  { %3763 = shalt.err (!%p3760_p13)
}
0x1318   :  { %2712 = dma.vmem_to_hbm [thread:$0]  %s2707_s12, 192, %s4905_s24, [#allocation33], %s3830_s29, %s3830_s29, %s3831_s21  }
0x1319   :  { %s3764_s7 = scalar_lea.vmem %s4799_s0, 192  ;;  %p3769_p1 = scmp.lt.s32.totalorder %s4799_s0, %s4799_s0 }
0x131a   :  { %p3765_p0 = scmp.ne.s32.totalorder %s4799_s0, %s3764_s7  ;;  %p3770_p2 = scmp.lt.s32.totalorder %s3764_s7, %s3764_s7 }
0x131c   :  { %p3771_p3 = por %p3770_p2, %p3769_p1 }
0x131e   :  { %p3772_p4 = pnand %p3771_p3, %p3765_p0 }
0x1320   :  { %3775 = shalt.err (!%p3772_p4)
}
0x1321   :  { %s4906_s10 = sld [smem:[#allocation62_spill]] }
0x1327   :  { %s3776_s11 = scalar_lea.hbm %s4906_s10, 192 }
0x1328   :  { %p3777_p5 = scmp.ne.s32.totalorder %s4906_s10, %s3776_s11  ;;  %p3780_p6 = scmp.lt.u32.totalorder %s3776_s11, %s4906_s10 }
0x132a   :  { %p3782_p7 = pnand %p3780_p6, %p3777_p5 }
0x132c   :  { %3785 = shalt.err (!%p3782_p7)
}
0x132d   :  { %2724 = dma.vmem_to_hbm [thread:$0]  %s4799_s0, 192, %s4906_s10, [#allocation36], %s3830_s29, %s3830_s29, %s3831_s21  }
0x132e   :  { %3808 = dma.done.wait [#allocation7], 288  }
0x132f   :  { %3809 = vsyncadd [#allocation7], 4294967008 }
0x1330   :  { %3810 = dma.done.wait [#allocation33], 576  }
0x1331   :  { %3811 = vsyncadd [#allocation33], 4294966720 }
0x1332   :  { %3812 = dma.done.wait [#allocation36], 192  }
0x1333   :  { %3813 = vsyncadd [#allocation36], 4294967104 }
0x1334   :  { %2737 = vsyncpa [#allocation6], 1 }
0x1335   :  { %2738 = vsyncpa [#allocation9], 1 }
0x1336   :  { %2739 = vsyncpa [#allocation12], 1 }
0x1337   :  { %2740 = vsyncpa [#allocation15], 1 }
0x1338   :  { %2741 = vsyncpa [#allocation18], 1 }
0x1339   :  { %2742 = vsyncpa [#allocation21], 1 }
0x133a   :  { %2743 = vsyncpa [#allocation24], 1 }
0x133b   :  { %2744 = vsyncpa [#allocation27], 1 }
0x133c   :  { %2745 = vsyncpa [#allocation30], 1 }
0x133d   :  { %2746 = vsyncpa [#allocation7], 1 }
0x133e   :  { %2747 = vsyncpa [#allocation33], 1 }
0x133f   :  { %2748 = vsyncpa [#allocation36], 1 }

</bundles_post_ra>
